<compile_context>
chip_gen: v7x
topology: tpu7x:2x2x1
jax: 0.10.0
libtpu: 0.0.40
codegen_flags: <defaults>
</compile_context>

<pallas_src>
import functools

import numpy as np

import jax
import jax.numpy as jnp
from jax.experimental import pallas as pl
from jax.experimental.pallas import tpu as pltpu

BN_EPS = 0.8          # nn.BatchNorm1d(out_size, 0.8) -> eps = 0.8
LRELU_SLOPE = 0.2
LANE = 128
HIDDEN = (128, 256, 512, 1024)


# ----------------------------- kernel ---------------------------------------

def _bn_train(v, gamma, beta):
    """Training-mode BatchNorm1d over the batch axis (biased variance).

    scale/shift are computed on (1, N) vectors; only 2 full-tensor VPU ops.
    One-pass variance is safe here because eps=0.8 dominates and activations
    are O(1)."""
    mean = jnp.mean(v, axis=0, keepdims=True)
    var = jnp.mean(v * v, axis=0, keepdims=True) - mean * mean
    scale = jax.lax.rsqrt(var + BN_EPS) * gamma
    shift = beta - mean * scale
    return v * scale + shift


def _generator_kernel(labels_ref, emb_ref, noise_ref,
                      w0e_ref, w0n_ref, w1_ref, w2_ref, w3_ref, hw_ref,
                      slab_ref, o_ref, *, col_offs, col_widths):
    """Fused forward: emb-gather + 4 x (Linear -> [BN] -> LeakyReLU -> BN)
    -> Linear -> Tanh, all resident in VMEM."""
    B = noise_ref.shape[0]
    NC = emb_ref.shape[0]

    def bias_gamma_beta(i):
        lo = col_offs[i]
        hi = lo + col_widths[i]
        return (slab_ref[0:1, lo:hi],      # bias
                slab_ref[1:2, lo:hi],      # gamma
                slab_ref[2:3, lo:hi])      # beta

    # ---- fused embedding lookup: one-hot matmul (exact in bf16) ------------
    lbl = labels_ref[...]                                            # (B, 1) int32
    iota = jax.lax.broadcasted_iota(jnp.int32, (B, NC), 1)
    onehot = (iota == lbl).astype(jnp.bfloat16)                      # (B, NC)
    emb_rows = jnp.dot(onehot, emb_ref[...].astype(jnp.bfloat16),
                       preferred_element_type=jnp.float32)           # (B, NC)

    # ---- block 0 (norm=False): Linear (split at emb/noise) -> LReLU -> BN --
    b0, g0, be0 = bias_gamma_beta(0)
    y = (jnp.dot(emb_rows.astype(jnp.bfloat16), w0e_ref[...],
                 preferred_element_type=jnp.float32)
         + jnp.dot(noise_ref[...].astype(jnp.bfloat16), w0n_ref[...],
                   preferred_element_type=jnp.float32)
         + b0)
    y = jnp.maximum(y, LRELU_SLOPE * y)                              # LeakyReLU(0.2)
    x = _bn_train(y, g0, be0)                                        # trailing bn

    # ---- blocks 1..3 (norm=True): Linear -> BN -> LReLU -> BN --------------
    for i, w_ref in zip((1, 2, 3), (w1_ref, w2_ref, w3_ref)):
        b, g, be = bias_gamma_beta(i)
        y = jnp.dot(x.astype(jnp.bfloat16), w_ref[...],
                    preferred_element_type=jnp.float32) + b
        y = _bn_train(y, g, be)
        y = jnp.maximum(y, LRELU_SLOPE * y)
        x = _bn_train(y, g, be)

    # ---- head: Linear -> Tanh (lane-dense zero-padded output) --------------
    hb = slab_ref[0:1, col_offs[4]:col_offs[4] + col_widths[4]]
    y = jnp.dot(x.astype(jnp.bfloat16), hw_ref[...],
                preferred_element_type=jnp.float32) + hb
    o_ref[...] = jnp.tanh(y)


# ----------------------------- wrapper ---------------------------------------

def _slab_layout(head_pad):
    widths = tuple(HIDDEN) + (head_pad,)
    offs = tuple(int(o) for o in np.concatenate([[0], np.cumsum(widths)[:-1]]))
    return offs, widths


def generator_forward(params, noise, labels, img_shape):
    img_dim = int(np.prod(img_shape))
    B = noise.shape[0]
    head_pad = params["head_w"].shape[1]
    col_offs, col_widths = _slab_layout(head_pad)

    labels2d = labels.reshape(B, 1).astype(jnp.int32)
    noise32 = noise.astype(jnp.float32)

    kernel = functools.partial(_generator_kernel,
                               col_offs=col_offs, col_widths=col_widths)
    vmem = pl.BlockSpec(memory_space=pltpu.MemorySpace.VMEM)
    out = pl.pallas_call(
        kernel,
        out_shape=jax.ShapeDtypeStruct((B, head_pad), jnp.float32),
        in_specs=[vmem] * 10,
        out_specs=vmem,
    )(labels2d, params["emb"], noise32,
      params["w0e"], params["w0n"], params["w1"], params["w2"], params["w3"],
      params["head_w"], params["slab"])

    # glue: drop the zero-padded lanes, then img.view(B, *img_shape)
    return out[:, :img_dim].reshape((B,) + tuple(img_shape))


# ----------------------------- params ----------------------------------------

def init_generator_params(key, numclasses, latent_dim, img_shape):
    img_dim = int(np.prod(img_shape))
    head_pad = max(LANE, ((img_dim + LANE - 1) // LANE) * LANE)
    dims = [numclasses + latent_dim] + list(HIDDEN)
    params = {}

    key, k_emb = jax.random.split(key)
    # nn.Embedding default init: N(0, 1)
    params["emb"] = jax.random.normal(k_emb, (numclasses, numclasses), jnp.float32)

    ws, biases, gammas, betas = [], [], [], []
    for i in range(4):
        f_in, f_out = dims[i], dims[i + 1]
        key, kw, kb = jax.random.split(key, 3)
        bound = 1.0 / np.sqrt(f_in)
        # stored as (in, out); bf16 for HBM/MXU efficiency
        ws.append(jax.random.uniform(kw, (f_in, f_out), jnp.float32, -bound, bound
                                     ).astype(jnp.bfloat16))
        biases.append(jax.random.uniform(kb, (1, f_out), jnp.float32, -bound, bound))
        gammas.append(jnp.ones((1, f_out), jnp.float32))     # BN gamma default 1
        betas.append(jnp.zeros((1, f_out), jnp.float32))     # BN beta default 0

    # split the first-layer weight at the emb/noise boundary (no in-kernel concat)
    params["w0e"] = ws[0][:numclasses]
    params["w0n"] = ws[0][numclasses:]
    params["w1"], params["w2"], params["w3"] = ws[1], ws[2], ws[3]

    key, kw, kb = jax.random.split(key, 3)
    bound = 1.0 / np.sqrt(1024)
    hw = jax.random.uniform(kw, (1024, img_dim), jnp.float32, -bound, bound
                            ).astype(jnp.bfloat16)
    hb = jax.random.uniform(kb, (1, img_dim), jnp.float32, -bound, bound)
    # zero-pad the head to a lane-dense (multiple-of-128) width
    params["head_w"] = jnp.pad(hw, ((0, 0), (0, head_pad - img_dim)))
    head_b = jnp.pad(hb, ((0, 0), (0, head_pad - img_dim)))

    # pack all (1, f_out) params into one sublane-dense slab:
    #   row 0 = bias, row 1 = gamma, row 2 = beta
    #   columns = block0 | block1 | block2 | block3 | head (head only uses row 0)
    biases.append(head_b)
    gammas.append(jnp.ones((1, head_pad), jnp.float32))   # unused
    betas.append(jnp.zeros((1, head_pad), jnp.float32))   # unused
    params["slab"] = jnp.concatenate(
        [jnp.concatenate(biases, axis=1),
         jnp.concatenate(gammas, axis=1),
         jnp.concatenate(betas, axis=1)], axis=0)
    return params


# ----------------------------- reference (plain JAX) --------------------------

def _ref_forward(params, noise, labels, img_shape):
    img_dim = int(np.prod(img_shape))
    head_pad = params["head_w"].shape[1]
    offs, widths = _slab_layout(head_pad)
    slab = params["slab"]

    def bgb(i):
        lo, hi = offs[i], offs[i] + widths[i]
        return slab[0:1, lo:hi], slab[1:2, lo:hi], slab[2:3, lo:hi]

    def bn(v, g, be):
        m = v.mean(0, keepdims=True)
        var = ((v - m) ** 2).mean(0, keepdims=True)
        return (v - m) / jnp.sqrt(var + BN_EPS) * g + be

    emb = params["emb"][labels]
    x = jnp.concatenate([emb, noise], axis=-1).astype(jnp.float32)
    w0 = jnp.concatenate([params["w0e"], params["w0n"]], axis=0)
    ws = [w0, params["w1"], params["w2"], params["w3"]]
    norms = [False, True, True, True]
    for i, (w, norm) in enumerate(zip(ws, norms)):
        b, g, be = bgb(i)
        y = jnp.dot(x.astype(jnp.bfloat16), w,
                    preferred_element_type=jnp.float32) + b
        if norm:
            y = bn(y, g, be)
        y = jnp.where(y >= 0, y, LRELU_SLOPE * y)
        x = bn(y, g, be)
    hb, _, _ = bgb(4)
    y = jnp.tanh(jnp.dot(x.astype(jnp.bfloat16), params["head_w"],
                         preferred_element_type=jnp.float32) + hb)
    return y[:, :img_dim].reshape((y.shape[0],) + tuple(img_shape))


# ----------------------------- main -------------------------------------------

if __name__ == "__main__":
    numclasses = 10
    latent_dim = 22
    img_shape = (1, 8, 8)
    batch = 8      # raise in real use (>=128/256) to amortize the weight DMA

    key = jax.random.PRNGKey(0)
    key, k_noise, k_lab, k_par = jax.random.split(key, 4)
    noise = jax.random.normal(k_noise, (batch, latent_dim), jnp.float32)
    labels = jax.random.randint(k_lab, (batch,), 0, numclasses, jnp.int32)
    params = init_generator_params(k_par, numclasses, latent_dim, img_shape)

    out = jax.block_until_ready(generator_forward(params, noise, labels, img_shape))
    ref = jax.block_until_ready(_ref_forward(params, noise, labels, img_shape))

    assert out.shape == (batch,) + img_shape, out.shape
    assert jnp.allclose(out, ref, atol=2e-4, rtol=2e-4), \
        float(jnp.max(jnp.abs(out - ref)))

    print("KERNEL_OK")
</pallas_src>

<mosaic_0001>
module attributes {stable_mosaic.version = 11 : i64} {
  func.func @_generator_kernel(%arg0: memref<8x1xi32, #tpu.memory_space<vmem>>, %arg1: memref<10x10xf32, #tpu.memory_space<vmem>>, %arg2: memref<8x22xf32, #tpu.memory_space<vmem>>, %arg3: memref<10x128xbf16, #tpu.memory_space<vmem>>, %arg4: memref<22x128xbf16, #tpu.memory_space<vmem>>, %arg5: memref<128x256xbf16, #tpu.memory_space<vmem>>, %arg6: memref<256x512xbf16, #tpu.memory_space<vmem>>, %arg7: memref<512x1024xbf16, #tpu.memory_space<vmem>>, %arg8: memref<1024x128xbf16, #tpu.memory_space<vmem>>, %arg9: memref<3x2048xf32, #tpu.memory_space<vmem>>, %arg10: memref<8x128xf32, #tpu.memory_space<vmem>>) attributes {dimension_semantics = [], scalar_prefetch = 0 : i64, scratch_operands = 0 : i64, tpu.core_type = #tpu.core_type<tc>} {
    %c0 = arith.constant 0 : index
    %c0_0 = arith.constant 0 : index
    %0 = vector.load %arg0[%c0, %c0_0] : memref<8x1xi32, #tpu.memory_space<vmem>>, vector<8x1xi32>
    %1 = tpu.iota {dimensions = array<i32: 1>} : vector<8x10xi32>
    %2 = vector.broadcast %0 : vector<8x1xi32> to vector<8x10xi32>
    %3 = arith.cmpi eq, %1, %2 : vector<8x10xi32>
    %4 = arith.extui %3 : vector<8x10xi1> to vector<8x10xi32>
    %5 = arith.sitofp %4 : vector<8x10xi32> to vector<8x10xf32>
    %6 = arith.truncf %5 : vector<8x10xf32> to vector<8x10xbf16>
    %c0_1 = arith.constant 0 : index
    %c0_2 = arith.constant 0 : index
    %7 = vector.load %arg1[%c0_1, %c0_2] : memref<10x10xf32, #tpu.memory_space<vmem>>, vector<10x10xf32>
    %8 = arith.truncf %7 : vector<10x10xf32> to vector<10x10xbf16>
    %cst = arith.constant dense<0.000000e+00> : vector<8x10xf32>
    %9 = tpu.matmul %6, %8, %cst {dimension_numbers = #tpu.dot_dimension_numbers<[1], [0], [0], [1], [0, 0, 1, 1], [], []>} : vector<8x10xbf16>, vector<10x10xbf16>, vector<8x10xf32> -> vector<8x10xf32>
    %c0_3 = arith.constant 0 : index
    %c0_4 = arith.constant 0 : index
    %10 = vector.load %arg9[%c0_3, %c0_4] : memref<3x2048xf32, #tpu.memory_space<vmem>>, vector<1x128xf32>
    %c1 = arith.constant 1 : index
    %c0_5 = arith.constant 0 : index
    %11 = vector.load %arg9[%c1, %c0_5] : memref<3x2048xf32, #tpu.memory_space<vmem>>, vector<1x128xf32>
    %c2 = arith.constant 2 : index
    %c0_6 = arith.constant 0 : index
    %12 = vector.load %arg9[%c2, %c0_6] : memref<3x2048xf32, #tpu.memory_space<vmem>>, vector<1x128xf32>
    %13 = arith.truncf %9 : vector<8x10xf32> to vector<8x10xbf16>
    %c0_7 = arith.constant 0 : index
    %c0_8 = arith.constant 0 : index
    %14 = vector.load %arg3[%c0_7, %c0_8] : memref<10x128xbf16, #tpu.memory_space<vmem>>, vector<10x128xbf16>
    %cst_9 = arith.constant dense<0.000000e+00> : vector<8x128xf32>
    %15 = tpu.matmul %13, %14, %cst_9 {dimension_numbers = #tpu.dot_dimension_numbers<[1], [0], [0], [1], [0, 0, 1, 1], [], []>} : vector<8x10xbf16>, vector<10x128xbf16>, vector<8x128xf32> -> vector<8x128xf32>
    %c0_10 = arith.constant 0 : index
    %c0_11 = arith.constant 0 : index
    %16 = vector.load %arg2[%c0_10, %c0_11] : memref<8x22xf32, #tpu.memory_space<vmem>>, vector<8x22xf32>
    %17 = arith.truncf %16 : vector<8x22xf32> to vector<8x22xbf16>
    %c0_12 = arith.constant 0 : index
    %c0_13 = arith.constant 0 : index
    %18 = vector.load %arg4[%c0_12, %c0_13] : memref<22x128xbf16, #tpu.memory_space<vmem>>, vector<22x128xbf16>
    %cst_14 = arith.constant dense<0.000000e+00> : vector<8x128xf32>
    %19 = tpu.matmul %17, %18, %cst_14 {dimension_numbers = #tpu.dot_dimension_numbers<[1], [0], [0], [1], [0, 0, 1, 1], [], []>} : vector<8x22xbf16>, vector<22x128xbf16>, vector<8x128xf32> -> vector<8x128xf32>
    %20 = arith.addf %15, %19 : vector<8x128xf32>
    %21 = vector.broadcast %10 : vector<1x128xf32> to vector<8x128xf32>
    %22 = arith.addf %20, %21 : vector<8x128xf32>
    %cst_15 = arith.constant 2.000000e-01 : f32
    %23 = vector.broadcast %cst_15 : f32 to vector<8x128xf32>
    %24 = arith.mulf %23, %22 : vector<8x128xf32>
    %25 = arith.maximumf %22, %24 : vector<8x128xf32>
    %cst_16 = arith.constant dense<0.000000e+00> : vector<128xf32>
    %26 = vector.multi_reduction <add>, %25, %cst_16 [0] : vector<8x128xf32> to vector<128xf32>
    %27 = vector.shape_cast %26 : vector<128xf32> to vector<1x128xf32>
    %cst_17 = arith.constant 8.000000e+00 : f32
    %28 = vector.broadcast %cst_17 : f32 to vector<1x128xf32>
    %29 = arith.divf %27, %28 : vector<1x128xf32>
    %30 = arith.mulf %25, %25 : vector<8x128xf32>
    %cst_18 = arith.constant dense<0.000000e+00> : vector<128xf32>
    %31 = vector.multi_reduction <add>, %30, %cst_18 [0] : vector<8x128xf32> to vector<128xf32>
    %32 = vector.shape_cast %31 : vector<128xf32> to vector<1x128xf32>
    %cst_19 = arith.constant 8.000000e+00 : f32
    %33 = vector.broadcast %cst_19 : f32 to vector<1x128xf32>
    %34 = arith.divf %32, %33 : vector<1x128xf32>
    %35 = arith.mulf %29, %29 : vector<1x128xf32>
    %36 = arith.subf %34, %35 : vector<1x128xf32>
    %cst_20 = arith.constant 8.000000e-01 : f32
    %37 = vector.broadcast %cst_20 : f32 to vector<1x128xf32>
    %38 = arith.addf %36, %37 : vector<1x128xf32>
    %39 = math.rsqrt %38 : vector<1x128xf32>
    %40 = arith.mulf %39, %11 : vector<1x128xf32>
    %41 = arith.mulf %29, %40 : vector<1x128xf32>
    %42 = arith.subf %12, %41 : vector<1x128xf32>
    %43 = vector.broadcast %40 : vector<1x128xf32> to vector<8x128xf32>
    %44 = arith.mulf %25, %43 : vector<8x128xf32>
    %45 = vector.broadcast %42 : vector<1x128xf32> to vector<8x128xf32>
    %46 = arith.addf %44, %45 : vector<8x128xf32>
    %c0_21 = arith.constant 0 : index
    %c128 = arith.constant 128 : index
    %47 = vector.load %arg9[%c0_21, %c128] : memref<3x2048xf32, #tpu.memory_space<vmem>>, vector<1x256xf32>
    %c1_22 = arith.constant 1 : index
    %c128_23 = arith.constant 128 : index
    %48 = vector.load %arg9[%c1_22, %c128_23] : memref<3x2048xf32, #tpu.memory_space<vmem>>, vector<1x256xf32>
    %c2_24 = arith.constant 2 : index
    %c128_25 = arith.constant 128 : index
    %49 = vector.load %arg9[%c2_24, %c128_25] : memref<3x2048xf32, #tpu.memory_space<vmem>>, vector<1x256xf32>
    %50 = arith.truncf %46 : vector<8x128xf32> to vector<8x128xbf16>
    %c0_26 = arith.constant 0 : index
    %c0_27 = arith.constant 0 : index
    %51 = vector.load %arg5[%c0_26, %c0_27] : memref<128x256xbf16, #tpu.memory_space<vmem>>, vector<128x256xbf16>
    %cst_28 = arith.constant dense<0.000000e+00> : vector<8x256xf32>
    %52 = tpu.matmul %50, %51, %cst_28 {dimension_numbers = #tpu.dot_dimension_numbers<[1], [0], [0], [1], [0, 0, 1, 1], [], []>} : vector<8x128xbf16>, vector<128x256xbf16>, vector<8x256xf32> -> vector<8x256xf32>
    %53 = vector.broadcast %47 : vector<1x256xf32> to vector<8x256xf32>
    %54 = arith.addf %52, %53 : vector<8x256xf32>
    %cst_29 = arith.constant dense<0.000000e+00> : vector<256xf32>
    %55 = vector.multi_reduction <add>, %54, %cst_29 [0] : vector<8x256xf32> to vector<256xf32>
    %56 = vector.shape_cast %55 : vector<256xf32> to vector<1x256xf32>
    %cst_30 = arith.constant 8.000000e+00 : f32
    %57 = vector.broadcast %cst_30 : f32 to vector<1x256xf32>
    %58 = arith.divf %56, %57 : vector<1x256xf32>
    %59 = arith.mulf %54, %54 : vector<8x256xf32>
    %cst_31 = arith.constant dense<0.000000e+00> : vector<256xf32>
    %60 = vector.multi_reduction <add>, %59, %cst_31 [0] : vector<8x256xf32> to vector<256xf32>
    %61 = vector.shape_cast %60 : vector<256xf32> to vector<1x256xf32>
    %cst_32 = arith.constant 8.000000e+00 : f32
    %62 = vector.broadcast %cst_32 : f32 to vector<1x256xf32>
    %63 = arith.divf %61, %62 : vector<1x256xf32>
    %64 = arith.mulf %58, %58 : vector<1x256xf32>
    %65 = arith.subf %63, %64 : vector<1x256xf32>
    %cst_33 = arith.constant 8.000000e-01 : f32
    %66 = vector.broadcast %cst_33 : f32 to vector<1x256xf32>
    %67 = arith.addf %65, %66 : vector<1x256xf32>
    %68 = math.rsqrt %67 : vector<1x256xf32>
    %69 = arith.mulf %68, %48 : vector<1x256xf32>
    %70 = arith.mulf %58, %69 : vector<1x256xf32>
    %71 = arith.subf %49, %70 : vector<1x256xf32>
    %72 = vector.broadcast %69 : vector<1x256xf32> to vector<8x256xf32>
    %73 = arith.mulf %54, %72 : vector<8x256xf32>
    %74 = vector.broadcast %71 : vector<1x256xf32> to vector<8x256xf32>
    %75 = arith.addf %73, %74 : vector<8x256xf32>
    %cst_34 = arith.constant 2.000000e-01 : f32
    %76 = vector.broadcast %cst_34 : f32 to vector<8x256xf32>
    %77 = arith.mulf %76, %75 : vector<8x256xf32>
    %78 = arith.maximumf %75, %77 : vector<8x256xf32>
    %cst_35 = arith.constant dense<0.000000e+00> : vector<256xf32>
    %79 = vector.multi_reduction <add>, %78, %cst_35 [0] : vector<8x256xf32> to vector<256xf32>
    %80 = vector.shape_cast %79 : vector<256xf32> to vector<1x256xf32>
    %cst_36 = arith.constant 8.000000e+00 : f32
    %81 = vector.broadcast %cst_36 : f32 to vector<1x256xf32>
    %82 = arith.divf %80, %81 : vector<1x256xf32>
    %83 = arith.mulf %78, %78 : vector<8x256xf32>
    %cst_37 = arith.constant dense<0.000000e+00> : vector<256xf32>
    %84 = vector.multi_reduction <add>, %83, %cst_37 [0] : vector<8x256xf32> to vector<256xf32>
    %85 = vector.shape_cast %84 : vector<256xf32> to vector<1x256xf32>
    %cst_38 = arith.constant 8.000000e+00 : f32
    %86 = vector.broadcast %cst_38 : f32 to vector<1x256xf32>
    %87 = arith.divf %85, %86 : vector<1x256xf32>
    %88 = arith.mulf %82, %82 : vector<1x256xf32>
    %89 = arith.subf %87, %88 : vector<1x256xf32>
    %cst_39 = arith.constant 8.000000e-01 : f32
    %90 = vector.broadcast %cst_39 : f32 to vector<1x256xf32>
    %91 = arith.addf %89, %90 : vector<1x256xf32>
    %92 = math.rsqrt %91 : vector<1x256xf32>
    %93 = arith.mulf %92, %48 : vector<1x256xf32>
    %94 = arith.mulf %82, %93 : vector<1x256xf32>
    %95 = arith.subf %49, %94 : vector<1x256xf32>
    %96 = vector.broadcast %93 : vector<1x256xf32> to vector<8x256xf32>
    %97 = arith.mulf %78, %96 : vector<8x256xf32>
    %98 = vector.broadcast %95 : vector<1x256xf32> to vector<8x256xf32>
    %99 = arith.addf %97, %98 : vector<8x256xf32>
    %c0_40 = arith.constant 0 : index
    %c384 = arith.constant 384 : index
    %100 = vector.load %arg9[%c0_40, %c384] : memref<3x2048xf32, #tpu.memory_space<vmem>>, vector<1x512xf32>
    %c1_41 = arith.constant 1 : index
    %c384_42 = arith.constant 384 : index
    %101 = vector.load %arg9[%c1_41, %c384_42] : memref<3x2048xf32, #tpu.memory_space<vmem>>, vector<1x512xf32>
    %c2_43 = arith.constant 2 : index
    %c384_44 = arith.constant 384 : index
    %102 = vector.load %arg9[%c2_43, %c384_44] : memref<3x2048xf32, #tpu.memory_space<vmem>>, vector<1x512xf32>
    %103 = arith.truncf %99 : vector<8x256xf32> to vector<8x256xbf16>
    %c0_45 = arith.constant 0 : index
    %c0_46 = arith.constant 0 : index
    %104 = vector.load %arg6[%c0_45, %c0_46] : memref<256x512xbf16, #tpu.memory_space<vmem>>, vector<256x512xbf16>
    %cst_47 = arith.constant dense<0.000000e+00> : vector<8x512xf32>
    %105 = tpu.matmul %103, %104, %cst_47 {dimension_numbers = #tpu.dot_dimension_numbers<[1], [0], [0], [1], [0, 0, 1, 1], [], []>} : vector<8x256xbf16>, vector<256x512xbf16>, vector<8x512xf32> -> vector<8x512xf32>
    %106 = vector.broadcast %100 : vector<1x512xf32> to vector<8x512xf32>
    %107 = arith.addf %105, %106 : vector<8x512xf32>
    %cst_48 = arith.constant dense<0.000000e+00> : vector<512xf32>
    %108 = vector.multi_reduction <add>, %107, %cst_48 [0] : vector<8x512xf32> to vector<512xf32>
    %109 = vector.shape_cast %108 : vector<512xf32> to vector<1x512xf32>
    %cst_49 = arith.constant 8.000000e+00 : f32
    %110 = vector.broadcast %cst_49 : f32 to vector<1x512xf32>
    %111 = arith.divf %109, %110 : vector<1x512xf32>
    %112 = arith.mulf %107, %107 : vector<8x512xf32>
    %cst_50 = arith.constant dense<0.000000e+00> : vector<512xf32>
    %113 = vector.multi_reduction <add>, %112, %cst_50 [0] : vector<8x512xf32> to vector<512xf32>
    %114 = vector.shape_cast %113 : vector<512xf32> to vector<1x512xf32>
    %cst_51 = arith.constant 8.000000e+00 : f32
    %115 = vector.broadcast %cst_51 : f32 to vector<1x512xf32>
    %116 = arith.divf %114, %115 : vector<1x512xf32>
    %117 = arith.mulf %111, %111 : vector<1x512xf32>
    %118 = arith.subf %116, %117 : vector<1x512xf32>
    %cst_52 = arith.constant 8.000000e-01 : f32
    %119 = vector.broadcast %cst_52 : f32 to vector<1x512xf32>
    %120 = arith.addf %118, %119 : vector<1x512xf32>
    %121 = math.rsqrt %120 : vector<1x512xf32>
    %122 = arith.mulf %121, %101 : vector<1x512xf32>
    %123 = arith.mulf %111, %122 : vector<1x512xf32>
    %124 = arith.subf %102, %123 : vector<1x512xf32>
    %125 = vector.broadcast %122 : vector<1x512xf32> to vector<8x512xf32>
    %126 = arith.mulf %107, %125 : vector<8x512xf32>
    %127 = vector.broadcast %124 : vector<1x512xf32> to vector<8x512xf32>
    %128 = arith.addf %126, %127 : vector<8x512xf32>
    %cst_53 = arith.constant 2.000000e-01 : f32
    %129 = vector.broadcast %cst_53 : f32 to vector<8x512xf32>
    %130 = arith.mulf %129, %128 : vector<8x512xf32>
    %131 = arith.maximumf %128, %130 : vector<8x512xf32>
    %cst_54 = arith.constant dense<0.000000e+00> : vector<512xf32>
    %132 = vector.multi_reduction <add>, %131, %cst_54 [0] : vector<8x512xf32> to vector<512xf32>
    %133 = vector.shape_cast %132 : vector<512xf32> to vector<1x512xf32>
    %cst_55 = arith.constant 8.000000e+00 : f32
    %134 = vector.broadcast %cst_55 : f32 to vector<1x512xf32>
    %135 = arith.divf %133, %134 : vector<1x512xf32>
    %136 = arith.mulf %131, %131 : vector<8x512xf32>
    %cst_56 = arith.constant dense<0.000000e+00> : vector<512xf32>
    %137 = vector.multi_reduction <add>, %136, %cst_56 [0] : vector<8x512xf32> to vector<512xf32>
    %138 = vector.shape_cast %137 : vector<512xf32> to vector<1x512xf32>
    %cst_57 = arith.constant 8.000000e+00 : f32
    %139 = vector.broadcast %cst_57 : f32 to vector<1x512xf32>
    %140 = arith.divf %138, %139 : vector<1x512xf32>
    %141 = arith.mulf %135, %135 : vector<1x512xf32>
    %142 = arith.subf %140, %141 : vector<1x512xf32>
    %cst_58 = arith.constant 8.000000e-01 : f32
    %143 = vector.broadcast %cst_58 : f32 to vector<1x512xf32>
    %144 = arith.addf %142, %143 : vector<1x512xf32>
    %145 = math.rsqrt %144 : vector<1x512xf32>
    %146 = arith.mulf %145, %101 : vector<1x512xf32>
    %147 = arith.mulf %135, %146 : vector<1x512xf32>
    %148 = arith.subf %102, %147 : vector<1x512xf32>
    %149 = vector.broadcast %146 : vector<1x512xf32> to vector<8x512xf32>
    %150 = arith.mulf %131, %149 : vector<8x512xf32>
    %151 = vector.broadcast %148 : vector<1x512xf32> to vector<8x512xf32>
    %152 = arith.addf %150, %151 : vector<8x512xf32>
    %c0_59 = arith.constant 0 : index
    %c896 = arith.constant 896 : index
    %153 = vector.load %arg9[%c0_59, %c896] : memref<3x2048xf32, #tpu.memory_space<vmem>>, vector<1x1024xf32>
    %c1_60 = arith.constant 1 : index
    %c896_61 = arith.constant 896 : index
    %154 = vector.load %arg9[%c1_60, %c896_61] : memref<3x2048xf32, #tpu.memory_space<vmem>>, vector<1x1024xf32>
    %c2_62 = arith.constant 2 : index
    %c896_63 = arith.constant 896 : index
    %155 = vector.load %arg9[%c2_62, %c896_63] : memref<3x2048xf32, #tpu.memory_space<vmem>>, vector<1x1024xf32>
    %156 = arith.truncf %152 : vector<8x512xf32> to vector<8x512xbf16>
    %c0_64 = arith.constant 0 : index
    %c0_65 = arith.constant 0 : index
    %157 = vector.load %arg7[%c0_64, %c0_65] : memref<512x1024xbf16, #tpu.memory_space<vmem>>, vector<512x1024xbf16>
    %cst_66 = arith.constant dense<0.000000e+00> : vector<8x1024xf32>
    %158 = tpu.matmul %156, %157, %cst_66 {dimension_numbers = #tpu.dot_dimension_numbers<[1], [0], [0], [1], [0, 0, 1, 1], [], []>} : vector<8x512xbf16>, vector<512x1024xbf16>, vector<8x1024xf32> -> vector<8x1024xf32>
    %159 = vector.broadcast %153 : vector<1x1024xf32> to vector<8x1024xf32>
    %160 = arith.addf %158, %159 : vector<8x1024xf32>
    %cst_67 = arith.constant dense<0.000000e+00> : vector<1024xf32>
    %161 = vector.multi_reduction <add>, %160, %cst_67 [0] : vector<8x1024xf32> to vector<1024xf32>
    %162 = vector.shape_cast %161 : vector<1024xf32> to vector<1x1024xf32>
    %cst_68 = arith.constant 8.000000e+00 : f32
    %163 = vector.broadcast %cst_68 : f32 to vector<1x1024xf32>
    %164 = arith.divf %162, %163 : vector<1x1024xf32>
    %165 = arith.mulf %160, %160 : vector<8x1024xf32>
    %cst_69 = arith.constant dense<0.000000e+00> : vector<1024xf32>
    %166 = vector.multi_reduction <add>, %165, %cst_69 [0] : vector<8x1024xf32> to vector<1024xf32>
    %167 = vector.shape_cast %166 : vector<1024xf32> to vector<1x1024xf32>
    %cst_70 = arith.constant 8.000000e+00 : f32
    %168 = vector.broadcast %cst_70 : f32 to vector<1x1024xf32>
    %169 = arith.divf %167, %168 : vector<1x1024xf32>
    %170 = arith.mulf %164, %164 : vector<1x1024xf32>
    %171 = arith.subf %169, %170 : vector<1x1024xf32>
    %cst_71 = arith.constant 8.000000e-01 : f32
    %172 = vector.broadcast %cst_71 : f32 to vector<1x1024xf32>
    %173 = arith.addf %171, %172 : vector<1x1024xf32>
    %174 = math.rsqrt %173 : vector<1x1024xf32>
    %175 = arith.mulf %174, %154 : vector<1x1024xf32>
    %176 = arith.mulf %164, %175 : vector<1x1024xf32>
    %177 = arith.subf %155, %176 : vector<1x1024xf32>
    %178 = vector.broadcast %175 : vector<1x1024xf32> to vector<8x1024xf32>
    %179 = arith.mulf %160, %178 : vector<8x1024xf32>
    %180 = vector.broadcast %177 : vector<1x1024xf32> to vector<8x1024xf32>
    %181 = arith.addf %179, %180 : vector<8x1024xf32>
    %cst_72 = arith.constant 2.000000e-01 : f32
    %182 = vector.broadcast %cst_72 : f32 to vector<8x1024xf32>
    %183 = arith.mulf %182, %181 : vector<8x1024xf32>
    %184 = arith.maximumf %181, %183 : vector<8x1024xf32>
    %cst_73 = arith.constant dense<0.000000e+00> : vector<1024xf32>
    %185 = vector.multi_reduction <add>, %184, %cst_73 [0] : vector<8x1024xf32> to vector<1024xf32>
    %186 = vector.shape_cast %185 : vector<1024xf32> to vector<1x1024xf32>
    %cst_74 = arith.constant 8.000000e+00 : f32
    %187 = vector.broadcast %cst_74 : f32 to vector<1x1024xf32>
    %188 = arith.divf %186, %187 : vector<1x1024xf32>
    %189 = arith.mulf %184, %184 : vector<8x1024xf32>
    %cst_75 = arith.constant dense<0.000000e+00> : vector<1024xf32>
    %190 = vector.multi_reduction <add>, %189, %cst_75 [0] : vector<8x1024xf32> to vector<1024xf32>
    %191 = vector.shape_cast %190 : vector<1024xf32> to vector<1x1024xf32>
    %cst_76 = arith.constant 8.000000e+00 : f32
    %192 = vector.broadcast %cst_76 : f32 to vector<1x1024xf32>
    %193 = arith.divf %191, %192 : vector<1x1024xf32>
    %194 = arith.mulf %188, %188 : vector<1x1024xf32>
    %195 = arith.subf %193, %194 : vector<1x1024xf32>
    %cst_77 = arith.constant 8.000000e-01 : f32
    %196 = vector.broadcast %cst_77 : f32 to vector<1x1024xf32>
    %197 = arith.addf %195, %196 : vector<1x1024xf32>
    %198 = math.rsqrt %197 : vector<1x1024xf32>
    %199 = arith.mulf %198, %154 : vector<1x1024xf32>
    %200 = arith.mulf %188, %199 : vector<1x1024xf32>
    %201 = arith.subf %155, %200 : vector<1x1024xf32>
    %202 = vector.broadcast %199 : vector<1x1024xf32> to vector<8x1024xf32>
    %203 = arith.mulf %184, %202 : vector<8x1024xf32>
    %204 = vector.broadcast %201 : vector<1x1024xf32> to vector<8x1024xf32>
    %205 = arith.addf %203, %204 : vector<8x1024xf32>
    %c0_78 = arith.constant 0 : index
    %c1920 = arith.constant 1920 : index
    %206 = vector.load %arg9[%c0_78, %c1920] : memref<3x2048xf32, #tpu.memory_space<vmem>>, vector<1x128xf32>
    %207 = arith.truncf %205 : vector<8x1024xf32> to vector<8x1024xbf16>
    %c0_79 = arith.constant 0 : index
    %c0_80 = arith.constant 0 : index
    %208 = vector.load %arg8[%c0_79, %c0_80] : memref<1024x128xbf16, #tpu.memory_space<vmem>>, vector<1024x128xbf16>
    %cst_81 = arith.constant dense<0.000000e+00> : vector<8x128xf32>
    %209 = tpu.matmul %207, %208, %cst_81 {dimension_numbers = #tpu.dot_dimension_numbers<[1], [0], [0], [1], [0, 0, 1, 1], [], []>} : vector<8x1024xbf16>, vector<1024x128xbf16>, vector<8x128xf32> -> vector<8x128xf32>
    %210 = vector.broadcast %206 : vector<1x128xf32> to vector<8x128xf32>
    %211 = arith.addf %209, %210 : vector<8x128xf32>
    %212 = math.tanh %211 : vector<8x128xf32>
    %c0_82 = arith.constant 0 : index
    %c0_83 = arith.constant 0 : index
    %213 = vector.load %arg10[%c0_82, %c0_83] : memref<8x128xf32, #tpu.memory_space<vmem>>, vector<8x128xf32>
    tpu.vector_store %arg10[%c0_82, %c0_83], %212 {strides = array<i32>} : memref<8x128xf32, #tpu.memory_space<vmem>>, vector<8x128xf32>,
    return
  }
}

</mosaic_0001>

<bundles_post_ra>
// kernel: tpu_custom_call.1
= control target key start
LH: loop header
LB: loop body
LE: loop exit
PB: predicated region body
PF: predicated region fallthrough
CT: control target
= control target key end

     0   :  { %15 = vsyncpa [#allocation3], 0  ;;  %s6598_s0 = inlined_call_operand.vmem [shape: s32[8,1], index: 0, kind: input, shape index: {}]   ;;  %s6599_s1 = inlined_call_operand.hbm [shape: f32[10,10], index: 1, kind: input, shape index: {}]   ;;  %s6600_s2 = inlined_call_operand.vmem [shape: f32[8,22], index: 2, kind: input, shape index: {}]   ;;  %s6601_s3 = inlined_call_operand.hbm [shape: bf16[10,128], index: 3, kind: input, shape index: {}]   ;;  %s6602_s4 = inlined_call_operand.vmem [shape: bf16[22,128], index: 4, kind: input, shape index: {}]   ;;  %s6603_s5 = inlined_call_operand.hbm [shape: bf16[128,256], index: 5, kind: input, shape index: {}]   ;;  %s6604_s6 = inlined_call_operand.hbm [shape: bf16[256,512], index: 6, kind: input, shape index: {}]   ;;  %s6605_s7 = inlined_call_operand.hbm [shape: bf16[512,1024], index: 7, kind: input, shape index: {}]   ;;  %s6606_s8 = inlined_call_operand.hbm [shape: bf16[1024,128], index: 8, kind: input, shape index: {}]   ;;  %s6607_s9 = inlined_call_operand.hbm [shape: f32[3,2048], index: 9, kind: input, shape index: {}]   ;;  %s6608_s10 = inlined_call_operand.hbm [shape: f32[8,128], index: 10, kind: output, shape index: {}]  }
   0x1   :  { %16 = vsyncpa [#allocation6], 0 }
   0x2   :  { %17 = vsyncpa [#allocation9], 0 }
   0x3   :  { %18 = vsyncpa [#allocation12], 0 }
   0x4   :  { %19 = vsyncpa [#allocation4], 0  ;;  %s5841_s13 = smov [#allocation5]   ;;  %s5655_s17 = scalar_lea.hbm %s6601_s3, 128 }
   0x5   :  { %s41_s14 = sshll.u32 %s5841_s13, 4  ;;  %p5656_p0 = scmp.ne.s32.totalorder %s6601_s3, %s5655_s17  ;;  %s42_s14 = int_to_ptr.vmem [resolvable:$true] %s41_s14 }
   0x6   :  { %p5659_p1 = scmp.lt.u32.totalorder %s5655_s17, %s6601_s3 }
   0x8   :  { %p5661_p2 = pnand %p5659_p1, %p5656_p0 }
   0xa   :  { %5664 = shalt.err (!%p5661_p2)
}
   0xb   :  { %s5665_s22 = scalar_lea.vmem %s42_s14, 128  ;;  %p5670_p4 = scmp.lt.s32.totalorder %s42_s14, %s42_s14 }
   0xc   :  { %p5666_p3 = scmp.ne.s32.totalorder %s42_s14, %s5665_s22  ;;  %p5671_p5 = scmp.lt.s32.totalorder %s5665_s22, %s5665_s22 }
   0xe   :  { %p5672_p6 = por %p5671_p5, %p5670_p4 }
  0x10   :  { %p5673_p7 = pnand %p5672_p6, %p5666_p3 }
  0x12   :  { %5676 = shalt.err (!%p5673_p7)
}
  0x13   :  { %s5842_s23 = smov 64   ;;  %s5843_s24 = smov 4  }
  0x14   :  { %47 = dma.hbm_to_vmem [thread:$0]  %s6601_s3, 128, %s42_s14, [#allocation6], %s5842_s23, %s5842_s23, %s5843_s24  }
  0x15   :  { %s5844_s27 = smov [#allocation8]   ;;  %s5677_s11 = scalar_lea.hbm %s6604_s6, 8192 }
  0x16   :  { %s67_s28 = sshll.u32 %s5844_s27, 4  ;;  %p5678_p8 = scmp.ne.s32.totalorder %s6604_s6, %s5677_s11  ;;  %s68_s28 = int_to_ptr.vmem [resolvable:$true] %s67_s28 }
  0x17   :  { %p5681_p9 = scmp.lt.u32.totalorder %s5677_s11, %s6604_s6 }
  0x19   :  { %p5683_p10 = pnand %p5681_p9, %p5678_p8 }
  0x1b   :  { %5686 = shalt.err (!%p5683_p10)
}
  0x1c   :  { %s5687_s17 = scalar_lea.vmem %s68_s28, 8192  ;;  %p5692_p12 = scmp.lt.s32.totalorder %s68_s28, %s68_s28 }
  0x1d   :  { %p5688_p11 = scmp.ne.s32.totalorder %s68_s28, %s5687_s17  ;;  %p5693_p13 = scmp.lt.s32.totalorder %s5687_s17, %s5687_s17 }
  0x1f   :  { %p5694_p0 = por %p5693_p13, %p5692_p12 }
  0x21   :  { %p5695_p1 = pnand %p5694_p0, %p5688_p11 }
  0x23   :  { %5698 = shalt.err (!%p5695_p1)
}
  0x24   :  { %s5845_s3 = smov 256   ;;  %s5846_s14 = smov 16  }
  0x25   :  { %73 = dma.hbm_to_vmem [thread:$0]  %s6604_s6, 8192, %s68_s28, [#allocation9], %s5845_s3, %s5845_s3, %s5846_s14  }
  0x26   :  { %s5847_s20 = smov [#allocation11]   ;;  %s5848_s22 = smov [#allocation2]  }
  0x27   :  { %s91_s21 = sshll.u32 %s5847_s20, 4  ;;  %s27_s25 = sshll.u32 %s5848_s22, 4  ;;  %s92_s21 = int_to_ptr.vmem [resolvable:$true] %s91_s21  ;;  %s5943_s25 = int_to_ptr.vmem [resolvable:$true] %s27_s25 }
  0x28   :  { %s5699_s29 = scalar_lea.hbm %s6606_s8, 8192 }
  0x29   :  { %p5700_p2 = scmp.ne.s32.totalorder %s6606_s8, %s5699_s29  ;;  %p5703_p3 = scmp.lt.u32.totalorder %s5699_s29, %s6606_s8 }
  0x2b   :  { %p5705_p4 = pnand %p5703_p3, %p5700_p2 }
  0x2d   :  { %5708 = shalt.err (!%p5705_p4)
}
  0x2e   :  { %s5709_s6 = scalar_lea.vmem %s92_s21, 8192  ;;  %p5714_p6 = scmp.lt.s32.totalorder %s92_s21, %s92_s21 }
  0x2f   :  { %p5710_p5 = scmp.ne.s32.totalorder %s92_s21, %s5709_s6  ;;  %p5715_p7 = scmp.lt.s32.totalorder %s5709_s6, %s5709_s6 }
  0x31   :  { %p5716_p8 = por %p5715_p7, %p5714_p6 }
  0x33   :  { %p5717_p9 = pnand %p5716_p8, %p5710_p5 }
  0x35   :  { %5720 = shalt.err (!%p5717_p9)
}
  0x36   :  { %97 = dma.hbm_to_vmem [thread:$0]  %s6606_s8, 8192, %s92_s21, [#allocation12], %s5842_s23, %s5842_s23, %s5843_s24  }
  0x37   :  { %s5721_s3 = scalar_lea.hbm %s6599_s1, 256 }
  0x38   :  { %p5722_p10 = scmp.ne.s32.totalorder %s6599_s1, %s5721_s3  ;;  %p5725_p11 = scmp.lt.u32.totalorder %s5721_s3, %s6599_s1 }
  0x3a   :  { %p5727_p12 = pnand %p5725_p11, %p5722_p10 }
  0x3c   :  { %5730 = shalt.err (!%p5727_p12)
}
  0x3d   :  { %s5731_s22 = scalar_lea.vmem %s5943_s25, 256  ;;  %p5736_p0 = scmp.lt.s32.totalorder %s5943_s25, %s5943_s25 }
  0x3e   :  { %p5732_p13 = scmp.ne.s32.totalorder %s5943_s25, %s5731_s22  ;;  %p5737_p1 = scmp.lt.s32.totalorder %s5731_s22, %s5731_s22 }
  0x40   :  { %p5738_p2 = por %p5737_p1, %p5736_p0 }
  0x42   :  { %p5739_p3 = pnand %p5738_p2, %p5732_p13 }
  0x44   :  { %5742 = shalt.err (!%p5739_p3)
}
  0x45   :  { %s5849_s8 = smov 128   ;;  %s5850_s23 = smov 8  }
  0x46   :  { %33 = dma.hbm_to_vmem [thread:$0]  %s6599_s1, 256, %s5943_s25, [#allocation3], %s5849_s8, %s5849_s8, %s5850_s23  }
  0x47   :  { %s5851_s26 = smov [#allocation7]   ;;  %s5852_s29 = smov [#allocation10]  }
  0x48   :  { %s55_s27 = sshll.u32 %s5851_s26, 4  ;;  %s79_s30 = sshll.u32 %s5852_s29, 4  ;;  %s56_s27 = int_to_ptr.vmem [resolvable:$true] %s55_s27  ;;  %s5977_s30 = int_to_ptr.vmem [resolvable:$true] %s79_s30 }
  0x49   :  { %s5743_s13 = scalar_lea.hbm %s6603_s5, 2048 }
  0x4a   :  { %p5744_p4 = scmp.ne.s32.totalorder %s6603_s5, %s5743_s13  ;;  %p5747_p5 = scmp.lt.u32.totalorder %s5743_s13, %s6603_s5 }
  0x4c   :  { %p5749_p6 = pnand %p5747_p5, %p5744_p4 }
  0x4e   :  { %5752 = shalt.err (!%p5749_p6)
}
  0x4f   :  { %s5753_s1 = scalar_lea.vmem %s56_s27, 2048  ;;  %p5758_p8 = scmp.lt.s32.totalorder %s56_s27, %s56_s27 }
  0x50   :  { %p5754_p7 = scmp.ne.s32.totalorder %s56_s27, %s5753_s1  ;;  %p5759_p9 = scmp.lt.s32.totalorder %s5753_s1, %s5753_s1 }
  0x52   :  { %p5760_p10 = por %p5759_p9, %p5758_p8 }
  0x54   :  { %p5761_p11 = pnand %p5760_p10, %p5754_p7 }
  0x56   :  { %5764 = shalt.err (!%p5761_p11)
}
  0x57   :  { %61 = dma.hbm_to_vmem [thread:$0]  %s6603_s5, 2048, %s56_s27, [#allocation6], %s5849_s8, %s5849_s8, %s5850_s23  }
  0x58   :  { %s5765_s18 = scalar_lea.hbm %s6605_s7, 32768 }
  0x59   :  { %p5766_p12 = scmp.ne.s32.totalorder %s6605_s7, %s5765_s18  ;;  %p5769_p13 = scmp.lt.u32.totalorder %s5765_s18, %s6605_s7 }
  0x5b   :  { %p5771_p0 = pnand %p5769_p13, %p5766_p12 }
  0x5d   :  { %5774 = shalt.err (!%p5771_p0)
}
  0x5e   :  { %s5775_s21 = scalar_lea.vmem %s5977_s30, 32768  ;;  %p5780_p2 = scmp.lt.s32.totalorder %s5977_s30, %s5977_s30 }
  0x5f   :  { %p5776_p1 = scmp.ne.s32.totalorder %s5977_s30, %s5775_s21  ;;  %p5781_p3 = scmp.lt.s32.totalorder %s5775_s21, %s5775_s21 }
  0x61   :  { %p5782_p4 = por %p5781_p3, %p5780_p2 }
  0x63   :  { %p5783_p5 = pnand %p5782_p4, %p5776_p1 }
  0x65   :  { %5786 = shalt.err (!%p5783_p5)
}
  0x66   :  { %s5853_s5 = smov 512   ;;  %s5854_s8 = smov 32  }
  0x67   :  { %85 = dma.hbm_to_vmem [thread:$0]  %s6605_s7, 32768, %s5977_s30, [#allocation9], %s5853_s5, %s5853_s5, %s5854_s8  }
  0x68   :  { %s5855_s27 = smov [#allocation13]   ;;  %s5787_s13 = scalar_lea.hbm %s6607_s9, 1024 }
  0x69   :  { %s104_s29 = sshll.u32 %s5855_s27, 4  ;;  %p5788_p6 = scmp.ne.s32.totalorder %s6607_s9, %s5787_s13  ;;  %s105_s29 = int_to_ptr.vmem [resolvable:$true] %s104_s29 }
  0x6a   :  { %p5791_p7 = scmp.lt.u32.totalorder %s5787_s13, %s6607_s9 }
  0x6c   :  { %p5793_p8 = pnand %p5791_p7, %p5788_p6 }
  0x6e   :  { %5796 = shalt.err (!%p5793_p8)
}
  0x6f   :  { %s5797_s1 = scalar_lea.vmem %s105_s29, 1024  ;;  %p5802_p10 = scmp.lt.s32.totalorder %s105_s29, %s105_s29 }
  0x70   :  { %p5798_p9 = scmp.ne.s32.totalorder %s105_s29, %s5797_s1  ;;  %p5803_p11 = scmp.lt.s32.totalorder %s5797_s1, %s5797_s1 }
  0x72   :  { %p5804_p12 = por %p5803_p11, %p5802_p10 }
  0x74   :  { %p5805_p13 = pnand %p5804_p12, %p5798_p9 }
  0x76   :  { %5808 = shalt.err (!%p5805_p13)
}
  0x77   :  { %107 = dma.hbm_to_vmem [thread:$0]  %s6607_s9, 1024, %s105_s29, [#allocation12]  }
  0x78   :  { %5831 = dma.done.wait [#allocation3], 256  }
  0x79   :  { %5832 = vsyncadd [#allocation3], 4294967040 }
  0x7a   :  { %5833 = dma.done.wait [#allocation6], 2176  }
  0x7b   :  { %5834 = vsyncadd [#allocation6], 4294965120 }
  0x7c   :  { %5835 = dma.done.wait [#allocation9], 40960  }
  0x7d   :  { %5836 = vsyncadd [#allocation9], 4294926336 }
  0x7e   :  { %5837 = dma.done.wait [#allocation12], 9216  }
  0x7f   :  { %5838 = vsyncadd [#allocation12], 4294958080  ;;  %v5856_v0 = vmov 0   ;;  %v5857_v1 = vmov 0.0   ;;  %v130_v2 = vld [vmem:[%s6598_s0] sm:$0xff]  ;;  %vm147_vm0 = vcmask 1044480   ;;  %v131_v7 = vlaneseq }
  0x80   :  { %5407 = vset.pattern.permute.xlu0 %v5856_v0  ;;  %5343 = vmatprep.subr.bf16.mxu0 %v5857_v1  ;;  %v140_v3 = vld [vmem:[#allocation2] sm:$0xff]  ;;  %v141_v4 = vld [vmem:[#allocation2 + $0x8] sm:$0x3]  ;;  %vm5858_vm1 = vmmov 0   ;;  %vm143_vm3 = vcmask 80896   ;;  %vm215_vm4 = vcmask 1042432  }
  0x81   :  { %496 = vmatprep.mubr.bf16.mxu1 %v5856_v0  ;;  %134 = vperm.xlu0 %5407, %v130_v2   ;;  %v142_v5 = vpack.c.bf16 %v141_v4, %v140_v3  ;;  %v132_v8 = vand.u32 127, %v131_v7  ;;  %v5409_v11 = vld [vmem:[%s6602_s4] sm:$0xff]   ;;  %v5410_v13 = vld [vmem:[%s6602_s4 + $0x8] ss:$0 sps:$4 sm:$0x77]   ;;  %vm211_vm5 = vcmask 179200  }
  0x82   :  { %5345 = vmatprep.mubr.msk.bf16.mxu0 %vm5858_vm1, %v5857_v1  ;;  %v197_v14 = vld [vmem:[%s6600_s2] sm:$0xff]  ;;  %v5408_v15 = vld [vmem:[#allocation5] sm:$0x1f]   ;;  %v217_v16 = vsel %vm215_vm4, %v5410_v13, 0  ;;  %v4846_v44 = vld [vmem:[#allocation13] ss:$0 sm:$0xff] }
  0x83   :  { %v149_v6 = vsel %vm147_vm0, %v142_v5, 0  ;;  %v198_v17 = vpack.c.bf16 %v197_v14, %v197_v14  ;;  %v268_v18 = vsel %vm147_vm0, %v5408_v15, 0  ;;  %v5411_v28 = vld [vmem:[#allocation7 + $0x4] ss:$8 sps:$4 sm:$0xff]   ;;  %v5413_v29 = vld [vmem:[#allocation7] ss:$8 sps:$4 sm:$0xff]  }
  0x84   :  { %5344 = vmatpush3.bf16.msra.mxu0 %v149_v6  ;;  %464 = vmatprep.subr.bf16.mxu1 %v5411_v28  ;;  %v5414_v30 = vld [vmem:[#allocation7 + $0x14] ss:$8 sps:$4 sm:$0xff]   ;;  %v5416_v31 = vld [vmem:[#allocation7 + $0x10] ss:$8 sps:$4 sm:$0xff]   ;;  %v5417_v32 = vld [vmem:[#allocation7 + $0x24] ss:$8 sps:$4 sm:$0xff]  }
  0x85   :  { %5349 = vmatprep.subr.bf16.mxu0 %v5857_v1  ;;  %465 = vmatpush1.bf16.msra.mxu1 %v5413_v29  ;;  %v5419_v33 = vld [vmem:[#allocation7 + $0x20] ss:$8 sps:$4 sm:$0xff]   ;;  %v5420_v34 = vld [vmem:[#allocation7 + $0x34] ss:$8 sps:$4 sm:$0xff]   ;;  %v5422_v35 = vld [vmem:[#allocation7 + $0x30] ss:$8 sps:$4 sm:$0xff]  }
  0x86   :  { %466 = vmatprep.subr.bf16.mxu1 %v5414_v30  ;;  %v5423_v36 = vld [vmem:[#allocation7 + $0x44] ss:$8 sps:$4 sm:$0xff]   ;;  %v5425_v37 = vld [vmem:[#allocation7 + $0x40] ss:$8 sps:$4 sm:$0xff]   ;;  %v5426_v38 = vld [vmem:[#allocation7 + $0x54] ss:$8 sps:$4 sm:$0xff]  }
  0x87   :  { %v5428_v39 = vld [vmem:[#allocation7 + $0x50] ss:$8 sps:$4 sm:$0xff]   ;;  %v5429_v40 = vld [vmem:[#allocation7 + $0x64] ss:$8 sps:$4 sm:$0xff]   ;;  %v5431_v41 = vld [vmem:[#allocation7 + $0x60] ss:$8 sps:$4 sm:$0xff]  }
  0x88   :  { %v5432_v42 = vld [vmem:[#allocation7 + $0x74] ss:$8 sps:$4 sm:$0xff]   ;;  %v5434_v43 = vld [vmem:[#allocation7 + $0x70] ss:$8 sps:$4 sm:$0xff]   ;;  %v193_v13 = vld [vmem:[#allocation13 + $0x2] sm:$0x1] }
  0x89   :  { %467 = vmatpush1.bf16.msra.mxu1 %v5416_v31  ;;  %v5449_v28 = vld [vmem:[#allocation8 + $0x44] ss:$16 sps:$4 sm:$0xff]   ;;  %v5452_v29 = vld [vmem:[#allocation8 + $0x4c] ss:$16 sps:$4 sm:$0xff]   ;;  %v5447_v30 = vld [vmem:[#allocation8 + $0x40] ss:$16 sps:$4 sm:$0xff]  }
  0x8a   :  { %468 = vmatprep.subr.bf16.mxu1 %v5417_v32  ;;  %v5450_v31 = vld [vmem:[#allocation8 + $0x48] ss:$16 sps:$4 sm:$0xff]   ;;  %v5455_v32 = vld [vmem:[#allocation8 + $0x64] ss:$16 sps:$4 sm:$0xff]   ;;  %s5860_s2 = smov [#allocation14]  }
  0x8b   :  { %s4827_s4 = sshll.u32 %s5860_s2, 4  ;;  %s4828_s4 = int_to_ptr.vmem [resolvable:$true] %s4827_s4 }
  0x8c   :  { %s5809_s20 = scalar_lea.vmem %s4828_s4, 128  ;;  %p5814_p1 = scmp.lt.s32.totalorder %s4828_s4, %s4828_s4 }
  0x8d   :  { %469 = vmatpush1.bf16.msra.mxu1 %v5419_v33  ;;  %v5458_v33 = vld [vmem:[#allocation8 + $0x6c] ss:$16 sps:$4 sm:$0xff]   ;;  %p5810_p0 = scmp.ne.s32.totalorder %s4828_s4, %s5809_s20  ;;  %p5815_p2 = scmp.lt.s32.totalorder %s5809_s20, %s5809_s20 }
  0x8e   :  { %470 = vmatprep.subr.bf16.mxu1 %v5420_v34  ;;  %v5453_v34 = vld [vmem:[#allocation8 + $0x60] ss:$16 sps:$4 sm:$0xff]  }
  0x8f   :  { %p5816_p3 = por %p5815_p2, %p5814_p1 }
  0x91   :  { %471 = vmatpush1.bf16.msra.mxu1 %v5422_v35  ;;  %v5456_v35 = vld [vmem:[#allocation8 + $0x68] ss:$16 sps:$4 sm:$0xff]   ;;  %p5817_p4 = pnand %p5816_p3, %p5810_p0 }
  0x92   :  { %472 = vmatprep.subr.bf16.mxu1 %v5423_v36  ;;  %v5461_v36 = vld [vmem:[#allocation8 + $0x84] ss:$16 sps:$4 sm:$0xff]  }
  0x95   :  { %473 = vmatpush1.bf16.msra.mxu1 %v5425_v37  ;;  %v5464_v37 = vld [vmem:[#allocation8 + $0x8c] ss:$16 sps:$4 sm:$0xff]  }
  0x96   :  { %474 = vmatprep.subr.bf16.mxu1 %v5426_v38  ;;  %v5459_v38 = vld [vmem:[#allocation8 + $0x80] ss:$16 sps:$4 sm:$0xff]  }
  0x99   :  { %475 = vmatpush1.bf16.msra.mxu1 %v5428_v39  ;;  %v5462_v39 = vld [vmem:[#allocation8 + $0x88] ss:$16 sps:$4 sm:$0xff]  }
  0x9a   :  { %476 = vmatprep.subr.bf16.mxu1 %v5429_v40  ;;  %v5467_v40 = vld [vmem:[#allocation8 + $0xa4] ss:$16 sps:$4 sm:$0xff]  }
  0x9d   :  { %477 = vmatpush1.bf16.msra.mxu1 %v5431_v41  ;;  %v5470_v41 = vld [vmem:[#allocation8 + $0xac] ss:$16 sps:$4 sm:$0xff]  }
  0x9e   :  { %478 = vmatprep.subr.bf16.mxu1 %v5432_v42  ;;  %v5465_v42 = vld [vmem:[#allocation8 + $0xa0] ss:$16 sps:$4 sm:$0xff]  }
  0xa1   :  { %479 = vmatpush1.bf16.msra.mxu1 %v5434_v43  ;;  %v5468_v43 = vld [vmem:[#allocation8 + $0xa8] ss:$16 sps:$4 sm:$0xff]  }
 0x100   :  { %v135_v9 = vpop.permute.xlu0 %134 }
 0x101   :  { %vm136_vm2 = vcmp.eq.s32.totalorder %v132_v8, %v135_v9  ;;  %v6041_v8 = vshrl.u32 %v131_v7, 7  ;;  %v192_v9 = vld [vmem:[#allocation13 + $0x1] sm:$0x1]  ;;  %v5437_v7 = vld [vmem:[#allocation8 + $0x4] ss:$16 sps:$4 sm:$0xff]  }
 0x102   :  { %v4839_v10 = vsel %vm136_vm2, 1.0, %v5857_v1 }
 0x103   :  { %v139_v12 = vpack.c.bf16 %v4839_v10, %v4839_v10  ;;  %v6044_v10 = vsub.s32 0, %v6041_v8 }
 0x105   :  { %5346 = vmatmul.mubr.msk.bf16.vlgmr.msra.gmra.mrb[0].mxu0 %vm143_vm3, %v139_v12 }
 0x106   :  { %5350 = vmatpush3.bf16.msra.mxu0 %v5409_v11  ;;  %5353 = vmatprep.mubr.msk.bf16.mxu0 %vm5858_vm1, %v5857_v1 }
 0x107   :  { %5351 = vmatprep.subr.bf16.mxu0 %v5857_v1 }
 0x10a   :  { %5352 = vmatpush3.bf16.msra.mxu0 %v217_v16 }
 0x10b   :  { %5357 = vmatprep.subr.bf16.mxu0 %v5857_v1 }
 0x10d   :  { %5354 = vmatmul.mubr.msk.bf16.vlgmr.msra.gmra.mrb[4].mxu0 %vm211_vm5, %v198_v17 }
 0x10e   :  { %5358 = vmatpush3.bf16.msra.mxu0 %v268_v18  ;;  %5359 = vmatprep.mubr.msk.bf16.mxu0 %vm5858_vm1, %v5857_v1 }
 0x10f   :  { %1101 = vmatprep.subr.bf16.mxu0 %v5437_v7  ;;  %v5528_v7 = vld [vmem:[#allocation8 + $0x1e8] ss:$16 sps:$4 sm:$0xff]  }
 0x1d8   :  { %v185_v19 = vpop.f32.mrb[0].mxu0 }
 0x1d9   :  { %v194_v20 = vpack.c.bf16 %v185_v19, %v185_v19  ;;  %v5347_v21 = vpop.f32.mrb[1].mxu0 }
 0x1da   :  { %v188_v22 = vpop.f32.mrb[2].mxu0  ;;  %v5435_v21 = vld [vmem:[#allocation8] ss:$16 sps:$4 sm:$0xff]  }
 0x1db   :  { %v5348_v23 = vpop.f32.mrb[3].mxu0  ;;  %5360 = vmatmul.mubr.msk.bf16.vlgmr.msra.gmra.mrb[8].mxu0 %vm143_vm3, %v194_v20  ;;  %v5438_v22 = vld [vmem:[#allocation8 + $0x8] ss:$16 sps:$4 sm:$0xff]  }
 0x1dc   :  { %v5440_v23 = vld [vmem:[#allocation8 + $0xc] ss:$16 sps:$4 sm:$0xff]   ;;  %1102 = vmatpush1.bf16.msra.mxu0 %v5435_v21  ;;  %v5525_v21 = vld [vmem:[#allocation8 + $0x1e0] ss:$16 sps:$4 sm:$0xff]  }
 0x1dd   :  { %1142 = vmatprep.subr.bf16.mxu1 %v5440_v23  ;;  %v351_v23 = vld [vmem:[#allocation13 + $0x4] ss:$4 sm:$0x3] }
 0x1e0   :  { %v253_v24 = vpop.f32.mrb[4].mxu0 }
 0x1e1   :  { %v5355_v25 = vpop.f32.mrb[5].mxu0 }
 0x1e2   :  { %v256_v26 = vpop.f32.mrb[6].mxu0  ;;  %v5446_v25 = vld [vmem:[#allocation8 + $0x2c] ss:$16 sps:$4 sm:$0xff]  }
 0x1e3   :  { %v5356_v27 = vpop.f32.mrb[7].mxu0  ;;  %v5441_v26 = vld [vmem:[#allocation8 + $0x20] ss:$16 sps:$4 sm:$0xff]  }
 0x1e4   :  { %v5444_v27 = vld [vmem:[#allocation8 + $0x28] ss:$16 sps:$4 sm:$0xff]  }
 0x2ae   :  { %v304_v45 = vpop.f32.mrb[8].mxu0 }
 0x2af   :  { %v305_v46 = vadd.f32 %v304_v45, %v253_v24  ;;  %v5361_v47 = vpop.f32.mrb[9].mxu0  ;;  %v5443_v24 = vld [vmem:[#allocation8 + $0x24] ss:$16 sps:$4 sm:$0xff]   ;;  %v5476_v45 = vld [vmem:[#allocation8 + $0xcc] ss:$16 sps:$4 sm:$0xff]  }
 0x2b0   :  { %v307_v48 = vpop.f32.mrb[10].mxu0  ;;  %1103 = vmatprep.subr.bf16.mxu0 %v5443_v24  ;;  %v5474_v47 = vld [vmem:[#allocation8 + $0xc8] ss:$16 sps:$4 sm:$0xff]   ;;  %v377_v24 = vrot.slane %v351_v23, %v6044_v10 }
 0x2b1   :  { %v314_v49 = vadd.f32 %v4846_v44, %v305_v46  ;;  %v5362_v50 = vpop.f32.mrb[11].mxu0  ;;  %1104 = vmatpush1.bf16.msra.mxu0 %v5441_v26  ;;  %v5473_v44 = vld [vmem:[#allocation8 + $0xc4] ss:$16 sps:$4 sm:$0xff]   ;;  %v5471_v46 = vld [vmem:[#allocation8 + $0xc0] ss:$16 sps:$4 sm:$0xff]  }
 0x2b2   :  { %1105 = vmatprep.subr.bf16.mxu0 %v5449_v28  ;;  %v5479_v48 = vld [vmem:[#allocation8 + $0xe4] ss:$16 sps:$4 sm:$0xff]   ;;  %v5477_v50 = vld [vmem:[#allocation8 + $0xe0] ss:$16 sps:$4 sm:$0xff]  }
 0x2b3   :  { %v315_v51 = vmul.f32 0.2, %v314_v49 }
 0x2b5   :  { %v316_v52 = vmax.f32 %v314_v49, %v315_v51  ;;  %1106 = vmatpush1.bf16.msra.mxu0 %v5447_v30  ;;  %v5482_v49 = vld [vmem:[#allocation8 + $0xec] ss:$16 sps:$4 sm:$0xff]   ;;  %v5480_v51 = vld [vmem:[#allocation8 + $0xe8] ss:$16 sps:$4 sm:$0xff]  }
 0x2b6   :  { %1107 = vmatprep.subr.bf16.mxu0 %v5455_v32 }
 0x2b7   :  { %v317_v53 = vrot.slane %v316_v52, 4  ;;  %v325_v54 = vmul.f32 %v316_v52, %v316_v52 }
 0x2b9   :  { %v318_v55 = vadd.f32 %v317_v53, %v316_v52  ;;  %v326_v56 = vrot.slane %v325_v54, 4  ;;  %1108 = vmatpush1.bf16.msra.mxu0 %v5453_v34  ;;  %v5488_v53 = vld [vmem:[#allocation8 + $0x10c] ss:$16 sps:$4 sm:$0xff]  }
 0x2ba   :  { %1109 = vmatprep.subr.bf16.mxu0 %v5461_v36 }
 0x2bb   :  { %v319_v57 = vrot.slane %v318_v55, 2  ;;  %v327_v58 = vadd.f32 %v326_v56, %v325_v54  ;;  %v5483_v54 = vld [vmem:[#allocation8 + $0x100] ss:$16 sps:$4 sm:$0xff]   ;;  %v5491_v56 = vld [vmem:[#allocation8 + $0x124] ss:$16 sps:$4 sm:$0xff]  }
 0x2bd   :  { %v320_v59 = vadd.f32 %v319_v57, %v318_v55  ;;  %v328_v60 = vrot.slane %v327_v58, 2  ;;  %1110 = vmatpush1.bf16.msra.mxu0 %v5459_v38  ;;  %v5486_v55 = vld [vmem:[#allocation8 + $0x108] ss:$16 sps:$4 sm:$0xff]   ;;  %v5494_v57 = vld [vmem:[#allocation8 + $0x12c] ss:$16 sps:$4 sm:$0xff]  }
 0x2be   :  { %1111 = vmatprep.subr.bf16.mxu0 %v5467_v40 }
 0x2bf   :  { %v329_v61 = vadd.f32 %v328_v60, %v327_v58  ;;  %v321_v62 = vrot.slane %v320_v59, 1  ;;  %v5489_v58 = vld [vmem:[#allocation8 + $0x120] ss:$16 sps:$4 sm:$0xff]   ;;  %v5497_v60 = vld [vmem:[#allocation8 + $0x144] ss:$16 sps:$4 sm:$0xff]  }
 0x2c1   :  { %v330_v63 = vrot.slane %v329_v61, 1  ;;  %v322_v0 = vadd.f32 %v321_v62, %v320_v59  ;;  %1112 = vmatpush1.bf16.msra.mxu0 %v5465_v42  ;;  %v5492_v59 = vld [vmem:[#allocation8 + $0x128] ss:$16 sps:$4 sm:$0xff]   ;;  %v5495_v62 = vld [vmem:[#allocation8 + $0x140] ss:$16 sps:$4 sm:$0xff]  }
 0x2c2   :  { %1113 = vmatprep.subr.bf16.mxu0 %v5473_v44 }
 0x2c3   :  { %v331_v1 = vadd.f32 %v330_v63, %v329_v61  ;;  %v324_v2 = vmul.f32 0.125, %v322_v0  ;;  %v5500_v61 = vld [vmem:[#allocation8 + $0x14c] ss:$16 sps:$4 sm:$0xff]   ;;  %v5498_v63 = vld [vmem:[#allocation8 + $0x148] ss:$16 sps:$4 sm:$0xff]  }
 0x2c4   :  { %v5503_v0 = vld [vmem:[#allocation8 + $0x164] ss:$16 sps:$4 sm:$0xff]  }
 0x2c5   :  { %v332_v3 = vmul.f32 0.125, %v331_v1  ;;  %v333_v4 = vmul.f32 %v324_v2, %v324_v2  ;;  %1114 = vmatpush1.bf16.msra.mxu0 %v5471_v46  ;;  %v5506_v1 = vld [vmem:[#allocation8 + $0x16c] ss:$16 sps:$4 sm:$0xff]  }
 0x2c6   :  { %1115 = vmatprep.subr.bf16.mxu0 %v5479_v48 }
 0x2c7   :  { %v334_v5 = vsub.f32 %v332_v3, %v333_v4  ;;  %v5504_v3 = vld [vmem:[#allocation8 + $0x168] ss:$16 sps:$4 sm:$0xff]   ;;  %v5509_v4 = vld [vmem:[#allocation8 + $0x184] ss:$16 sps:$4 sm:$0xff]  }
 0x2c9   :  { %v335_v6 = vadd.f32 0.8, %v334_v5  ;;  %1116 = vmatpush1.bf16.msra.mxu0 %v5477_v50  ;;  %v5512_v5 = vld [vmem:[#allocation8 + $0x18c] ss:$16 sps:$4 sm:$0xff]  }
 0x2cb   :  { %5595 = vrsqrt.f32 %v335_v6  ;;  %v5507_v6 = vld [vmem:[#allocation8 + $0x180] ss:$16 sps:$4 sm:$0xff]  }
 0x2d5   :  { %v5596_v11 = vpop.eup %5595 }
 0x2d6   :  { %v337_v12 = vmul.f32 %v5596_v11, %v192_v9  ;;  %v5510_v9 = vld [vmem:[#allocation8 + $0x188] ss:$16 sps:$4 sm:$0xff]   ;;  %v5515_v11 = vld [vmem:[#allocation8 + $0x1a4] ss:$16 sps:$4 sm:$0xff]  }
 0x2d8   :  { %v338_v14 = vmul.f32 %v337_v12, %v324_v2  ;;  %v343_v15 = vrot.slane %v337_v12, %v6044_v10  ;;  %v5501_v2 = vld [vmem:[#allocation8 + $0x160] ss:$16 sps:$4 sm:$0xff]   ;;  %v5518_v12 = vld [vmem:[#allocation8 + $0x1ac] ss:$16 sps:$4 sm:$0xff]  }
 0x2da   :  { %v339_v16 = vsub.f32 %v193_v13, %v338_v14  ;;  %v344_v17 = vmul.f32 %v343_v15, %v316_v52  ;;  %v5485_v52 = vld [vmem:[#allocation8 + $0x104] ss:$16 sps:$4 sm:$0xff]   ;;  %v5513_v13 = vld [vmem:[#allocation8 + $0x1a0] ss:$16 sps:$4 sm:$0xff]   ;;  %v5516_v14 = vld [vmem:[#allocation8 + $0x1a8] ss:$16 sps:$4 sm:$0xff]  }
 0x2db   :  { %1117 = vmatprep.subr.bf16.mxu0 %v5485_v52  ;;  %v5521_v15 = vld [vmem:[#allocation8 + $0x1c4] ss:$16 sps:$4 sm:$0xff]  }
 0x2dc   :  { %v348_v18 = vrot.slane %v339_v16, %v6044_v10  ;;  %1118 = vmatpush1.bf16.msra.mxu0 %v5483_v54  ;;  %v5524_v16 = vld [vmem:[#allocation8 + $0x1cc] ss:$16 sps:$4 sm:$0xff]  }
 0x2dd   :  { %1119 = vmatprep.subr.bf16.mxu0 %v5491_v56 }
 0x2de   :  { %v349_v19 = vadd.f32 %v348_v18, %v344_v17  ;;  %v5519_v17 = vld [vmem:[#allocation8 + $0x1c0] ss:$16 sps:$4 sm:$0xff]   ;;  %v5522_v18 = vld [vmem:[#allocation8 + $0x1c8] ss:$16 sps:$4 sm:$0xff]  }
 0x2e0   :  { %v356_v20 = vpack.c.bf16 %v349_v19, %v349_v19  ;;  %1120 = vmatpush1.bf16.msra.mxu0 %v5489_v58  ;;  %v5527_v19 = vld [vmem:[#allocation8 + $0x1e4] ss:$16 sps:$4 sm:$0xff]  }
 0x2e1   :  { %1121 = vmatprep.subr.bf16.mxu0 %v5497_v60 }
 0x2e2   :  { %497 = vmatmul.mubr.bf16.vlgmr.msra.gmra.mrb[0].mxu1 %v356_v20  ;;  %v5530_v20 = vld [vmem:[#allocation8 + $0x1ec] ss:$16 sps:$4 sm:$0xff]  }
 0x2e3   :  { %1143 = vmatpush1.bf16.msra.mxu1 %v5438_v22  ;;  %v6049_v22 = vsub.s32 1, %v6041_v8 }
 0x2e4   :  { %1144 = vmatprep.subr.bf16.mxu1 %v5446_v25  ;;  %1122 = vmatpush1.bf16.msra.mxu0 %v5495_v62 }
 0x2e5   :  { %1123 = vmatprep.subr.bf16.mxu0 %v5503_v0  ;;  %v381_v25 = vrot.slane %v351_v23, %v6049_v22 }
 0x2e7   :  { %1145 = vmatpush1.bf16.msra.mxu1 %v5444_v27 }
 0x2e8   :  { %1146 = vmatprep.subr.bf16.mxu1 %v5452_v29  ;;  %1124 = vmatpush1.bf16.msra.mxu0 %v5501_v2 }
 0x2e9   :  { %1125 = vmatprep.subr.bf16.mxu0 %v5509_v4  ;;  %v353_v4 = vld [vmem:[#allocation13 + $0x5] ss:$4 sm:$0x3] }
 0x2eb   :  { %1147 = vmatpush1.bf16.msra.mxu1 %v5450_v31 }
 0x2ec   :  { %1148 = vmatprep.subr.bf16.mxu1 %v5458_v33  ;;  %1126 = vmatpush1.bf16.msra.mxu0 %v5507_v6 }
 0x2ed   :  { %1127 = vmatprep.subr.bf16.mxu0 %v5515_v11  ;;  %v6063_v11 = vrot.slane %v353_v4, %v6049_v22 }
 0x2ef   :  { %1149 = vmatpush1.bf16.msra.mxu1 %v5456_v35 }
 0x2f0   :  { %1150 = vmatprep.subr.bf16.mxu1 %v5464_v37  ;;  %1128 = vmatpush1.bf16.msra.mxu0 %v5513_v13 }
 0x2f1   :  { %1129 = vmatprep.subr.bf16.mxu0 %v5521_v15 }
 0x2f3   :  { %1151 = vmatpush1.bf16.msra.mxu1 %v5462_v39 }
 0x2f4   :  { %1152 = vmatprep.subr.bf16.mxu1 %v5470_v41  ;;  %1130 = vmatpush1.bf16.msra.mxu0 %v5519_v17 }
 0x2f5   :  { %1131 = vmatprep.subr.bf16.mxu0 %v5527_v19 }
 0x2f7   :  { %1153 = vmatpush1.bf16.msra.mxu1 %v5468_v43 }
 0x2f8   :  { %1154 = vmatprep.subr.bf16.mxu1 %v5476_v45  ;;  %1132 = vmatpush1.bf16.msra.mxu0 %v5525_v21 }
 0x2fb   :  { %1155 = vmatpush1.bf16.msra.mxu1 %v5474_v47 }
 0x2fc   :  { %1156 = vmatprep.subr.bf16.mxu1 %v5482_v49 }
 0x2ff   :  { %1157 = vmatpush1.bf16.msra.mxu1 %v5480_v51 }
 0x300   :  { %1158 = vmatprep.subr.bf16.mxu1 %v5488_v53 }
 0x303   :  { %1159 = vmatpush1.bf16.msra.mxu1 %v5486_v55 }
 0x304   :  { %1160 = vmatprep.subr.bf16.mxu1 %v5494_v57 }
 0x307   :  { %1161 = vmatpush1.bf16.msra.mxu1 %v5492_v59 }
 0x308   :  { %1162 = vmatprep.subr.bf16.mxu1 %v5500_v61 }
 0x30b   :  { %1163 = vmatpush1.bf16.msra.mxu1 %v5498_v63 }
 0x30c   :  { %1164 = vmatprep.subr.bf16.mxu1 %v5506_v1 }
 0x30f   :  { %1165 = vmatpush1.bf16.msra.mxu1 %v5504_v3 }
 0x310   :  { %1166 = vmatprep.subr.bf16.mxu1 %v5512_v5  ;;  %v5859_v5 = vmov 1966171168  }
 0x311   :  { %v562_v6 = vunpack.c.l.s4 %v5859_v5 }
 0x313   :  { %1167 = vmatpush1.bf16.msra.mxu1 %v5510_v9  ;;  %v6060_v9 = vrot.slane %v353_v4, %v6044_v10  ;;  %v563_v13 = vunpack.c.0.s8 %v562_v6 }
 0x314   :  { %1168 = vmatprep.subr.bf16.mxu1 %v5518_v12 }
 0x317   :  { %1169 = vmatpush1.bf16.msra.mxu1 %v5516_v14 }
 0x318   :  { %1170 = vmatprep.subr.bf16.mxu1 %v5524_v16 }
 0x31b   :  { %1171 = vmatpush1.bf16.msra.mxu1 %v5522_v18  ;;  %v6068_v18 = vsub.s32 %v563_v13, %v6041_v8 }
 0x31c   :  { %1172 = vmatprep.subr.bf16.mxu1 %v5530_v20 }
 0x31f   :  { %1173 = vmatpush1.bf16.msra.mxu1 %v5528_v7  ;;  %v6071_v7 = vld [vmem:[#allocation13 + $0x6] ss:$4 sm:$0x3] }
 0x3b5   :  { %v498_v26 = vpop.f32.mrb[0].mxu1 }
 0x3b6   :  { %v6053_v27 = vadd.f32 %v498_v26, %v377_v24  ;;  %v500_v28 = vpop.f32.mrb[1].mxu1 }
 0x3b7   :  { %v501_v29 = vadd.f32 %v500_v28, %v381_v25  ;;  %v502_v30 = vpop.f32.mrb[2].mxu1 }
 0x3b8   :  { %v505_v31 = vrot.slane %v6053_v27, 4  ;;  %v519_v32 = vmul.f32 %v6053_v27, %v6053_v27  ;;  %v503_v33 = vpop.f32.mrb[3].mxu1 }
 0x3b9   :  { %v511_v34 = vrot.slane %v501_v29, 4  ;;  %v520_v35 = vmul.f32 %v501_v29, %v501_v29 }
 0x3ba   :  { %v506_v36 = vadd.f32 %v505_v31, %v6053_v27  ;;  %v521_v37 = vrot.slane %v519_v32, 4 }
 0x3bb   :  { %v512_v38 = vadd.f32 %v511_v34, %v501_v29  ;;  %v527_v39 = vrot.slane %v520_v35, 4 }
 0x3bc   :  { %v507_v40 = vrot.slane %v506_v36, 2  ;;  %v522_v41 = vadd.f32 %v521_v37, %v519_v32 }
 0x3bd   :  { %v513_v42 = vrot.slane %v512_v38, 2  ;;  %v528_v43 = vadd.f32 %v527_v39, %v520_v35 }
 0x3be   :  { %v508_v44 = vadd.f32 %v507_v40, %v506_v36  ;;  %v523_v45 = vrot.slane %v522_v41, 2 }
 0x3bf   :  { %v514_v46 = vadd.f32 %v513_v42, %v512_v38  ;;  %v529_v47 = vrot.slane %v528_v43, 2 }
 0x3c0   :  { %v509_v48 = vrot.slane %v508_v44, 1  ;;  %v524_v49 = vadd.f32 %v523_v45, %v522_v41 }
 0x3c1   :  { %v515_v50 = vrot.slane %v514_v46, 1  ;;  %v530_v51 = vadd.f32 %v529_v47, %v528_v43 }
 0x3c2   :  { %v510_v52 = vadd.f32 %v509_v48, %v508_v44  ;;  %v525_v53 = vrot.slane %v524_v49, 1 }
 0x3c3   :  { %v516_v54 = vadd.f32 %v515_v50, %v514_v46  ;;  %v531_v55 = vrot.slane %v530_v51, 1 }
 0x3c4   :  { %v517_v56 = vmul.f32 0.125, %v510_v52  ;;  %v526_v57 = vadd.f32 %v525_v53, %v524_v49 }
 0x3c5   :  { %v518_v58 = vmul.f32 0.125, %v516_v54  ;;  %v532_v59 = vadd.f32 %v531_v55, %v530_v51 }
 0x3c6   :  { %v533_v60 = vmul.f32 0.125, %v526_v57  ;;  %v535_v61 = vmul.f32 %v517_v56, %v517_v56 }
 0x3c7   :  { %v534_v62 = vmul.f32 0.125, %v532_v59  ;;  %v536_v63 = vmul.f32 %v518_v58, %v518_v58 }
 0x3c8   :  { %v537_v0 = vsub.f32 %v533_v60, %v535_v61 }
 0x3c9   :  { %v538_v1 = vsub.f32 %v534_v62, %v536_v63 }
 0x3ca   :  { %v539_v2 = vadd.f32 0.8, %v537_v0 }
 0x3cb   :  { %v540_v3 = vadd.f32 0.8, %v538_v1 }
 0x3cc   :  { %5597 = vrsqrt.f32 %v539_v2 }
 0x3cd   :  { %5599 = vrsqrt.f32 %v540_v3 }
 0x3d6   :  { %v5598_v12 = vpop.eup %5597 }
 0x3d7   :  { %v5600_v14 = vpop.eup %5599  ;;  %v554_v15 = vmul.f32 %v5598_v12, %v6060_v9 }
 0x3d8   :  { %v555_v16 = vmul.f32 %v5600_v14, %v6063_v11 }
 0x3d9   :  { %v556_v17 = vmul.f32 %v554_v15, %v517_v56  ;;  %v580_v23 = vrot.slane %v554_v15, %v6044_v10 }
 0x3da   :  { %v557_v19 = vmul.f32 %v555_v16, %v518_v58  ;;  %v584_v24 = vrot.slane %v555_v16, %v6044_v10 }
 0x3db   :  { %v585_v28 = vmul.f32 %v580_v23, %v6053_v27 }
 0x3dc   :  { %v560_v20 = vcombine.low %v556_v17, %v557_v19  ;;  %v586_v30 = vmul.f32 %v584_v24, %v501_v29 }
 0x3de   :  { %v567_v21 = vrot.slane %v560_v20, %v6068_v18 }
 0x3e0   :  { %v574_v25 = vrot.slane %v567_v21, %v6068_v18 }
 0x3e2   :  { %v576_v26 = vsub.f32 %v6071_v7, %v574_v25 }
 0x3e4   :  { %v591_v31 = vrot.slane %v576_v26, %v6044_v10  ;;  %v595_v32 = vrot.slane %v576_v26, %v6049_v22 }
 0x3e6   :  { %v598_v33 = vadd.f32 %v591_v31, %v585_v28  ;;  %v599_v34 = vadd.f32 %v595_v32, %v586_v30 }
 0x3e8   :  { %v600_v35 = vmul.f32 0.2, %v598_v33  ;;  %v601_v36 = vmul.f32 0.2, %v599_v34 }
 0x3ea   :  { %v602_v37 = vmax.f32 %v598_v33, %v600_v35  ;;  %v603_v38 = vmax.f32 %v599_v34, %v601_v36  ;;  %v1540_v36 = vld [vmem:[#allocation10] sm:$0xff] }
 0x3ec   :  { %v604_v39 = vrot.slane %v602_v37, 4  ;;  %v610_v40 = vrot.slane %v603_v38, 4  ;;  %v618_v41 = vmul.f32 %v602_v37, %v602_v37  ;;  %v619_v42 = vmul.f32 %v603_v38, %v603_v38 }
 0x3ee   :  { %v605_v43 = vadd.f32 %v604_v39, %v602_v37  ;;  %v611_v44 = vadd.f32 %v610_v40, %v603_v38  ;;  %v620_v45 = vrot.slane %v618_v41, 4  ;;  %v626_v46 = vrot.slane %v619_v42, 4  ;;  %v1544_v39 = vld [vmem:[#allocation10 + $0x20] sm:$0xff]  ;;  %v1541_v40 = vld [vmem:[#allocation10 + $0x8] sm:$0xff] }
 0x3f0   :  { %v606_v27 = vrot.slane %v605_v43, 2  ;;  %v612_v29 = vrot.slane %v611_v44, 2  ;;  %v621_v47 = vadd.f32 %v620_v45, %v618_v41  ;;  %v627_v48 = vadd.f32 %v626_v46, %v619_v42  ;;  %v1545_v42 = vld [vmem:[#allocation10 + $0x28] sm:$0xff] }
 0x3f1   :  { %v4928_v41 = vcombine.high %v1540_v36, %v1544_v39  ;;  %v1549_v45 = vld [vmem:[#allocation10 + $0x48] sm:$0xff] }
 0x3f2   :  { %v607_v49 = vadd.f32 %v606_v27, %v605_v43  ;;  %v613_v50 = vadd.f32 %v612_v29, %v611_v44  ;;  %v622_v51 = vrot.slane %v621_v47, 2  ;;  %v628_v52 = vrot.slane %v627_v48, 2  ;;  %v1552_v44 = vld [vmem:[#allocation10 + $0x60] sm:$0xff]  ;;  %v1553_v27 = vld [vmem:[#allocation10 + $0x68] sm:$0xff] }
 0x3f3   :  { %v4930_v43 = vcombine.high %v1541_v40, %v1545_v42  ;;  %3117 = vmatprep.subr.bf16.mxu0 %v4928_v41 }
 0x3f4   :  { %v608_v53 = vrot.slane %v607_v49, 1  ;;  %v614_v54 = vrot.slane %v613_v50, 1  ;;  %v623_v55 = vadd.f32 %v622_v51, %v621_v47  ;;  %v629_v56 = vadd.f32 %v628_v52, %v627_v48  ;;  %v1557_v51 = vld [vmem:[#allocation10 + $0x88] sm:$0xff] }
 0x3f5   :  { %3199 = vmatprep.subr.bf16.mxu1 %v4930_v43  ;;  %v4937_v47 = vcombine.low %v1549_v45, %v1553_v27  ;;  %v4938_v48 = vcombine.high %v1549_v45, %v1553_v27  ;;  %v1612_v27 = vld [vmem:[#allocation10 + $0x240] sm:$0xff] }
 0x3f6   :  { %v609_v57 = vadd.f32 %v608_v53, %v607_v49  ;;  %v615_v58 = vadd.f32 %v614_v54, %v613_v50  ;;  %v624_v59 = vrot.slane %v623_v55, 1  ;;  %v630_v60 = vrot.slane %v629_v56, 1  ;;  %v1556_v49 = vld [vmem:[#allocation10 + $0x80] sm:$0xff]  ;;  %v1561_v53 = vld [vmem:[#allocation10 + $0xa8] sm:$0xff] }
 0x3f7   :  { %v1560_v50 = vld [vmem:[#allocation10 + $0xa0] sm:$0xff] }
 0x3f8   :  { %v616_v61 = vmul.f32 0.125, %v609_v57  ;;  %v617_v62 = vmul.f32 0.125, %v615_v58  ;;  %v625_v63 = vadd.f32 %v624_v59, %v623_v55  ;;  %v631_v0 = vadd.f32 %v630_v60, %v629_v56  ;;  %v1564_v57 = vld [vmem:[#allocation10 + $0xc0] sm:$0xff]  ;;  %v1565_v59 = vld [vmem:[#allocation10 + $0xc8] sm:$0xff] }
 0x3f9   :  { %v4944_v52 = vcombine.high %v1556_v49, %v1560_v50  ;;  %v4943_v54 = vcombine.low %v1556_v49, %v1560_v50  ;;  %v4945_v55 = vcombine.low %v1557_v51, %v1561_v53  ;;  %v4946_v56 = vcombine.high %v1557_v51, %v1561_v53  ;;  %v1568_v58 = vld [vmem:[#allocation10 + $0xe0] sm:$0xff]  ;;  %v1617_v49 = vld [vmem:[#allocation10 + $0x268] sm:$0xff] }
 0x3fa   :  { %v632_v1 = vmul.f32 0.125, %v625_v63  ;;  %v633_v2 = vmul.f32 0.125, %v631_v0  ;;  %v634_v3 = vmul.f32 %v616_v61, %v616_v61  ;;  %v635_v4 = vmul.f32 %v617_v62, %v617_v62  ;;  %v1620_v53 = vld [vmem:[#allocation10 + $0x280] sm:$0xff] }
 0x3fb   :  { %v4952_v60 = vcombine.high %v1564_v57, %v1568_v58 }
 0x3fc   :  { %v636_v5 = vsub.f32 %v632_v1, %v634_v3  ;;  %v637_v6 = vsub.f32 %v633_v2, %v635_v4  ;;  %v1572_v1 = vld [vmem:[#allocation10 + $0x100] sm:$0xff]  ;;  %v1573_v3 = vld [vmem:[#allocation10 + $0x108] sm:$0xff] }
 0x3fd   :  { %v1576_v2 = vld [vmem:[#allocation10 + $0x120] sm:$0xff] }
 0x3fe   :  { %v638_v12 = vadd.f32 0.8, %v636_v5  ;;  %v639_v13 = vadd.f32 0.8, %v637_v6  ;;  %v4960_v4 = vcombine.high %v1572_v1, %v1576_v2  ;;  %v1577_v5 = vld [vmem:[#allocation10 + $0x128] sm:$0xff]  ;;  %v4959_v6 = vcombine.low %v1572_v1, %v1576_v2 }
 0x3ff   :  { %v1633_v1 = vld [vmem:[#allocation10 + $0x2e8] sm:$0xff] }
 0x400   :  { %5601 = vrsqrt.f32 %v638_v12  ;;  %v4961_v12 = vcombine.low %v1573_v3, %v1577_v5 }
 0x401   :  { %5603 = vrsqrt.f32 %v639_v13  ;;  %v4962_v13 = vcombine.high %v1573_v3, %v1577_v5  ;;  %v1636_v5 = vld [vmem:[#allocation10 + $0x300] sm:$0xff] }
 0x40a   :  { %v5602_v14 = vpop.eup %5601 }
 0x40b   :  { %v5604_v15 = vpop.eup %5603  ;;  %v642_v16 = vmul.f32 %v5602_v14, %v6060_v9  ;;  %v1580_v14 = vld [vmem:[#allocation10 + $0x140] sm:$0xff] }
 0x40c   :  { %v643_v17 = vmul.f32 %v5604_v15, %v6063_v11  ;;  %v1584_v15 = vld [vmem:[#allocation10 + $0x160] sm:$0xff] }
 0x40d   :  { %v644_v19 = vmul.f32 %v642_v16, %v616_v61  ;;  %v668_v26 = vrot.slane %v642_v16, %v6044_v10  ;;  %v1569_v61 = vld [vmem:[#allocation10 + $0xe8] sm:$0xff] }
 0x40e   :  { %v645_v20 = vmul.f32 %v643_v17, %v617_v62  ;;  %v672_v25 = vrot.slane %v643_v17, %v6044_v10  ;;  %v4951_v62 = vcombine.low %v1564_v57, %v1568_v58  ;;  %v4953_v63 = vcombine.low %v1565_v59, %v1569_v61  ;;  %v1581_v16 = vld [vmem:[#allocation10 + $0x148] sm:$0xff] }
 0x40f   :  { %v673_v32 = vmul.f32 %v668_v26, %v602_v37  ;;  %v1548_v37 = vld [vmem:[#allocation10 + $0x40] sm:$0xff]  ;;  %v4954_v0 = vcombine.high %v1565_v59, %v1569_v61  ;;  %v4968_v17 = vcombine.high %v1580_v14, %v1584_v15  ;;  %v1589_v26 = vld [vmem:[#allocation10 + $0x188] sm:$0xff] }
 0x410   :  { %v648_v21 = vcombine.low %v644_v19, %v645_v20  ;;  %v674_v30 = vmul.f32 %v672_v25, %v603_v38  ;;  %v4929_v38 = vcombine.low %v1541_v40, %v1545_v42  ;;  %v4936_v46 = vcombine.high %v1548_v37, %v1552_v44  ;;  %v1585_v19 = vld [vmem:[#allocation10 + $0x168] sm:$0xff]  ;;  %v1592_v25 = vld [vmem:[#allocation10 + $0x1a0] sm:$0xff] }
 0x411   :  { %v4935_v29 = vcombine.low %v1548_v37, %v1552_v44  ;;  %v4967_v20 = vcombine.low %v1580_v14, %v1584_v15  ;;  %v1604_v42 = vld [vmem:[#allocation10 + $0x200] sm:$0xff]  ;;  %v1609_v37 = vld [vmem:[#allocation10 + $0x228] sm:$0xff] }
 0x412   :  { %v655_v23 = vrot.slane %v648_v21, %v6068_v18  ;;  %v4969_v21 = vcombine.low %v1581_v16, %v1585_v19  ;;  %v1625_v57 = vld [vmem:[#allocation10 + $0x2a8] sm:$0xff]  ;;  %v1628_v61 = vld [vmem:[#allocation10 + $0x2c0] sm:$0xff] }
 0x413   :  { %v1641_v14 = vld [vmem:[#allocation10 + $0x328] sm:$0xff] }
 0x414   :  { %v662_v24 = vrot.slane %v655_v23, %v6068_v18  ;;  %v4970_v23 = vcombine.high %v1581_v16, %v1585_v19  ;;  %v1644_v19 = vld [vmem:[#allocation10 + $0x340] sm:$0xff] }
 0x416   :  { %v664_v28 = vsub.f32 %v6071_v7, %v662_v24  ;;  %v4927_v7 = vcombine.low %v1540_v36, %v1544_v39  ;;  %v1588_v24 = vld [vmem:[#allocation10 + $0x180] sm:$0xff]  ;;  %v1601_v36 = vld [vmem:[#allocation10 + $0x1e8] sm:$0xff] }
 0x418   :  { %v683_v31 = vrot.slane %v664_v28, %v6049_v22  ;;  %v679_v9 = vrot.slane %v664_v28, %v6044_v10  ;;  %v4976_v28 = vcombine.high %v1588_v24, %v1592_v25 }
 0x41a   :  { %v687_v11 = vadd.f32 %v683_v31, %v674_v30  ;;  %v686_v33 = vadd.f32 %v679_v9, %v673_v32  ;;  %v1593_v30 = vld [vmem:[#allocation10 + $0x1a8] sm:$0xff]  ;;  %v4975_v31 = vcombine.low %v1588_v24, %v1592_v25 }
 0x41b   :  { %v4977_v32 = vcombine.low %v1589_v26, %v1593_v30  ;;  %v4978_v9 = vcombine.high %v1589_v26, %v1593_v30  ;;  %v1649_v25 = vld [vmem:[#allocation10 + $0x368] sm:$0xff]  ;;  %v1652_v26 = vld [vmem:[#allocation10 + $0x380] sm:$0xff] }
 0x41c   :  { %v695_v34 = vpack.c.bf16 %v687_v11, %v687_v11  ;;  %v694_v35 = vpack.c.bf16 %v686_v33, %v686_v33  ;;  %v1596_v11 = vld [vmem:[#allocation10 + $0x1c0] sm:$0xff] }
 0x41d   :  { %v1600_v33 = vld [vmem:[#allocation10 + $0x1e0] sm:$0xff] }
 0x41e   :  { %1133 = vmatprep.mubr.bf16.mxu0 %v695_v34  ;;  %1174 = vmatprep.mubr.bf16.mxu1 %v695_v34  ;;  %v1597_v34 = vld [vmem:[#allocation10 + $0x1c8] sm:$0xff]  ;;  %v4983_v39 = vcombine.low %v1596_v11, %v1600_v33 }
 0x41f   :  { %1134 = vmatmul.mubr.bf16.vlgmr.msra.gmra.mrb[12].mxu0 %v694_v35  ;;  %1175 = vmatmul.mubr.bf16.vlgmr.msra.gmra.mrb[4].mxu1 %v694_v35  ;;  %v4984_v35 = vcombine.high %v1596_v11, %v1600_v33  ;;  %v4985_v40 = vcombine.low %v1597_v34, %v1601_v36  ;;  %v4986_v41 = vcombine.high %v1597_v34, %v1601_v36  ;;  %v1657_v11 = vld [vmem:[#allocation10 + $0x3a8] sm:$0xff]  ;;  %v1660_v33 = vld [vmem:[#allocation10 + $0x3c0] sm:$0xff] }
 0x420   :  { %3118 = vmatpush1.bf16.msra.mxu0 %v4927_v7  ;;  %3200 = vmatpush1.bf16.msra.mxu1 %v4929_v38  ;;  %v1608_v7 = vld [vmem:[#allocation10 + $0x220] sm:$0xff]  ;;  %v1605_v38 = vld [vmem:[#allocation10 + $0x208] sm:$0xff] }
 0x421   :  { %3119 = vmatprep.subr.bf16.mxu0 %v4936_v46  ;;  %3201 = vmatprep.subr.bf16.mxu1 %v4938_v48  ;;  %v4992_v43 = vcombine.high %v1604_v42, %v1608_v7  ;;  %v4991_v44 = vcombine.low %v1604_v42, %v1608_v7  ;;  %v4993_v45 = vcombine.low %v1605_v38, %v1609_v37  ;;  %v1661_v36 = vld [vmem:[#allocation10 + $0x3c8] sm:$0xff] }
 0x422   :  { %v4994_v46 = vcombine.high %v1605_v38, %v1609_v37  ;;  %v6089_v37 = vld [vmem:[#allocation10 + $0x400] sm:$0xff] }
 0x424   :  { %3120 = vmatpush1.bf16.msra.mxu0 %v4935_v29  ;;  %3202 = vmatpush1.bf16.msra.mxu1 %v4937_v47  ;;  %v1616_v29 = vld [vmem:[#allocation10 + $0x260] sm:$0xff]  ;;  %v1613_v47 = vld [vmem:[#allocation10 + $0x248] sm:$0xff] }
 0x425   :  { %3121 = vmatprep.subr.bf16.mxu0 %v4944_v52  ;;  %3203 = vmatprep.subr.bf16.mxu1 %v4946_v56  ;;  %v5000_v48 = vcombine.high %v1612_v27, %v1616_v29  ;;  %v4999_v50 = vcombine.low %v1612_v27, %v1616_v29  ;;  %v5001_v51 = vcombine.low %v1613_v47, %v1617_v49  ;;  %v6097_v27 = vld [vmem:[#allocation10 + $0x428] sm:$0xff] }
 0x426   :  { %v5002_v52 = vcombine.high %v1613_v47, %v1617_v49  ;;  %v6106_v49 = vsub.s32 2, %v6041_v8 }
 0x428   :  { %3122 = vmatpush1.bf16.msra.mxu0 %v4943_v54  ;;  %3204 = vmatpush1.bf16.msra.mxu1 %v4945_v55  ;;  %v1624_v54 = vld [vmem:[#allocation10 + $0x2a0] sm:$0xff]  ;;  %v1621_v55 = vld [vmem:[#allocation10 + $0x288] sm:$0xff] }
 0x429   :  { %3123 = vmatprep.subr.bf16.mxu0 %v4952_v60  ;;  %3205 = vmatprep.subr.bf16.mxu1 %v4954_v0  ;;  %v5008_v56 = vcombine.high %v1620_v53, %v1624_v54  ;;  %v5007_v58 = vcombine.low %v1620_v53, %v1624_v54  ;;  %v5009_v59 = vcombine.low %v1621_v55, %v1625_v57 }
 0x42a   :  { %v5010_v60 = vcombine.high %v1621_v55, %v1625_v57 }
 0x42c   :  { %3124 = vmatpush1.bf16.msra.mxu0 %v4951_v62  ;;  %3206 = vmatpush1.bf16.msra.mxu1 %v4953_v63  ;;  %v1632_v62 = vld [vmem:[#allocation10 + $0x2e0] sm:$0xff]  ;;  %v1629_v63 = vld [vmem:[#allocation10 + $0x2c8] sm:$0xff] }
 0x42d   :  { %3125 = vmatprep.subr.bf16.mxu0 %v4960_v4  ;;  %3207 = vmatprep.subr.bf16.mxu1 %v4962_v13  ;;  %v5016_v0 = vcombine.high %v1628_v61, %v1632_v62  ;;  %v5015_v2 = vcombine.low %v1628_v61, %v1632_v62  ;;  %v5017_v3 = vcombine.low %v1629_v63, %v1633_v1 }
 0x42e   :  { %v5018_v4 = vcombine.high %v1629_v63, %v1633_v1 }
 0x430   :  { %3126 = vmatpush1.bf16.msra.mxu0 %v4959_v6  ;;  %3208 = vmatpush1.bf16.msra.mxu1 %v4961_v12  ;;  %v1640_v6 = vld [vmem:[#allocation10 + $0x320] sm:$0xff]  ;;  %v1637_v12 = vld [vmem:[#allocation10 + $0x308] sm:$0xff] }
 0x431   :  { %3127 = vmatprep.subr.bf16.mxu0 %v4968_v17  ;;  %3209 = vmatprep.subr.bf16.mxu1 %v4970_v23  ;;  %v5024_v13 = vcombine.high %v1636_v5, %v1640_v6  ;;  %v5023_v15 = vcombine.low %v1636_v5, %v1640_v6  ;;  %v5025_v16 = vcombine.low %v1637_v12, %v1641_v14 }
 0x432   :  { %v5026_v17 = vcombine.high %v1637_v12, %v1641_v14 }
 0x434   :  { %3128 = vmatpush1.bf16.msra.mxu0 %v4967_v20  ;;  %3210 = vmatpush1.bf16.msra.mxu1 %v4969_v21  ;;  %v1648_v20 = vld [vmem:[#allocation10 + $0x360] sm:$0xff]  ;;  %v1645_v21 = vld [vmem:[#allocation10 + $0x348] sm:$0xff] }
 0x435   :  { %3129 = vmatprep.subr.bf16.mxu0 %v4976_v28  ;;  %3211 = vmatprep.subr.bf16.mxu1 %v4978_v9  ;;  %v5031_v23 = vcombine.low %v1644_v19, %v1648_v20  ;;  %v5032_v24 = vcombine.high %v1644_v19, %v1648_v20  ;;  %v1656_v28 = vld [vmem:[#allocation10 + $0x3a0] sm:$0xff]  ;;  %v5033_v30 = vcombine.low %v1645_v21, %v1649_v25  ;;  %v1653_v9 = vld [vmem:[#allocation10 + $0x388] sm:$0xff] }
 0x436   :  { %v5042_v34 = vcombine.high %v1653_v9, %v1657_v11 }
 0x438   :  { %3130 = vmatpush1.bf16.msra.mxu0 %v4975_v31  ;;  %3212 = vmatpush1.bf16.msra.mxu1 %v4977_v32  ;;  %v5034_v31 = vcombine.high %v1645_v21, %v1649_v25  ;;  %v5040_v32 = vcombine.high %v1652_v26, %v1656_v28 }
 0x439   :  { %3131 = vmatprep.subr.bf16.mxu0 %v4984_v35  ;;  %3213 = vmatprep.subr.bf16.mxu1 %v4986_v41  ;;  %v1664_v35 = vld [vmem:[#allocation10 + $0x3e0] sm:$0xff]  ;;  %v5041_v41 = vcombine.low %v1653_v9, %v1657_v11 }
 0x43a   :  { %v5048_v42 = vcombine.high %v1660_v33, %v1664_v35  ;;  %v5047_v38 = vcombine.low %v1660_v33, %v1664_v35 }
 0x43c   :  { %3132 = vmatpush1.bf16.msra.mxu0 %v4983_v39  ;;  %3214 = vmatpush1.bf16.msra.mxu1 %v4985_v40  ;;  %v1665_v39 = vld [vmem:[#allocation10 + $0x3e8] sm:$0xff]  ;;  %v5039_v40 = vcombine.low %v1652_v26, %v1656_v28 }
 0x43d   :  { %3133 = vmatprep.subr.bf16.mxu0 %v4992_v43  ;;  %3215 = vmatprep.subr.bf16.mxu1 %v4994_v46  ;;  %v5050_v7 = vcombine.high %v1661_v36, %v1665_v39  ;;  %v5049_v43 = vcombine.low %v1661_v36, %v1665_v39 }
 0x440   :  { %3134 = vmatpush1.bf16.msra.mxu0 %v4991_v44  ;;  %3216 = vmatpush1.bf16.msra.mxu1 %v4993_v45  ;;  %v6091_v44 = vld [vmem:[#allocation10 + $0x420] sm:$0xff]  ;;  %v6093_v45 = vld [vmem:[#allocation10 + $0x408] sm:$0xff] }
 0x441   :  { %3135 = vmatprep.subr.bf16.mxu0 %v5000_v48  ;;  %3217 = vmatprep.subr.bf16.mxu1 %v5002_v52  ;;  %v5056_v46 = vcombine.high %v6089_v37, %v6091_v44  ;;  %v5055_v29 = vcombine.low %v6089_v37, %v6091_v44  ;;  %v5057_v47 = vcombine.low %v6093_v45, %v6097_v27 }
 0x442   :  { %v5058_v48 = vcombine.high %v6093_v45, %v6097_v27 }
 0x444   :  { %3136 = vmatpush1.bf16.msra.mxu0 %v4999_v50  ;;  %3218 = vmatpush1.bf16.msra.mxu1 %v5001_v51  ;;  %v689_v50 = vld [vmem:[#allocation13 + $0xc] ss:$4 sm:$0xf]  ;;  %v6109_v51 = vsub.s32 3, %v6041_v8 }
 0x445   :  { %3137 = vmatprep.subr.bf16.mxu0 %v5008_v56  ;;  %3219 = vmatprep.subr.bf16.mxu1 %v5010_v60  ;;  %v764_v52 = vrot.slane %v689_v50, %v6044_v10  ;;  %v772_v53 = vrot.slane %v689_v50, %v6106_v49  ;;  %v768_v54 = vrot.slane %v689_v50, %v6049_v22 }
 0x446   :  { %v776_v55 = vrot.slane %v689_v50, %v6109_v51 }
 0x448   :  { %3138 = vmatpush1.bf16.msra.mxu0 %v5007_v58  ;;  %3220 = vmatpush1.bf16.msra.mxu1 %v5009_v59 }
 0x449   :  { %3139 = vmatprep.subr.bf16.mxu0 %v5016_v0  ;;  %3221 = vmatprep.subr.bf16.mxu1 %v5018_v4 }
 0x44c   :  { %3140 = vmatpush1.bf16.msra.mxu0 %v5015_v2  ;;  %3222 = vmatpush1.bf16.msra.mxu1 %v5017_v3 }
 0x44d   :  { %3141 = vmatprep.subr.bf16.mxu0 %v5024_v13  ;;  %3223 = vmatprep.subr.bf16.mxu1 %v5026_v17 }
 0x450   :  { %3142 = vmatpush1.bf16.msra.mxu0 %v5023_v15  ;;  %3224 = vmatpush1.bf16.msra.mxu1 %v5025_v16 }
 0x451   :  { %3143 = vmatprep.subr.bf16.mxu0 %v5032_v24  ;;  %3225 = vmatprep.subr.bf16.mxu1 %v5034_v31 }
 0x454   :  { %3144 = vmatpush1.bf16.msra.mxu0 %v5031_v23  ;;  %3226 = vmatpush1.bf16.msra.mxu1 %v5033_v30 }
 0x455   :  { %3145 = vmatprep.subr.bf16.mxu0 %v5040_v32  ;;  %3227 = vmatprep.subr.bf16.mxu1 %v5042_v34 }
 0x458   :  { %3146 = vmatpush1.bf16.msra.mxu0 %v5039_v40  ;;  %3228 = vmatpush1.bf16.msra.mxu1 %v5041_v41 }
 0x459   :  { %3147 = vmatprep.subr.bf16.mxu0 %v5048_v42  ;;  %3229 = vmatprep.subr.bf16.mxu1 %v5050_v7 }
 0x45c   :  { %3148 = vmatpush1.bf16.msra.mxu0 %v5047_v38  ;;  %3230 = vmatpush1.bf16.msra.mxu1 %v5049_v43 }
 0x45d   :  { %3158 = vmatprep.subr.bf16.mxu0 %v5056_v46  ;;  %3240 = vmatprep.subr.bf16.mxu1 %v5058_v48 }
 0x4f2   :  { %v1135_v56 = vpop.f32.mrb[12].mxu0  ;;  %v1176_v57 = vpop.f32.mrb[4].mxu1 }
 0x4f3   :  { %v6115_v58 = vadd.f32 %v1135_v56, %v764_v52  ;;  %v6117_v59 = vadd.f32 %v1176_v57, %v772_v53  ;;  %v1137_v60 = vpop.f32.mrb[13].mxu0  ;;  %v1178_v61 = vpop.f32.mrb[5].mxu1 }
 0x4f4   :  { %v6119_v62 = vadd.f32 %v1137_v60, %v768_v54  ;;  %v6121_v63 = vadd.f32 %v1178_v61, %v776_v55  ;;  %v1139_v0 = vpop.f32.mrb[14].mxu0  ;;  %v1180_v1 = vpop.f32.mrb[6].mxu1 }
 0x4f5   :  { %v1183_v2 = vrot.slane %v6115_v58, 4  ;;  %v1211_v3 = vmul.f32 %v6115_v58, %v6115_v58  ;;  %v1195_v4 = vrot.slane %v6117_v59, 4  ;;  %v1213_v5 = vmul.f32 %v6117_v59, %v6117_v59  ;;  %v1140_v6 = vpop.f32.mrb[15].mxu0  ;;  %v1181_v12 = vpop.f32.mrb[7].mxu1 }
 0x4f6   :  { %v1189_v13 = vrot.slane %v6119_v62, 4  ;;  %v1212_v14 = vmul.f32 %v6119_v62, %v6119_v62  ;;  %v1201_v15 = vrot.slane %v6121_v63, 4  ;;  %v1214_v16 = vmul.f32 %v6121_v63, %v6121_v63 }
 0x4f7   :  { %v1184_v17 = vadd.f32 %v1183_v2, %v6115_v58  ;;  %v1215_v19 = vrot.slane %v1211_v3, 4  ;;  %v1196_v20 = vadd.f32 %v1195_v4, %v6117_v59  ;;  %v1227_v21 = vrot.slane %v1213_v5, 4 }
 0x4f8   :  { %v1190_v23 = vadd.f32 %v1189_v13, %v6119_v62  ;;  %v1221_v24 = vrot.slane %v1212_v14, 4  ;;  %v1202_v25 = vadd.f32 %v1201_v15, %v6121_v63  ;;  %v1233_v26 = vrot.slane %v1214_v16, 4 }
 0x4f9   :  { %v1185_v28 = vrot.slane %v1184_v17, 2  ;;  %v1216_v30 = vadd.f32 %v1215_v19, %v1211_v3  ;;  %v1197_v31 = vrot.slane %v1196_v20, 2  ;;  %v1228_v32 = vadd.f32 %v1227_v21, %v1213_v5 }
 0x4fa   :  { %v1191_v9 = vrot.slane %v1190_v23, 2  ;;  %v1222_v11 = vadd.f32 %v1221_v24, %v1212_v14  ;;  %v1203_v33 = vrot.slane %v1202_v25, 2  ;;  %v1234_v34 = vadd.f32 %v1233_v26, %v1214_v16 }
 0x4fb   :  { %v1186_v35 = vadd.f32 %v1185_v28, %v1184_v17  ;;  %v1217_v36 = vrot.slane %v1216_v30, 2  ;;  %v1198_v39 = vadd.f32 %v1197_v31, %v1196_v20  ;;  %v1229_v40 = vrot.slane %v1228_v32, 2 }
 0x4fc   :  { %v1192_v41 = vadd.f32 %v1191_v9, %v1190_v23  ;;  %v1223_v42 = vrot.slane %v1222_v11, 2  ;;  %v1204_v7 = vadd.f32 %v1203_v33, %v1202_v25  ;;  %v1235_v38 = vrot.slane %v1234_v34, 2 }
 0x4fd   :  { %v1187_v43 = vrot.slane %v1186_v35, 1  ;;  %v1218_v46 = vadd.f32 %v1217_v36, %v1216_v30  ;;  %v1199_v48 = vrot.slane %v1198_v39, 1  ;;  %v1230_v50 = vadd.f32 %v1229_v40, %v1228_v32 }
 0x4fe   :  { %v1193_v52 = vrot.slane %v1192_v41, 1  ;;  %v1224_v53 = vadd.f32 %v1223_v42, %v1222_v11  ;;  %v1205_v54 = vrot.slane %v1204_v7, 1  ;;  %v1236_v55 = vadd.f32 %v1235_v38, %v1234_v34 }
 0x4ff   :  { %v1188_v56 = vadd.f32 %v1187_v43, %v1186_v35  ;;  %v1219_v57 = vrot.slane %v1218_v46, 1  ;;  %v1200_v60 = vadd.f32 %v1199_v48, %v1198_v39  ;;  %v1231_v61 = vrot.slane %v1230_v50, 1  ;;  %v691_v35 = vld [vmem:[#allocation13 + $0xd] ss:$4 sm:$0xf] }
 0x500   :  { %v1194_v0 = vadd.f32 %v1193_v52, %v1192_v41  ;;  %v1225_v1 = vrot.slane %v1224_v53, 1  ;;  %v1206_v2 = vadd.f32 %v1205_v54, %v1204_v7  ;;  %v1237_v3 = vrot.slane %v1236_v55, 1 }
 0x501   :  { %v1207_v4 = vmul.f32 0.125, %v1188_v56  ;;  %v1220_v5 = vadd.f32 %v1219_v57, %v1218_v46  ;;  %v1209_v6 = vmul.f32 0.125, %v1200_v60  ;;  %v1232_v12 = vadd.f32 %v1231_v61, %v1230_v50 }
 0x502   :  { %v1208_v13 = vmul.f32 0.125, %v1194_v0  ;;  %v1226_v14 = vadd.f32 %v1225_v1, %v1224_v53  ;;  %v1210_v15 = vmul.f32 0.125, %v1206_v2  ;;  %v1238_v16 = vadd.f32 %v1237_v3, %v1236_v55 }
 0x503   :  { %v1239_v17 = vmul.f32 0.125, %v1220_v5  ;;  %v1243_v19 = vmul.f32 %v1207_v4, %v1207_v4  ;;  %v1241_v20 = vmul.f32 0.125, %v1232_v12  ;;  %v1245_v21 = vmul.f32 %v1209_v6, %v1209_v6  ;;  %v6160_v5 = vld [vmem:[#allocation13 + $0xe] ss:$4 sm:$0xf] }
 0x504   :  { %v1240_v23 = vmul.f32 0.125, %v1226_v14  ;;  %v1244_v24 = vmul.f32 %v1208_v13, %v1208_v13  ;;  %v1242_v25 = vmul.f32 0.125, %v1238_v16  ;;  %v1246_v26 = vmul.f32 %v1210_v15, %v1210_v15 }
 0x505   :  { %v1247_v28 = vsub.f32 %v1239_v17, %v1243_v19  ;;  %v1249_v30 = vsub.f32 %v1241_v20, %v1245_v21  ;;  %v6140_v36 = vrot.slane %v691_v35, %v6044_v10  ;;  %v6143_v39 = vrot.slane %v691_v35, %v6106_v49 }
 0x506   :  { %v1248_v31 = vsub.f32 %v1240_v23, %v1244_v24  ;;  %v1250_v32 = vsub.f32 %v1242_v25, %v1246_v26  ;;  %v6146_v40 = vrot.slane %v691_v35, %v6049_v22  ;;  %v6149_v42 = vrot.slane %v691_v35, %v6109_v51 }
 0x507   :  { %v1251_v9 = vadd.f32 0.8, %v1247_v28  ;;  %v1253_v11 = vadd.f32 0.8, %v1249_v30 }
 0x508   :  { %v1252_v33 = vadd.f32 0.8, %v1248_v31  ;;  %v1254_v34 = vadd.f32 0.8, %v1250_v32 }
 0x509   :  { %5605 = vrsqrt.f32 %v1251_v9 }
 0x50a   :  { %5607 = vrsqrt.f32 %v1253_v11 }
 0x50b   :  { %5609 = vrsqrt.f32 %v1252_v33 }
 0x50c   :  { %5611 = vrsqrt.f32 %v1254_v34 }
 0x513   :  { %v5606_v41 = vpop.eup %5605 }
 0x514   :  { %v5608_v7 = vpop.eup %5607  ;;  %v1280_v38 = vmul.f32 %v5606_v41, %v6140_v36 }
 0x515   :  { %v5610_v43 = vpop.eup %5609  ;;  %v1282_v46 = vmul.f32 %v5608_v7, %v6143_v39 }
 0x516   :  { %v5612_v48 = vpop.eup %5611  ;;  %v1284_v50 = vmul.f32 %v1280_v38, %v1207_v4  ;;  %v1281_v52 = vmul.f32 %v5610_v43, %v6146_v40  ;;  %v1321_v2 = vrot.slane %v1280_v38, %v6044_v10 }
 0x517   :  { %v1286_v53 = vmul.f32 %v1282_v46, %v1209_v6  ;;  %v1283_v54 = vmul.f32 %v5612_v48, %v6149_v42  ;;  %v1329_v3 = vrot.slane %v1282_v46, %v6044_v10 }
 0x518   :  { %v1285_v55 = vmul.f32 %v1281_v52, %v1208_v13  ;;  %v1325_v4 = vrot.slane %v1281_v52, %v6044_v10  ;;  %v1334_v14 = vmul.f32 %v1321_v2, %v6115_v58 }
 0x519   :  { %v1287_v56 = vmul.f32 %v1283_v54, %v1210_v15  ;;  %v1333_v6 = vrot.slane %v1283_v54, %v6044_v10  ;;  %v1336_v15 = vmul.f32 %v1329_v3, %v6117_v59 }
 0x51a   :  { %v1292_v57 = vcombine.low %v1284_v50, %v1285_v55  ;;  %v1335_v16 = vmul.f32 %v1325_v4, %v6119_v62 }
 0x51b   :  { %v1293_v60 = vcombine.low %v1286_v53, %v1287_v56  ;;  %v1337_v17 = vmul.f32 %v1333_v6, %v6121_v63 }
 0x51c   :  { %v1300_v61 = vrot.slane %v1292_v57, %v6068_v18 }
 0x51d   :  { %v1307_v0 = vrot.slane %v1293_v60, %v6068_v18 }
 0x51f   :  { %v1308_v1 = vcombine.low %v1300_v61, %v1307_v0 }
 0x521   :  { %v1315_v12 = vrot.slane %v1308_v1, %v6068_v18 }
 0x523   :  { %v1317_v13 = vsub.f32 %v6160_v5, %v1315_v12 }
 0x525   :  { %v1342_v19 = vrot.slane %v1317_v13, %v6044_v10  ;;  %v1350_v20 = vrot.slane %v1317_v13, %v6106_v49  ;;  %v1354_v21 = vrot.slane %v1317_v13, %v6109_v51  ;;  %v1346_v23 = vrot.slane %v1317_v13, %v6049_v22 }
 0x527   :  { %v1359_v24 = vadd.f32 %v1342_v19, %v1334_v14  ;;  %v1361_v25 = vadd.f32 %v1350_v20, %v1336_v15  ;;  %v1362_v26 = vadd.f32 %v1354_v21, %v1337_v17  ;;  %v1360_v28 = vadd.f32 %v1346_v23, %v1335_v16 }
 0x529   :  { %v1363_v30 = vmul.f32 0.2, %v1359_v24  ;;  %v1365_v58 = vmul.f32 0.2, %v1361_v25  ;;  %v1366_v31 = vmul.f32 0.2, %v1362_v26 }
 0x52a   :  { %v1364_v59 = vmul.f32 0.2, %v1360_v28 }
 0x52b   :  { %v6173_v32 = vmax.f32 %v1359_v24, %v1363_v30  ;;  %v6175_v62 = vmax.f32 %v1361_v25, %v1365_v58  ;;  %v6177_v63 = vmax.f32 %v1362_v26, %v1366_v31 }
 0x52c   :  { %v6179_v9 = vmax.f32 %v1360_v28, %v1364_v59 }
 0x52d   :  { %v1383_v11 = vrot.slane %v6175_v62, 4  ;;  %v1389_v33 = vrot.slane %v6177_v63, 4  ;;  %v1401_v34 = vmul.f32 %v6175_v62, %v6175_v62  ;;  %v1402_v35 = vmul.f32 %v6177_v63, %v6177_v63 }
 0x52e   :  { %v1371_v41 = vrot.slane %v6173_v32, 4  ;;  %v1377_v7 = vrot.slane %v6179_v9, 4  ;;  %v1399_v38 = vmul.f32 %v6173_v32, %v6173_v32  ;;  %v1400_v43 = vmul.f32 %v6179_v9, %v6179_v9 }
 0x52f   :  { %v1384_v46 = vadd.f32 %v1383_v11, %v6175_v62  ;;  %v1390_v48 = vadd.f32 %v1389_v33, %v6177_v63  ;;  %v1415_v50 = vrot.slane %v1401_v34, 4  ;;  %v1421_v52 = vrot.slane %v1402_v35, 4 }
 0x530   :  { %v1372_v53 = vadd.f32 %v1371_v41, %v6173_v32  ;;  %v1378_v54 = vadd.f32 %v1377_v7, %v6179_v9  ;;  %v1403_v55 = vrot.slane %v1399_v38, 4  ;;  %v1409_v56 = vrot.slane %v1400_v43, 4 }
 0x531   :  { %v1385_v57 = vrot.slane %v1384_v46, 2  ;;  %v1391_v60 = vrot.slane %v1390_v48, 2  ;;  %v1416_v61 = vadd.f32 %v1415_v50, %v1401_v34  ;;  %v1422_v0 = vadd.f32 %v1421_v52, %v1402_v35 }
 0x532   :  { %v1373_v1 = vrot.slane %v1372_v53, 2  ;;  %v1379_v2 = vrot.slane %v1378_v54, 2  ;;  %v1404_v3 = vadd.f32 %v1403_v55, %v1399_v38  ;;  %v1410_v4 = vadd.f32 %v1409_v56, %v1400_v43 }
 0x533   :  { %v1386_v6 = vadd.f32 %v1385_v57, %v1384_v46  ;;  %v1392_v12 = vadd.f32 %v1391_v60, %v1390_v48  ;;  %v1417_v13 = vrot.slane %v1416_v61, 2  ;;  %v1423_v14 = vrot.slane %v1422_v0, 2 }
 0x534   :  { %v1374_v15 = vadd.f32 %v1373_v1, %v1372_v53  ;;  %v1380_v16 = vadd.f32 %v1379_v2, %v1378_v54  ;;  %v1405_v17 = vrot.slane %v1404_v3, 2  ;;  %v1411_v19 = vrot.slane %v1410_v4, 2 }
 0x535   :  { %v1387_v20 = vrot.slane %v1386_v6, 1  ;;  %v1393_v21 = vrot.slane %v1392_v12, 1  ;;  %v1418_v23 = vadd.f32 %v1417_v13, %v1416_v61  ;;  %v1424_v24 = vadd.f32 %v1423_v14, %v1422_v0 }
 0x536   :  { %v1375_v25 = vrot.slane %v1374_v15, 1  ;;  %v1381_v26 = vrot.slane %v1380_v16, 1  ;;  %v1406_v28 = vadd.f32 %v1405_v17, %v1404_v3  ;;  %v1412_v30 = vadd.f32 %v1411_v19, %v1410_v4 }
 0x537   :  { %v1388_v58 = vadd.f32 %v1387_v20, %v1386_v6  ;;  %v1394_v31 = vadd.f32 %v1393_v21, %v1392_v12  ;;  %v1419_v59 = vrot.slane %v1418_v23, 1  ;;  %v1425_v11 = vrot.slane %v1424_v24, 1 }
 0x538   :  { %v1376_v33 = vadd.f32 %v1375_v25, %v1374_v15  ;;  %v1382_v34 = vadd.f32 %v1381_v26, %v1380_v16  ;;  %v1407_v35 = vrot.slane %v1406_v28, 1  ;;  %v1413_v41 = vrot.slane %v1412_v30, 1 }
 0x539   :  { %v1397_v7 = vmul.f32 0.125, %v1388_v58  ;;  %v1398_v38 = vmul.f32 0.125, %v1394_v31  ;;  %v1420_v43 = vadd.f32 %v1419_v59, %v1418_v23  ;;  %v1426_v46 = vadd.f32 %v1425_v11, %v1424_v24 }
 0x53a   :  { %v1395_v48 = vmul.f32 0.125, %v1376_v33  ;;  %v1396_v50 = vmul.f32 0.125, %v1382_v34  ;;  %v1408_v52 = vadd.f32 %v1407_v35, %v1406_v28  ;;  %v1414_v53 = vadd.f32 %v1413_v41, %v1412_v30 }
 0x53b   :  { %v1429_v54 = vmul.f32 0.125, %v1420_v43  ;;  %v1430_v55 = vmul.f32 0.125, %v1426_v46  ;;  %v1433_v56 = vmul.f32 %v1397_v7, %v1397_v7  ;;  %v1434_v57 = vmul.f32 %v1398_v38, %v1398_v38 }
 0x53c   :  { %v1427_v60 = vmul.f32 0.125, %v1408_v52  ;;  %v1428_v61 = vmul.f32 0.125, %v1414_v53  ;;  %v1431_v0 = vmul.f32 %v1395_v48, %v1395_v48  ;;  %v1432_v1 = vmul.f32 %v1396_v50, %v1396_v50 }
 0x53d   :  { %v1437_v2 = vsub.f32 %v1429_v54, %v1433_v56  ;;  %v1438_v3 = vsub.f32 %v1430_v55, %v1434_v57  ;;  %v1676_v56 = vld [vmem:[#allocation10 + $0x440] sm:$0xff] }
 0x53e   :  { %v1435_v4 = vsub.f32 %v1427_v60, %v1431_v0  ;;  %v1436_v6 = vsub.f32 %v1428_v61, %v1432_v1  ;;  %v1681_v60 = vld [vmem:[#allocation10 + $0x468] sm:$0xff]  ;;  %v1684_v61 = vld [vmem:[#allocation10 + $0x480] sm:$0xff] }
 0x53f   :  { %v1441_v12 = vadd.f32 0.8, %v1437_v2  ;;  %v1442_v13 = vadd.f32 0.8, %v1438_v3  ;;  %v1688_v2 = vld [vmem:[#allocation10 + $0x4a0] sm:$0xff]  ;;  %v1685_v3 = vld [vmem:[#allocation10 + $0x488] sm:$0xff] }
 0x540   :  { %v1439_v14 = vadd.f32 0.8, %v1435_v4  ;;  %v1440_v15 = vadd.f32 0.8, %v1436_v6  ;;  %v1689_v4 = vld [vmem:[#allocation10 + $0x4a8] sm:$0xff]  ;;  %v5071_v37 = vcombine.low %v1684_v61, %v1688_v2 }
 0x541   :  { %5613 = vrsqrt.f32 %v1441_v12  ;;  %v5073_v44 = vcombine.low %v1685_v3, %v1689_v4 }
 0x542   :  { %5615 = vrsqrt.f32 %v1442_v13 }
 0x543   :  { %5617 = vrsqrt.f32 %v1439_v14  ;;  %v5072_v14 = vcombine.high %v1684_v61, %v1688_v2 }
 0x544   :  { %5619 = vrsqrt.f32 %v1440_v15  ;;  %v5074_v15 = vcombine.high %v1685_v3, %v1689_v4  ;;  %v1740_v3 = vld [vmem:[#allocation10 + $0x640] sm:$0xff] }
 0x545   :  { %v1744_v4 = vld [vmem:[#allocation10 + $0x660] sm:$0xff] }
 0x54b   :  { %v5614_v16 = vpop.eup %5613 }
 0x54c   :  { %v5616_v17 = vpop.eup %5615  ;;  %v1449_v19 = vmul.f32 %v5614_v16, %v6143_v39  ;;  %v1692_v16 = vld [vmem:[#allocation10 + $0x4c0] sm:$0xff] }
 0x54d   :  { %v5618_v20 = vpop.eup %5617  ;;  %v1450_v21 = vmul.f32 %v5616_v17, %v6149_v42  ;;  %v1696_v17 = vld [vmem:[#allocation10 + $0x4e0] sm:$0xff] }
 0x54e   :  { %v5620_v23 = vpop.eup %5619  ;;  %v1453_v24 = vmul.f32 %v1449_v19, %v1397_v7  ;;  %v1447_v25 = vmul.f32 %v5618_v20, %v6140_v36  ;;  %v1496_v26 = vrot.slane %v1449_v19, %v6044_v10  ;;  %v1693_v19 = vld [vmem:[#allocation10 + $0x4c8] sm:$0xff]  ;;  %v5080_v45 = vcombine.high %v1692_v16, %v1696_v17 }
 0x54f   :  { %v1454_v28 = vmul.f32 %v1450_v21, %v1398_v38  ;;  %v1448_v30 = vmul.f32 %v5620_v23, %v6146_v40  ;;  %v1500_v41 = vrot.slane %v1450_v21, %v6044_v10  ;;  %v1697_v20 = vld [vmem:[#allocation10 + $0x4e8] sm:$0xff] }
 0x550   :  { %v1451_v58 = vmul.f32 %v1447_v25, %v1395_v48  ;;  %v1503_v31 = vmul.f32 %v1496_v26, %v6175_v62  ;;  %v1488_v36 = vrot.slane %v1447_v25, %v6044_v10  ;;  %v5082_v27 = vcombine.high %v1693_v19, %v1697_v20  ;;  %v1701_v21 = vld [vmem:[#allocation10 + $0x508] sm:$0xff] }
 0x551   :  { %v1460_v59 = vcombine.low %v1453_v24, %v1454_v28  ;;  %v1452_v11 = vmul.f32 %v1448_v30, %v1396_v50  ;;  %v1492_v35 = vrot.slane %v1448_v30, %v6044_v10  ;;  %v1504_v43 = vmul.f32 %v1500_v41, %v6177_v63  ;;  %v1705_v23 = vld [vmem:[#allocation10 + $0x528] sm:$0xff]  ;;  %v1708_v30 = vld [vmem:[#allocation10 + $0x540] sm:$0xff] }
 0x552   :  { %v1501_v38 = vmul.f32 %v1488_v36, %v6173_v32  ;;  %v5079_v24 = vcombine.low %v1692_v16, %v1696_v17  ;;  %v5081_v25 = vcombine.low %v1693_v19, %v1697_v20  ;;  %v5090_v28 = vcombine.high %v1701_v21, %v1705_v23  ;;  %v1717_v36 = vld [vmem:[#allocation10 + $0x588] sm:$0xff]  ;;  %v1748_v19 = vld [vmem:[#allocation10 + $0x680] sm:$0xff] }
 0x553   :  { %v1474_v33 = vrot.slane %v1460_v59, %v6068_v18  ;;  %v1459_v39 = vcombine.low %v1451_v58, %v1452_v11  ;;  %v1502_v62 = vmul.f32 %v1492_v35, %v6179_v9  ;;  %v1677_v9 = vld [vmem:[#allocation10 + $0x448] sm:$0xff]  ;;  %v1712_v58 = vld [vmem:[#allocation10 + $0x560] sm:$0xff]  ;;  %v5128_v16 = vcombine.high %v1740_v3, %v1744_v4 }
 0x554   :  { %v5066_v1 = vcombine.high %v1677_v9, %v1681_v60  ;;  %v5065_v13 = vcombine.low %v1677_v9, %v1681_v60  ;;  %v1713_v59 = vld [vmem:[#allocation10 + $0x568] sm:$0xff]  ;;  %v1720_v35 = vld [vmem:[#allocation10 + $0x5a0] sm:$0xff] }
 0x555   :  { %v1467_v34 = vrot.slane %v1459_v39, %v6068_v18  ;;  %v5096_v39 = vcombine.high %v1708_v30, %v1712_v58  ;;  %v1721_v41 = vld [vmem:[#allocation10 + $0x5a8] sm:$0xff]  ;;  %v1752_v20 = vld [vmem:[#allocation10 + $0x6a0] sm:$0xff] }
 0x556   :  { %v1733_v9 = vld [vmem:[#allocation10 + $0x608] sm:$0xff] }
 0x557   :  { %v1475_v42 = vcombine.low %v1467_v34, %v1474_v33  ;;  %v5089_v33 = vcombine.low %v1701_v21, %v1705_v23  ;;  %v1737_v60 = vld [vmem:[#allocation10 + $0x628] sm:$0xff]  ;;  %v1756_v21 = vld [vmem:[#allocation10 + $0x6c0] sm:$0xff] }
 0x558   :  { %v5122_v2 = vcombine.high %v1733_v9, %v1737_v60  ;;  %v1760_v23 = vld [vmem:[#allocation10 + $0x6e0] sm:$0xff] }
 0x559   :  { %v1482_v7 = vrot.slane %v1475_v42, %v6068_v18  ;;  %v1716_v42 = vld [vmem:[#allocation10 + $0x580] sm:$0xff] }
 0x55b   :  { %v1484_v40 = vsub.f32 %v6160_v5, %v1482_v7  ;;  %v1680_v5 = vld [vmem:[#allocation10 + $0x460] sm:$0xff]  ;;  %v5095_v7 = vcombine.low %v1708_v30, %v1712_v58  ;;  %v5144_v30 = vcombine.high %v1756_v21, %v1760_v23 }
 0x55c   :  { %v5064_v0 = vcombine.high %v1676_v56, %v1680_v5  ;;  %v5063_v12 = vcombine.low %v1676_v56, %v1680_v5  ;;  %v1732_v56 = vld [vmem:[#allocation10 + $0x600] sm:$0xff] }
 0x55d   :  { %v1513_v46 = vrot.slane %v1484_v40, %v6049_v22  ;;  %v1509_v48 = vrot.slane %v1484_v40, %v6044_v10  ;;  %v1521_v50 = vrot.slane %v1484_v40, %v6109_v51  ;;  %v1517_v52 = vrot.slane %v1484_v40, %v6106_v49  ;;  %v1736_v5 = vld [vmem:[#allocation10 + $0x620] sm:$0xff] }
 0x55f   :  { %v1527_v53 = vadd.f32 %v1513_v46, %v1502_v62  ;;  %v1526_v54 = vadd.f32 %v1509_v48, %v1501_v38  ;;  %v1529_v55 = vadd.f32 %v1521_v50, %v1504_v43  ;;  %v6217_v57 = vadd.f32 %v1517_v52, %v1503_v31  ;;  %v1709_v31 = vld [vmem:[#allocation10 + $0x548] sm:$0xff]  ;;  %v1724_v43 = vld [vmem:[#allocation10 + $0x5c0] sm:$0xff] }
 0x560   :  { %v5098_v34 = vcombine.high %v1709_v31, %v1713_v59  ;;  %v5097_v40 = vcombine.low %v1709_v31, %v1713_v59  ;;  %v5104_v62 = vcombine.high %v1716_v42, %v1720_v35  ;;  %v5106_v38 = vcombine.high %v1717_v36, %v1721_v41  ;;  %v1728_v46 = vld [vmem:[#allocation10 + $0x5e0] sm:$0xff]  ;;  %v1725_v48 = vld [vmem:[#allocation10 + $0x5c8] sm:$0xff] }
 0x561   :  { %v6219_v32 = vpack.c.bf16 %v1527_v53, %v1527_v53  ;;  %v6221_v63 = vpack.c.bf16 %v1526_v54, %v1526_v54  ;;  %v6227_v6 = vpack.c.bf16 %v1529_v55, %v1529_v55  ;;  %v1729_v50 = vld [vmem:[#allocation10 + $0x5e8] sm:$0xff]  ;;  %v5103_v52 = vcombine.low %v1716_v42, %v1720_v35  ;;  %v1764_v31 = vld [vmem:[#allocation10 + $0x700] sm:$0xff] }
 0x562   :  { %v5105_v53 = vcombine.low %v1717_v36, %v1721_v41  ;;  %v5112_v54 = vcombine.high %v1724_v43, %v1728_v46  ;;  %v5114_v55 = vcombine.high %v1725_v48, %v1729_v50  ;;  %v5111_v61 = vcombine.low %v1724_v43, %v1728_v46  ;;  %v1768_v59 = vld [vmem:[#allocation10 + $0x720] sm:$0xff] }
 0x563   :  { %3149 = vmatprep.mubr.bf16.mxu0 %v6219_v32  ;;  %3231 = vmatprep.mubr.bf16.mxu1 %v6219_v32  ;;  %v5152_v42 = vcombine.high %v1764_v31, %v1768_v59  ;;  %v1772_v36 = vld [vmem:[#allocation10 + $0x740] sm:$0xff] }
 0x564   :  { %3150 = vmatmul.mubr.bf16.vlgmr.msra.gmra.mrb[16].mxu0 %v6221_v63  ;;  %3232 = vmatmul.mubr.bf16.vlgmr.msra.gmra.mrb[8].mxu1 %v6221_v63  ;;  %v1776_v41 = vld [vmem:[#allocation10 + $0x760] sm:$0xff] }
 0x565   :  { %3159 = vmatpush1.bf16.msra.mxu0 %v5055_v29  ;;  %3241 = vmatpush1.bf16.msra.mxu1 %v5057_v47  ;;  %v1700_v29 = vld [vmem:[#allocation10 + $0x500] sm:$0xff]  ;;  %v5160_v43 = vcombine.high %v1772_v36, %v1776_v41 }
 0x566   :  { %3190 = vmatprep.mubr.bf16.mxu0 %v6227_v6  ;;  %3272 = vmatprep.mubr.bf16.mxu1 %v6227_v6  ;;  %v1704_v47 = vld [vmem:[#allocation10 + $0x520] sm:$0xff] }
 0x567   :  { %3160 = vmatprep.subr.bf16.mxu0 %v5064_v0  ;;  %3242 = vmatprep.subr.bf16.mxu1 %v5066_v1  ;;  %v5088_v26 = vcombine.high %v1700_v29, %v1704_v47  ;;  %v5087_v11 = vcombine.low %v1700_v29, %v1704_v47  ;;  %v5113_v0 = vcombine.low %v1725_v48, %v1729_v50  ;;  %v1780_v48 = vld [vmem:[#allocation10 + $0x780] sm:$0xff] }
 0x568   :  { %v5120_v1 = vcombine.high %v1732_v56, %v1736_v5  ;;  %v5136_v29 = vcombine.high %v1748_v19, %v1752_v20  ;;  %v1784_v50 = vld [vmem:[#allocation10 + $0x7a0] sm:$0xff] }
 0x569   :  { %3161 = vmatpush1.bf16.msra.mxu0 %v5063_v12  ;;  %3243 = vmatpush1.bf16.msra.mxu1 %v5065_v13  ;;  %v1741_v12 = vld [vmem:[#allocation10 + $0x648] sm:$0xff] }
 0x56a   :  { %3162 = vmatprep.subr.bf16.mxu0 %v5072_v14  ;;  %3244 = vmatprep.subr.bf16.mxu1 %v5074_v15  ;;  %v1745_v13 = vld [vmem:[#allocation10 + $0x668] sm:$0xff]  ;;  %v5119_v14 = vcombine.low %v1732_v56, %v1736_v5  ;;  %v5121_v15 = vcombine.low %v1733_v9, %v1737_v60  ;;  %v5168_v56 = vcombine.high %v1780_v48, %v1784_v50  ;;  %v1788_v9 = vld [vmem:[#allocation10 + $0x7c0] sm:$0xff] }
 0x56b   :  { %v5130_v17 = vcombine.high %v1741_v12, %v1745_v13  ;;  %v1792_v60 = vld [vmem:[#allocation10 + $0x7e0] sm:$0xff] }
 0x56d   :  { %3163 = vmatpush1.bf16.msra.mxu0 %v5071_v37  ;;  %3245 = vmatpush1.bf16.msra.mxu1 %v5073_v44  ;;  %v1749_v37 = vld [vmem:[#allocation10 + $0x688] sm:$0xff] }
 0x56e   :  { %3164 = vmatprep.subr.bf16.mxu0 %v5080_v45  ;;  %3246 = vmatprep.subr.bf16.mxu1 %v5082_v27  ;;  %v1753_v44 = vld [vmem:[#allocation10 + $0x6a8] sm:$0xff]  ;;  %v5127_v45 = vcombine.low %v1740_v3, %v1744_v4  ;;  %v5129_v27 = vcombine.low %v1741_v12, %v1745_v13  ;;  %v5176_v3 = vcombine.high %v1788_v9, %v1792_v60  ;;  %v1542_v12 = vld [vmem:[#allocation10 + $0x10] sm:$0xff] }
 0x56f   :  { %v5138_v47 = vcombine.high %v1749_v37, %v1753_v44  ;;  %v1546_v13 = vld [vmem:[#allocation10 + $0x30] sm:$0xff] }
 0x571   :  { %3165 = vmatpush1.bf16.msra.mxu0 %v5079_v24  ;;  %3247 = vmatpush1.bf16.msra.mxu1 %v5081_v25  ;;  %v1757_v24 = vld [vmem:[#allocation10 + $0x6c8] sm:$0xff] }
 0x572   :  { %3166 = vmatprep.subr.bf16.mxu0 %v5088_v26  ;;  %3248 = vmatprep.subr.bf16.mxu1 %v5090_v28  ;;  %v1761_v25 = vld [vmem:[#allocation10 + $0x6e8] sm:$0xff]  ;;  %v5135_v26 = vcombine.low %v1748_v19, %v1752_v20  ;;  %v5137_v28 = vcombine.low %v1749_v37, %v1753_v44  ;;  %v4932_v19 = vcombine.high %v1542_v12, %v1546_v13  ;;  %v1550_v37 = vld [vmem:[#allocation10 + $0x50] sm:$0xff] }
 0x573   :  { %v5146_v58 = vcombine.high %v1757_v24, %v1761_v25  ;;  %v1554_v44 = vld [vmem:[#allocation10 + $0x70] sm:$0xff] }
 0x575   :  { %3167 = vmatpush1.bf16.msra.mxu0 %v5087_v11  ;;  %3249 = vmatpush1.bf16.msra.mxu1 %v5089_v33  ;;  %v1765_v11 = vld [vmem:[#allocation10 + $0x708] sm:$0xff] }
 0x576   :  { %3168 = vmatprep.subr.bf16.mxu0 %v5096_v39  ;;  %3250 = vmatprep.subr.bf16.mxu1 %v5098_v34  ;;  %v1769_v33 = vld [vmem:[#allocation10 + $0x728] sm:$0xff]  ;;  %v5143_v39 = vcombine.low %v1756_v21, %v1760_v23  ;;  %v5145_v34 = vcombine.low %v1757_v24, %v1761_v25  ;;  %v4940_v23 = vcombine.high %v1550_v37, %v1554_v44  ;;  %v1558_v25 = vld [vmem:[#allocation10 + $0x90] sm:$0xff] }
 0x577   :  { %v5154_v35 = vcombine.high %v1765_v11, %v1769_v33 }
 0x579   :  { %3169 = vmatpush1.bf16.msra.mxu0 %v5095_v7  ;;  %3251 = vmatpush1.bf16.msra.mxu1 %v5097_v40  ;;  %v1773_v7 = vld [vmem:[#allocation10 + $0x748] sm:$0xff] }
 0x57a   :  { %3170 = vmatprep.subr.bf16.mxu0 %v5104_v62  ;;  %3252 = vmatprep.subr.bf16.mxu1 %v5106_v38  ;;  %v1777_v40 = vld [vmem:[#allocation10 + $0x768] sm:$0xff]  ;;  %v5151_v62 = vcombine.low %v1764_v31, %v1768_v59  ;;  %v5153_v38 = vcombine.low %v1765_v11, %v1769_v33  ;;  %v1566_v11 = vld [vmem:[#allocation10 + $0xd0] sm:$0xff] }
 0x57b   :  { %v5162_v46 = vcombine.high %v1773_v7, %v1777_v40  ;;  %v1570_v33 = vld [vmem:[#allocation10 + $0xf0] sm:$0xff] }
 0x57d   :  { %3171 = vmatpush1.bf16.msra.mxu0 %v5103_v52  ;;  %3253 = vmatpush1.bf16.msra.mxu1 %v5105_v53  ;;  %v1781_v52 = vld [vmem:[#allocation10 + $0x788] sm:$0xff] }
 0x57e   :  { %3172 = vmatprep.subr.bf16.mxu0 %v5112_v54  ;;  %3254 = vmatprep.subr.bf16.mxu1 %v5114_v55  ;;  %v1785_v53 = vld [vmem:[#allocation10 + $0x7a8] sm:$0xff]  ;;  %v5159_v54 = vcombine.low %v1772_v36, %v1776_v41  ;;  %v5161_v55 = vcombine.low %v1773_v7, %v1777_v40  ;;  %v4956_v36 = vcombine.high %v1566_v11, %v1570_v33  ;;  %v1574_v7 = vld [vmem:[#allocation10 + $0x110] sm:$0xff] }
 0x57f   :  { %v5170_v5 = vcombine.high %v1781_v52, %v1785_v53  ;;  %v1578_v40 = vld [vmem:[#allocation10 + $0x130] sm:$0xff] }
 0x581   :  { %3173 = vmatpush1.bf16.msra.mxu0 %v5111_v61  ;;  %3255 = vmatpush1.bf16.msra.mxu1 %v5113_v0  ;;  %v1789_v61 = vld [vmem:[#allocation10 + $0x7c8] sm:$0xff] }
 0x582   :  { %3174 = vmatprep.subr.bf16.mxu0 %v5120_v1  ;;  %3256 = vmatprep.subr.bf16.mxu1 %v5122_v2  ;;  %v1793_v0 = vld [vmem:[#allocation10 + $0x7e8] sm:$0xff]  ;;  %v5167_v1 = vcombine.low %v1780_v48, %v1784_v50  ;;  %v5169_v2 = vcombine.low %v1781_v52, %v1785_v53  ;;  %v1582_v50 = vld [vmem:[#allocation10 + $0x150] sm:$0xff]  ;;  %v1583_v53 = vld [vmem:[#allocation10 + $0x158] sm:$0xff] }
 0x583   :  { %v5178_v4 = vcombine.high %v1789_v61, %v1793_v0  ;;  %v1586_v52 = vld [vmem:[#allocation10 + $0x170] sm:$0xff] }
 0x585   :  { %3175 = vmatpush1.bf16.msra.mxu0 %v5119_v14  ;;  %3257 = vmatpush1.bf16.msra.mxu1 %v5121_v15  ;;  %v1543_v14 = vld [vmem:[#allocation10 + $0x18] sm:$0xff] }
 0x586   :  { %3176 = vmatprep.subr.bf16.mxu0 %v5128_v16  ;;  %3258 = vmatprep.subr.bf16.mxu1 %v5130_v17  ;;  %v1547_v15 = vld [vmem:[#allocation10 + $0x38] sm:$0xff]  ;;  %v5175_v16 = vcombine.low %v1788_v9, %v1792_v60  ;;  %v5177_v17 = vcombine.low %v1789_v61, %v1793_v0  ;;  %v1590_v60 = vld [vmem:[#allocation10 + $0x190] sm:$0xff] }
 0x587   :  { %v4934_v20 = vcombine.high %v1543_v14, %v1547_v15  ;;  %v4933_v21 = vcombine.low %v1543_v14, %v1547_v15  ;;  %v1594_v61 = vld [vmem:[#allocation10 + $0x1b0] sm:$0xff]  ;;  %v1591_v0 = vld [vmem:[#allocation10 + $0x198] sm:$0xff] }
 0x588   :  { %v1602_v14 = vld [vmem:[#allocation10 + $0x1f0] sm:$0xff]  ;;  %v1599_v15 = vld [vmem:[#allocation10 + $0x1d8] sm:$0xff] }
 0x589   :  { %3177 = vmatpush1.bf16.msra.mxu0 %v5127_v45  ;;  %3259 = vmatpush1.bf16.msra.mxu1 %v5129_v27  ;;  %v1551_v45 = vld [vmem:[#allocation10 + $0x58] sm:$0xff] }
 0x58a   :  { %3178 = vmatprep.subr.bf16.mxu0 %v5136_v29  ;;  %3260 = vmatprep.subr.bf16.mxu1 %v5138_v47  ;;  %v1555_v27 = vld [vmem:[#allocation10 + $0x78] sm:$0xff]  ;;  %v4931_v29 = vcombine.low %v1542_v12, %v1546_v13  ;;  %v6239_v47 = vpack.c.bf16 %v6217_v57, %v6217_v57  ;;  %v1598_v13 = vld [vmem:[#allocation10 + $0x1d0] sm:$0xff] }
 0x58b   :  { %v4942_v24 = vcombine.high %v1551_v45, %v1555_v27  ;;  %v4941_v57 = vcombine.low %v1551_v45, %v1555_v27  ;;  %v1610_v45 = vld [vmem:[#allocation10 + $0x230] sm:$0xff]  ;;  %v1607_v27 = vld [vmem:[#allocation10 + $0x218] sm:$0xff] }
 0x58d   :  { %3179 = vmatpush1.bf16.msra.mxu0 %v5135_v26  ;;  %3261 = vmatpush1.bf16.msra.mxu1 %v5137_v28  ;;  %v1562_v26 = vld [vmem:[#allocation10 + $0xb0] sm:$0xff]  ;;  %v1559_v28 = vld [vmem:[#allocation10 + $0x98] sm:$0xff] }
 0x58e   :  { %3180 = vmatprep.subr.bf16.mxu0 %v5144_v30  ;;  %3262 = vmatprep.subr.bf16.mxu1 %v5146_v58  ;;  %v1563_v30 = vld [vmem:[#allocation10 + $0xb8] sm:$0xff]  ;;  %v4939_v58 = vcombine.low %v1550_v37, %v1554_v44  ;;  %v4948_v31 = vcombine.high %v1558_v25, %v1562_v26  ;;  %v1606_v44 = vld [vmem:[#allocation10 + $0x210] sm:$0xff] }
 0x58f   :  { %v4950_v59 = vcombine.high %v1559_v28, %v1563_v30 }
 0x591   :  { %3181 = vmatpush1.bf16.msra.mxu0 %v5143_v39  ;;  %3263 = vmatpush1.bf16.msra.mxu1 %v5145_v34  ;;  %v1567_v39 = vld [vmem:[#allocation10 + $0xd8] sm:$0xff] }
 0x592   :  { %3182 = vmatprep.subr.bf16.mxu0 %v5152_v42  ;;  %3264 = vmatprep.subr.bf16.mxu1 %v5154_v35  ;;  %v1571_v34 = vld [vmem:[#allocation10 + $0xf8] sm:$0xff]  ;;  %v4947_v42 = vcombine.low %v1558_v25, %v1562_v26  ;;  %v4949_v35 = vcombine.low %v1559_v28, %v1563_v30  ;;  %v1614_v26 = vld [vmem:[#allocation10 + $0x250] sm:$0xff] }
 0x593   :  { %v4958_v41 = vcombine.high %v1567_v39, %v1571_v34  ;;  %v1618_v28 = vld [vmem:[#allocation10 + $0x270] sm:$0xff]  ;;  %v1615_v30 = vld [vmem:[#allocation10 + $0x258] sm:$0xff] }
 0x595   :  { %3183 = vmatpush1.bf16.msra.mxu0 %v5151_v62  ;;  %3265 = vmatpush1.bf16.msra.mxu1 %v5153_v38  ;;  %v1579_v62 = vld [vmem:[#allocation10 + $0x138] sm:$0xff]  ;;  %v4955_v38 = vcombine.low %v1566_v11, %v1570_v33  ;;  %v1622_v33 = vld [vmem:[#allocation10 + $0x290] sm:$0xff] }
 0x596   :  { %3184 = vmatprep.subr.bf16.mxu0 %v5160_v43  ;;  %3266 = vmatprep.subr.bf16.mxu1 %v5162_v46  ;;  %v4957_v43 = vcombine.low %v1567_v39, %v1571_v34  ;;  %v4964_v46 = vcombine.high %v1574_v7, %v1578_v40  ;;  %v1626_v39 = vld [vmem:[#allocation10 + $0x2b0] sm:$0xff]  ;;  %v1623_v34 = vld [vmem:[#allocation10 + $0x298] sm:$0xff] }
 0x599   :  { %3185 = vmatpush1.bf16.msra.mxu0 %v5159_v54  ;;  %3267 = vmatpush1.bf16.msra.mxu1 %v5161_v55  ;;  %v1587_v54 = vld [vmem:[#allocation10 + $0x178] sm:$0xff]  ;;  %v4963_v55 = vcombine.low %v1574_v7, %v1578_v40  ;;  %v1630_v40 = vld [vmem:[#allocation10 + $0x2d0] sm:$0xff] }
 0x59a   :  { %3186 = vmatprep.subr.bf16.mxu0 %v5168_v56  ;;  %3268 = vmatprep.subr.bf16.mxu1 %v5170_v5  ;;  %v4972_v5 = vcombine.high %v1582_v50, %v1586_v52  ;;  %v4974_v9 = vcombine.high %v1583_v53, %v1587_v54 }
 0x59d   :  { %3187 = vmatpush1.bf16.msra.mxu0 %v5167_v1  ;;  %3269 = vmatpush1.bf16.msra.mxu1 %v5169_v2  ;;  %v1595_v1 = vld [vmem:[#allocation10 + $0x1b8] sm:$0xff]  ;;  %v4971_v2 = vcombine.low %v1582_v50, %v1586_v52  ;;  %v1638_v52 = vld [vmem:[#allocation10 + $0x310] sm:$0xff] }
 0x59e   :  { %3188 = vmatprep.subr.bf16.mxu0 %v5176_v3  ;;  %3270 = vmatprep.subr.bf16.mxu1 %v5178_v4  ;;  %v4973_v3 = vcombine.low %v1583_v53, %v1587_v54  ;;  %v4980_v4 = vcombine.high %v1590_v60, %v1594_v61  ;;  %v4982_v12 = vcombine.high %v1591_v0, %v1595_v1  ;;  %v1642_v53 = vld [vmem:[#allocation10 + $0x330] sm:$0xff]  ;;  %v1639_v54 = vld [vmem:[#allocation10 + $0x318] sm:$0xff] }
 0x5a1   :  { %3189 = vmatpush1.bf16.msra.mxu0 %v5175_v16  ;;  %3271 = vmatpush1.bf16.msra.mxu1 %v5177_v17  ;;  %v1603_v16 = vld [vmem:[#allocation10 + $0x1f8] sm:$0xff]  ;;  %v4979_v17 = vcombine.low %v1590_v60, %v1594_v61  ;;  %v1646_v61 = vld [vmem:[#allocation10 + $0x350] sm:$0xff] }
 0x5a2   :  { %3281 = vmatprep.subr.bf16.mxu0 %v4932_v19  ;;  %3363 = vmatprep.subr.bf16.mxu1 %v4934_v20  ;;  %v4981_v19 = vcombine.low %v1591_v0, %v1595_v1  ;;  %v4988_v20 = vcombine.high %v1598_v13, %v1602_v14  ;;  %v4990_v37 = vcombine.high %v1599_v15, %v1603_v16  ;;  %v1650_v0 = vld [vmem:[#allocation10 + $0x370] sm:$0xff]  ;;  %v1647_v1 = vld [vmem:[#allocation10 + $0x358] sm:$0xff] }
 0x5a4   :  { %3191 = vmatmul.mubr.bf16.vlgmr.msra.gmra.mrb[16].mxu0 %v6239_v47  ;;  %3273 = vmatmul.mubr.bf16.vlgmr.msra.gmra.mrb[8].mxu1 %v6239_v47 }
 0x5a5   :  { %3282 = vmatpush1.bf16.msra.mxu0 %v4931_v29  ;;  %3313 = vmatprep.mubr.bf16.mxu0 %v6219_v32  ;;  %v1611_v29 = vld [vmem:[#allocation10 + $0x238] sm:$0xff] }
 0x5a6   :  { %3364 = vmatpush1.bf16.msra.mxu1 %v4933_v21  ;;  %3395 = vmatprep.mubr.bf16.mxu1 %v6219_v32  ;;  %v1575_v32 = vld [vmem:[#allocation10 + $0x118] sm:$0xff]  ;;  %v4987_v21 = vcombine.low %v1598_v13, %v1602_v14  ;;  %v4998_v25 = vcombine.high %v1607_v27, %v1611_v29  ;;  %v1654_v14 = vld [vmem:[#allocation10 + $0x390] sm:$0xff] }
 0x5a7   :  { %3283 = vmatprep.subr.bf16.mxu0 %v4940_v23  ;;  %3365 = vmatprep.subr.bf16.mxu1 %v4942_v24  ;;  %v4966_v48 = vcombine.high %v1575_v32, %v1579_v62  ;;  %v4965_v56 = vcombine.low %v1575_v32, %v1579_v62  ;;  %v4989_v23 = vcombine.low %v1599_v15, %v1603_v16  ;;  %v1634_v32 = vld [vmem:[#allocation10 + $0x2f0] sm:$0xff]  ;;  %v1631_v62 = vld [vmem:[#allocation10 + $0x2d8] sm:$0xff] }
 0x5a8   :  { %v4996_v24 = vcombine.high %v1606_v44, %v1610_v45  ;;  %v1658_v15 = vld [vmem:[#allocation10 + $0x3b0] sm:$0xff]  ;;  %v1655_v16 = vld [vmem:[#allocation10 + $0x398] sm:$0xff] }
 0x5a9   :  { %3284 = vmatpush1.bf16.msra.mxu0 %v4939_v58  ;;  %v1619_v58 = vld [vmem:[#allocation10 + $0x278] sm:$0xff] }
 0x5aa   :  { %3366 = vmatpush1.bf16.msra.mxu1 %v4941_v57  ;;  %3285 = vmatprep.subr.bf16.mxu0 %v4948_v31  ;;  %v4995_v57 = vcombine.low %v1606_v44, %v1610_v45  ;;  %v4997_v31 = vcombine.low %v1607_v27, %v1611_v29  ;;  %v5006_v11 = vcombine.high %v1615_v30, %v1619_v58  ;;  %v1662_v45 = vld [vmem:[#allocation10 + $0x3d0] sm:$0xff]  ;;  %v1663_v29 = vld [vmem:[#allocation10 + $0x3d8] sm:$0xff] }
 0x5ab   :  { %3367 = vmatprep.subr.bf16.mxu1 %v4950_v59  ;;  %v5004_v59 = vcombine.high %v1614_v26, %v1618_v28  ;;  %v1666_v27 = vld [vmem:[#allocation10 + $0x3f0] sm:$0xff] }
 0x5ad   :  { %3286 = vmatpush1.bf16.msra.mxu0 %v4947_v42  ;;  %v1627_v42 = vld [vmem:[#allocation10 + $0x2b8] sm:$0xff] }
 0x5ae   :  { %3368 = vmatpush1.bf16.msra.mxu1 %v4949_v35  ;;  %3287 = vmatprep.subr.bf16.mxu0 %v4956_v36  ;;  %v5003_v35 = vcombine.low %v1614_v26, %v1618_v28  ;;  %v5005_v36 = vcombine.low %v1615_v30, %v1619_v58  ;;  %v5014_v7 = vcombine.high %v1623_v34, %v1627_v42  ;;  %v1670_v28 = vld [vmem:[#allocation10 + $0x410] sm:$0xff]  ;;  %v1671_v58 = vld [vmem:[#allocation10 + $0x418] sm:$0xff] }
 0x5af   :  { %3369 = vmatprep.subr.bf16.mxu1 %v4958_v41  ;;  %v5012_v41 = vcombine.high %v1622_v33, %v1626_v39  ;;  %v1674_v30 = vld [vmem:[#allocation10 + $0x430] sm:$0xff] }
 0x5b1   :  { %3288 = vmatpush1.bf16.msra.mxu0 %v4955_v38  ;;  %v1635_v38 = vld [vmem:[#allocation10 + $0x2f8] sm:$0xff] }
 0x5b2   :  { %3370 = vmatpush1.bf16.msra.mxu1 %v4957_v43  ;;  %3289 = vmatprep.subr.bf16.mxu0 %v4964_v46  ;;  %v5011_v43 = vcombine.low %v1622_v33, %v1626_v39  ;;  %v5013_v46 = vcombine.low %v1623_v34, %v1627_v42  ;;  %v5022_v50 = vcombine.high %v1631_v62, %v1635_v38  ;;  %v1678_v39 = vld [vmem:[#allocation10 + $0x450] sm:$0xff] }
 0x5b3   :  { %3371 = vmatprep.subr.bf16.mxu1 %v4966_v48  ;;  %v5020_v48 = vcombine.high %v1630_v40, %v1634_v32  ;;  %v1682_v34 = vld [vmem:[#allocation10 + $0x470] sm:$0xff]  ;;  %v5059_v42 = vcombine.low %v1670_v28, %v1674_v30 }
 0x5b5   :  { %3290 = vmatpush1.bf16.msra.mxu0 %v4963_v55  ;;  %v1643_v55 = vld [vmem:[#allocation10 + $0x338] sm:$0xff] }
 0x5b6   :  { %3372 = vmatpush1.bf16.msra.mxu1 %v4965_v56  ;;  %3291 = vmatprep.subr.bf16.mxu0 %v4972_v5  ;;  %v5019_v56 = vcombine.low %v1630_v40, %v1634_v32  ;;  %v5021_v5 = vcombine.low %v1631_v62, %v1635_v38  ;;  %v5030_v60 = vcombine.high %v1639_v54, %v1643_v55  ;;  %v1686_v40 = vld [vmem:[#allocation10 + $0x490] sm:$0xff]  ;;  %v1687_v38 = vld [vmem:[#allocation10 + $0x498] sm:$0xff] }
 0x5b7   :  { %3373 = vmatprep.subr.bf16.mxu1 %v4974_v9  ;;  %v5028_v9 = vcombine.high %v1638_v52, %v1642_v53  ;;  %v1690_v32 = vld [vmem:[#allocation10 + $0x4b0] sm:$0xff] }
 0x5b9   :  { %3292 = vmatpush1.bf16.msra.mxu0 %v4971_v2  ;;  %v1651_v2 = vld [vmem:[#allocation10 + $0x378] sm:$0xff] }
 0x5ba   :  { %3374 = vmatpush1.bf16.msra.mxu1 %v4973_v3  ;;  %3293 = vmatprep.subr.bf16.mxu0 %v4980_v4  ;;  %v5027_v3 = vcombine.low %v1638_v52, %v1642_v53  ;;  %v5029_v4 = vcombine.low %v1639_v54, %v1643_v55  ;;  %v5038_v13 = vcombine.high %v1647_v1, %v1651_v2  ;;  %v1694_v53 = vld [vmem:[#allocation10 + $0x4d0] sm:$0xff]  ;;  %v1695_v55 = vld [vmem:[#allocation10 + $0x4d8] sm:$0xff] }
 0x5bb   :  { %3375 = vmatprep.subr.bf16.mxu1 %v4982_v12  ;;  %v5036_v12 = vcombine.high %v1646_v61, %v1650_v0  ;;  %v1698_v54 = vld [vmem:[#allocation10 + $0x4f0] sm:$0xff] }
 0x5bd   :  { %3294 = vmatpush1.bf16.msra.mxu0 %v4979_v17  ;;  %v1659_v17 = vld [vmem:[#allocation10 + $0x3b8] sm:$0xff] }
 0x5be   :  { %3376 = vmatpush1.bf16.msra.mxu1 %v4981_v19  ;;  %3295 = vmatprep.subr.bf16.mxu0 %v4988_v20  ;;  %v5035_v19 = vcombine.low %v1646_v61, %v1650_v0  ;;  %v5037_v20 = vcombine.low %v1647_v1, %v1651_v2  ;;  %v5046_v44 = vcombine.high %v1655_v16, %v1659_v17  ;;  %v1702_v61 = vld [vmem:[#allocation10 + $0x510] sm:$0xff]  ;;  %v1703_v1 = vld [vmem:[#allocation10 + $0x518] sm:$0xff] }
 0x5bf   :  { %3377 = vmatprep.subr.bf16.mxu1 %v4990_v37  ;;  %v5044_v37 = vcombine.high %v1654_v14, %v1658_v15  ;;  %v1706_v0 = vld [vmem:[#allocation10 + $0x530] sm:$0xff]  ;;  %v1707_v2 = vld [vmem:[#allocation10 + $0x538] sm:$0xff] }
 0x5c1   :  { %3296 = vmatpush1.bf16.msra.mxu0 %v4987_v21  ;;  %v1667_v21 = vld [vmem:[#allocation10 + $0x3f8] sm:$0xff] }
 0x5c2   :  { %3378 = vmatpush1.bf16.msra.mxu1 %v4989_v23  ;;  %3297 = vmatprep.subr.bf16.mxu0 %v4996_v24  ;;  %v5043_v23 = vcombine.low %v1654_v14, %v1658_v15  ;;  %v5045_v24 = vcombine.low %v1655_v16, %v1659_v17  ;;  %v5054_v26 = vcombine.high %v1663_v29, %v1667_v21  ;;  %v1714_v14 = vld [vmem:[#allocation10 + $0x570] sm:$0xff]  ;;  %v1711_v15 = vld [vmem:[#allocation10 + $0x558] sm:$0xff] }
 0x5c3   :  { %3379 = vmatprep.subr.bf16.mxu1 %v4998_v25  ;;  %v5052_v25 = vcombine.high %v1662_v45, %v1666_v27  ;;  %v1715_v16 = vld [vmem:[#allocation10 + $0x578] sm:$0xff]  ;;  %v5091_v17 = vcombine.low %v1702_v61, %v1706_v0 }
 0x5c5   :  { %3298 = vmatpush1.bf16.msra.mxu0 %v4995_v57  ;;  %v1675_v57 = vld [vmem:[#allocation10 + $0x438] sm:$0xff] }
 0x5c6   :  { %3380 = vmatpush1.bf16.msra.mxu1 %v4997_v31  ;;  %3299 = vmatprep.subr.bf16.mxu0 %v5004_v59  ;;  %v5051_v31 = vcombine.low %v1662_v45, %v1666_v27  ;;  %v5053_v59 = vcombine.low %v1663_v29, %v1667_v21  ;;  %v5062_v33 = vcombine.high %v1671_v58, %v1675_v57  ;;  %v1722_v45 = vld [vmem:[#allocation10 + $0x5b0] sm:$0xff]  ;;  %v1719_v27 = vld [vmem:[#allocation10 + $0x598] sm:$0xff] }
 0x5c7   :  { %3381 = vmatprep.subr.bf16.mxu1 %v5006_v11  ;;  %v5060_v11 = vcombine.high %v1670_v28, %v1674_v30  ;;  %v1723_v29 = vld [vmem:[#allocation10 + $0x5b8] sm:$0xff]  ;;  %v1730_v28 = vld [vmem:[#allocation10 + $0x5f0] sm:$0xff] }
 0x5c8   :  { %v1727_v30 = vld [vmem:[#allocation10 + $0x5d8] sm:$0xff] }
 0x5c9   :  { %3300 = vmatpush1.bf16.msra.mxu0 %v5003_v35  ;;  %v1679_v35 = vld [vmem:[#allocation10 + $0x458] sm:$0xff] }
 0x5ca   :  { %3382 = vmatpush1.bf16.msra.mxu1 %v5005_v36  ;;  %3301 = vmatprep.subr.bf16.mxu0 %v5012_v41  ;;  %v1683_v36 = vld [vmem:[#allocation10 + $0x478] sm:$0xff]  ;;  %v5061_v41 = vcombine.low %v1671_v58, %v1675_v57 }
 0x5cb   :  { %3383 = vmatprep.subr.bf16.mxu1 %v5014_v7  ;;  %v5068_v7 = vcombine.high %v1678_v39, %v1682_v34  ;;  %v5070_v62 = vcombine.high %v1679_v35, %v1683_v36  ;;  %v1731_v58 = vld [vmem:[#allocation10 + $0x5f8] sm:$0xff] }
 0x5cd   :  { %3302 = vmatpush1.bf16.msra.mxu0 %v5011_v43  ;;  %v1691_v43 = vld [vmem:[#allocation10 + $0x4b8] sm:$0xff] }
 0x5ce   :  { %3384 = vmatpush1.bf16.msra.mxu1 %v5013_v46  ;;  %3303 = vmatprep.subr.bf16.mxu0 %v5020_v48  ;;  %v5067_v46 = vcombine.low %v1678_v39, %v1682_v34  ;;  %v5069_v48 = vcombine.low %v1679_v35, %v1683_v36  ;;  %v5078_v52 = vcombine.high %v1687_v38, %v1691_v43  ;;  %v1738_v39 = vld [vmem:[#allocation10 + $0x630] sm:$0xff]  ;;  %v1735_v34 = vld [vmem:[#allocation10 + $0x618] sm:$0xff] }
 0x5cf   :  { %3385 = vmatprep.subr.bf16.mxu1 %v5022_v50  ;;  %v5076_v50 = vcombine.high %v1686_v40, %v1690_v32  ;;  %v5117_v36 = vcombine.low %v1727_v30, %v1731_v58 }
 0x5d1   :  { %3304 = vmatpush1.bf16.msra.mxu0 %v5019_v56  ;;  %v1699_v56 = vld [vmem:[#allocation10 + $0x4f8] sm:$0xff] }
 0x5d2   :  { %3386 = vmatpush1.bf16.msra.mxu1 %v5021_v5  ;;  %3305 = vmatprep.subr.bf16.mxu0 %v5028_v9  ;;  %v5075_v5 = vcombine.low %v1686_v40, %v1690_v32  ;;  %v5084_v9 = vcombine.high %v1694_v53, %v1698_v54  ;;  %v1742_v40 = vld [vmem:[#allocation10 + $0x650] sm:$0xff] }
 0x5d3   :  { %3387 = vmatprep.subr.bf16.mxu1 %v5030_v60  ;;  %v5086_v60 = vcombine.high %v1695_v55, %v1699_v56  ;;  %v1746_v32 = vld [vmem:[#allocation10 + $0x670] sm:$0xff] }
 0x5d5   :  { %3306 = vmatpush1.bf16.msra.mxu0 %v5027_v3  ;;  %v5085_v3 = vcombine.low %v1695_v55, %v1699_v56  ;;  %v1755_v55 = vld [vmem:[#allocation10 + $0x6b8] sm:$0xff]  ;;  %v5131_v56 = vcombine.low %v1742_v40, %v1746_v32 }
 0x5d6   :  { %3388 = vmatpush1.bf16.msra.mxu1 %v5029_v4  ;;  %3307 = vmatprep.subr.bf16.mxu0 %v5036_v12  ;;  %v5092_v4 = vcombine.high %v1702_v61, %v1706_v0  ;;  %v5094_v12 = vcombine.high %v1703_v1, %v1707_v2  ;;  %v1762_v61 = vld [vmem:[#allocation10 + $0x6f0] sm:$0xff]  ;;  %v1759_v0 = vld [vmem:[#allocation10 + $0x6d8] sm:$0xff] }
 0x5d7   :  { %3389 = vmatprep.subr.bf16.mxu1 %v5038_v13  ;;  %v1710_v13 = vld [vmem:[#allocation10 + $0x550] sm:$0xff] }
 0x5d8   :  { %v5099_v21 = vcombine.low %v1710_v13, %v1714_v14 }
 0x5d9   :  { %3308 = vmatpush1.bf16.msra.mxu0 %v5035_v19  ;;  %v5093_v19 = vcombine.low %v1703_v1, %v1707_v2  ;;  %v1763_v1 = vld [vmem:[#allocation10 + $0x6f8] sm:$0xff] }
 0x5da   :  { %3390 = vmatpush1.bf16.msra.mxu1 %v5037_v20  ;;  %3309 = vmatprep.subr.bf16.mxu0 %v5044_v37  ;;  %v5100_v20 = vcombine.high %v1710_v13, %v1714_v14  ;;  %v5102_v37 = vcombine.high %v1711_v15, %v1715_v16  ;;  %v1770_v13 = vld [vmem:[#allocation10 + $0x730] sm:$0xff]  ;;  %v1767_v14 = vld [vmem:[#allocation10 + $0x718] sm:$0xff] }
 0x5db   :  { %3391 = vmatprep.subr.bf16.mxu1 %v5046_v44  ;;  %v1718_v44 = vld [vmem:[#allocation10 + $0x590] sm:$0xff] }
 0x5dc   :  { %v5107_v57 = vcombine.low %v1718_v44, %v1722_v45 }
 0x5dd   :  { %3310 = vmatpush1.bf16.msra.mxu0 %v5043_v23  ;;  %v5101_v23 = vcombine.low %v1711_v15, %v1715_v16  ;;  %v1771_v15 = vld [vmem:[#allocation10 + $0x738] sm:$0xff] }
 0x5de   :  { %3392 = vmatpush1.bf16.msra.mxu1 %v5045_v24  ;;  %3311 = vmatprep.subr.bf16.mxu0 %v5052_v25  ;;  %v5108_v24 = vcombine.high %v1718_v44, %v1722_v45  ;;  %v5110_v25 = vcombine.high %v1719_v27, %v1723_v29  ;;  %v1778_v44 = vld [vmem:[#allocation10 + $0x770] sm:$0xff]  ;;  %v1775_v45 = vld [vmem:[#allocation10 + $0x758] sm:$0xff] }
 0x5df   :  { %3393 = vmatprep.subr.bf16.mxu1 %v5054_v26  ;;  %v1726_v26 = vld [vmem:[#allocation10 + $0x5d0] sm:$0xff] }
 0x5e0   :  { %v5115_v35 = vcombine.low %v1726_v26, %v1730_v28 }
 0x5e1   :  { %3312 = vmatpush1.bf16.msra.mxu0 %v5051_v31  ;;  %v5109_v31 = vcombine.low %v1719_v27, %v1723_v29  ;;  %v1779_v27 = vld [vmem:[#allocation10 + $0x778] sm:$0xff] }
 0x5e2   :  { %3394 = vmatpush1.bf16.msra.mxu1 %v5053_v59  ;;  %3322 = vmatprep.subr.bf16.mxu0 %v5060_v11  ;;  %v5116_v59 = vcombine.high %v1726_v26, %v1730_v28  ;;  %v5118_v11 = vcombine.high %v1727_v30, %v1731_v58  ;;  %v1786_v26 = vld [vmem:[#allocation10 + $0x7b0] sm:$0xff]  ;;  %v1783_v28 = vld [vmem:[#allocation10 + $0x798] sm:$0xff] }
 0x5e3   :  { %3404 = vmatprep.subr.bf16.mxu1 %v5062_v33  ;;  %v1734_v33 = vld [vmem:[#allocation10 + $0x610] sm:$0xff]  ;;  %v1787_v30 = vld [vmem:[#allocation10 + $0x7b8] sm:$0xff] }
 0x5e4   :  { %3314 = vmatmul.mubr.bf16.vlgmr.msra.gmra.mrb[20].mxu0 %v6221_v63 }
 0x5e5   :  { %3396 = vmatmul.mubr.bf16.vlgmr.msra.gmra.mrb[12].mxu1 %v6221_v63  ;;  %3323 = vmatpush1.bf16.msra.mxu0 %v5059_v42  ;;  %v5077_v63 = vcombine.low %v1687_v38, %v1691_v43  ;;  %v1739_v42 = vld [vmem:[#allocation10 + $0x638] sm:$0xff]  ;;  %v5123_v43 = vcombine.low %v1734_v33, %v1738_v39 }
 0x5e6   :  { %3354 = vmatprep.mubr.bf16.mxu0 %v6227_v6  ;;  %3405 = vmatpush1.bf16.msra.mxu1 %v5061_v41  ;;  %v5124_v41 = vcombine.high %v1734_v33, %v1738_v39  ;;  %v1747_v38 = vld [vmem:[#allocation10 + $0x678] sm:$0xff]  ;;  %v1794_v33 = vld [vmem:[#allocation10 + $0x7f0] sm:$0xff] }
 0x5e7   :  { %3436 = vmatprep.mubr.bf16.mxu1 %v6227_v6  ;;  %3324 = vmatprep.subr.bf16.mxu0 %v5068_v7  ;;  %v5083_v6 = vcombine.low %v1694_v53, %v1698_v54  ;;  %v5126_v7 = vcombine.high %v1735_v34, %v1739_v42  ;;  %v1754_v53 = vld [vmem:[#allocation10 + $0x6b0] sm:$0xff]  ;;  %v1751_v54 = vld [vmem:[#allocation10 + $0x698] sm:$0xff] }
 0x5e8   :  { %3406 = vmatprep.subr.bf16.mxu1 %v5070_v62  ;;  %v1743_v62 = vld [vmem:[#allocation10 + $0x658] sm:$0xff] }
 0x5e9   :  { %3325 = vmatpush1.bf16.msra.mxu0 %v5067_v46  ;;  %v5125_v46 = vcombine.low %v1735_v34, %v1739_v42  ;;  %v1791_v39 = vld [vmem:[#allocation10 + $0x7d8] sm:$0xff] }
 0x5ea   :  { %3407 = vmatpush1.bf16.msra.mxu1 %v5069_v48  ;;  %3326 = vmatprep.subr.bf16.mxu0 %v5076_v50  ;;  %v5132_v48 = vcombine.high %v1742_v40, %v1746_v32  ;;  %v5134_v50 = vcombine.high %v1743_v62, %v1747_v38  ;;  %v1795_v34 = vld [vmem:[#allocation10 + $0x7f8] sm:$0xff] }
 0x5eb   :  { %3408 = vmatprep.subr.bf16.mxu1 %v5078_v52  ;;  %v1750_v52 = vld [vmem:[#allocation10 + $0x690] sm:$0xff]  ;;  %v5181_v40 = vcombine.low %v1791_v39, %v1795_v34 }
 0x5ec   :  { %v5139_v2 = vcombine.low %v1750_v52, %v1754_v53  ;;  %v6251_v32 = vld [vmem:[#allocation13 + $0x1c] ss:$4 sm:$0xff] }
 0x5ed   :  { %3327 = vmatpush1.bf16.msra.mxu0 %v5075_v5  ;;  %v5133_v5 = vcombine.low %v1743_v62, %v1747_v38  ;;  %v1800_v62 = vrot.slane %v6251_v32, %v6044_v10  ;;  %v1808_v38 = vrot.slane %v6251_v32, %v6106_v49 }
 0x5ee   :  { %3409 = vmatpush1.bf16.msra.mxu1 %v5077_v63  ;;  %3328 = vmatprep.subr.bf16.mxu0 %v5084_v9  ;;  %v5140_v63 = vcombine.high %v1750_v52, %v1754_v53  ;;  %v5142_v9 = vcombine.high %v1751_v54, %v1755_v55 }
 0x5ef   :  { %3410 = vmatprep.subr.bf16.mxu1 %v5086_v60  ;;  %v1758_v60 = vld [vmem:[#allocation10 + $0x6d0] sm:$0xff] }
 0x5f0   :  { %v5147_v16 = vcombine.low %v1758_v60, %v1762_v61 }
 0x5f1   :  { %3329 = vmatpush1.bf16.msra.mxu0 %v5083_v6  ;;  %v5141_v6 = vcombine.low %v1751_v54, %v1755_v55 }
 0x5f2   :  { %3411 = vmatpush1.bf16.msra.mxu1 %v5085_v3  ;;  %3330 = vmatprep.subr.bf16.mxu0 %v5092_v4  ;;  %v5148_v3 = vcombine.high %v1758_v60, %v1762_v61  ;;  %v5150_v4 = vcombine.high %v1759_v0, %v1763_v1 }
 0x5f3   :  { %3412 = vmatprep.subr.bf16.mxu1 %v5094_v12  ;;  %v1766_v12 = vld [vmem:[#allocation10 + $0x710] sm:$0xff] }
 0x5f4   :  { %v5155_v29 = vcombine.low %v1766_v12, %v1770_v13 }
 0x5f5   :  { %3331 = vmatpush1.bf16.msra.mxu0 %v5091_v17  ;;  %v5149_v17 = vcombine.low %v1759_v0, %v1763_v1 }
 0x5f6   :  { %3413 = vmatpush1.bf16.msra.mxu1 %v5093_v19  ;;  %3332 = vmatprep.subr.bf16.mxu0 %v5100_v20  ;;  %v5156_v19 = vcombine.high %v1766_v12, %v1770_v13  ;;  %v5158_v20 = vcombine.high %v1767_v14, %v1771_v15 }
 0x5f7   :  { %3414 = vmatprep.subr.bf16.mxu1 %v5102_v37  ;;  %v1774_v37 = vld [vmem:[#allocation10 + $0x750] sm:$0xff] }
 0x5f8   :  { %v5163_v58 = vcombine.low %v1774_v37, %v1778_v44 }
 0x5f9   :  { %3333 = vmatpush1.bf16.msra.mxu0 %v5099_v21  ;;  %v5157_v21 = vcombine.low %v1767_v14, %v1771_v15 }
 0x5fa   :  { %3415 = vmatpush1.bf16.msra.mxu1 %v5101_v23  ;;  %3334 = vmatprep.subr.bf16.mxu0 %v5108_v24  ;;  %v5164_v23 = vcombine.high %v1774_v37, %v1778_v44  ;;  %v5166_v24 = vcombine.high %v1775_v45, %v1779_v27 }
 0x5fb   :  { %3416 = vmatprep.subr.bf16.mxu1 %v5110_v25  ;;  %v1782_v25 = vld [vmem:[#allocation10 + $0x790] sm:$0xff] }
 0x5fc   :  { %v5171_v42 = vcombine.low %v1782_v25, %v1786_v26 }
 0x5fd   :  { %3335 = vmatpush1.bf16.msra.mxu0 %v5107_v57  ;;  %v5165_v57 = vcombine.low %v1775_v45, %v1779_v27 }
 0x5fe   :  { %3417 = vmatpush1.bf16.msra.mxu1 %v5109_v31  ;;  %3336 = vmatprep.subr.bf16.mxu0 %v5116_v59  ;;  %v5172_v31 = vcombine.high %v1782_v25, %v1786_v26  ;;  %v5174_v59 = vcombine.high %v1783_v28, %v1787_v30 }
 0x5ff   :  { %3418 = vmatprep.subr.bf16.mxu1 %v5118_v11  ;;  %v1790_v11 = vld [vmem:[#allocation10 + $0x7d0] sm:$0xff] }
 0x601   :  { %3337 = vmatpush1.bf16.msra.mxu0 %v5115_v35  ;;  %v5173_v35 = vcombine.low %v1783_v28, %v1787_v30 }
 0x602   :  { %3419 = vmatpush1.bf16.msra.mxu1 %v5117_v36  ;;  %3338 = vmatprep.subr.bf16.mxu0 %v5124_v41  ;;  %v5180_v36 = vcombine.high %v1790_v11, %v1794_v33  ;;  %v5182_v41 = vcombine.high %v1791_v39, %v1795_v34 }
 0x603   :  { %3420 = vmatprep.subr.bf16.mxu1 %v5126_v7  ;;  %v5179_v7 = vcombine.low %v1790_v11, %v1794_v33 }
 0x605   :  { %3339 = vmatpush1.bf16.msra.mxu0 %v5123_v43  ;;  %v1804_v43 = vrot.slane %v6251_v32, %v6049_v22 }
 0x606   :  { %3421 = vmatpush1.bf16.msra.mxu1 %v5125_v46  ;;  %3340 = vmatprep.subr.bf16.mxu0 %v5132_v48  ;;  %v1812_v46 = vrot.slane %v6251_v32, %v6109_v51 }
 0x607   :  { %3422 = vmatprep.subr.bf16.mxu1 %v5134_v50 }
 0x609   :  { %3341 = vmatpush1.bf16.msra.mxu0 %v5131_v56 }
 0x60a   :  { %3423 = vmatpush1.bf16.msra.mxu1 %v5133_v5  ;;  %3342 = vmatprep.subr.bf16.mxu0 %v5140_v63 }
 0x60b   :  { %3424 = vmatprep.subr.bf16.mxu1 %v5142_v9 }
 0x60d   :  { %3343 = vmatpush1.bf16.msra.mxu0 %v5139_v2 }
 0x60e   :  { %3425 = vmatpush1.bf16.msra.mxu1 %v5141_v6  ;;  %3344 = vmatprep.subr.bf16.mxu0 %v5148_v3 }
 0x60f   :  { %3426 = vmatprep.subr.bf16.mxu1 %v5150_v4 }
 0x611   :  { %3345 = vmatpush1.bf16.msra.mxu0 %v5147_v16 }
 0x612   :  { %3427 = vmatpush1.bf16.msra.mxu1 %v5149_v17  ;;  %3346 = vmatprep.subr.bf16.mxu0 %v5156_v19 }
 0x613   :  { %3428 = vmatprep.subr.bf16.mxu1 %v5158_v20 }
 0x615   :  { %3347 = vmatpush1.bf16.msra.mxu0 %v5155_v29 }
 0x616   :  { %3429 = vmatpush1.bf16.msra.mxu1 %v5157_v21  ;;  %3348 = vmatprep.subr.bf16.mxu0 %v5164_v23 }
 0x617   :  { %3430 = vmatprep.subr.bf16.mxu1 %v5166_v24 }
 0x619   :  { %3349 = vmatpush1.bf16.msra.mxu0 %v5163_v58 }
 0x61a   :  { %3431 = vmatpush1.bf16.msra.mxu1 %v5165_v57  ;;  %3350 = vmatprep.subr.bf16.mxu0 %v5172_v31 }
 0x61b   :  { %3432 = vmatprep.subr.bf16.mxu1 %v5174_v59 }
 0x61d   :  { %3351 = vmatpush1.bf16.msra.mxu0 %v5171_v42 }
 0x61e   :  { %3433 = vmatpush1.bf16.msra.mxu1 %v5173_v35  ;;  %3352 = vmatprep.subr.bf16.mxu0 %v5180_v36 }
 0x61f   :  { %3434 = vmatprep.subr.bf16.mxu1 %v5182_v41 }
 0x621   :  { %3353 = vmatpush1.bf16.msra.mxu0 %v5179_v7 }
 0x622   :  { %3435 = vmatpush1.bf16.msra.mxu1 %v5181_v40 }
 0x624   :  { %3355 = vmatmul.mubr.bf16.vlgmr.msra.gmra.mrb[20].mxu0 %v6239_v47 }
 0x625   :  { %3437 = vmatmul.mubr.bf16.vlgmr.msra.gmra.mrb[12].mxu1 %v6239_v47 }
 0x677   :  { %v3192_v48 = vpop.f32.mrb[16].mxu0  ;;  %v3274_v50 = vpop.f32.mrb[8].mxu1 }
 0x678   :  { %v6261_v52 = vadd.f32 %v3192_v48, %v1800_v62  ;;  %v6263_v53 = vadd.f32 %v3274_v50, %v1808_v38  ;;  %v3194_v47 = vpop.f32.mrb[17].mxu0  ;;  %v3276_v54 = vpop.f32.mrb[9].mxu1 }
 0x679   :  { %v6265_v55 = vadd.f32 %v3194_v47, %v1804_v43  ;;  %v6267_v56 = vadd.f32 %v3276_v54, %v1812_v46  ;;  %v3196_v5 = vpop.f32.mrb[18].mxu0  ;;  %v3278_v63 = vpop.f32.mrb[10].mxu1 }
 0x67a   :  { %v3445_v9 = vrot.slane %v6261_v52, 4  ;;  %v3501_v60 = vmul.f32 %v6261_v52, %v6261_v52  ;;  %v3457_v61 = vrot.slane %v6263_v53, 4  ;;  %v3503_v0 = vmul.f32 %v6263_v53, %v6263_v53  ;;  %v3197_v1 = vpop.f32.mrb[19].mxu0  ;;  %v3279_v2 = vpop.f32.mrb[11].mxu1 }
 0x67b   :  { %v3451_v6 = vrot.slane %v6265_v55, 4  ;;  %v3502_v3 = vmul.f32 %v6265_v55, %v6265_v55  ;;  %v3463_v4 = vrot.slane %v6267_v56, 4  ;;  %v3504_v12 = vmul.f32 %v6267_v56, %v6267_v56 }
 0x67c   :  { %v3446_v13 = vadd.f32 %v6261_v52, %v3445_v9  ;;  %v3509_v14 = vrot.slane %v3501_v60, 4  ;;  %v3458_v15 = vadd.f32 %v6263_v53, %v3457_v61  ;;  %v3521_v16 = vrot.slane %v3503_v0, 4 }
 0x67d   :  { %v3452_v17 = vadd.f32 %v6265_v55, %v3451_v6  ;;  %v3515_v19 = vrot.slane %v3502_v3, 4  ;;  %v3464_v20 = vadd.f32 %v6267_v56, %v3463_v4  ;;  %v3527_v37 = vrot.slane %v3504_v12, 4 }
 0x67e   :  { %v3447_v44 = vrot.slane %v3446_v13, 2  ;;  %v3510_v45 = vadd.f32 %v3509_v14, %v3501_v60  ;;  %v3459_v27 = vrot.slane %v3458_v15, 2  ;;  %v3522_v29 = vadd.f32 %v3521_v16, %v3503_v0 }
 0x67f   :  { %v3453_v21 = vrot.slane %v3452_v17, 2  ;;  %v3516_v23 = vadd.f32 %v3515_v19, %v3502_v3  ;;  %v3465_v24 = vrot.slane %v3464_v20, 2  ;;  %v3528_v25 = vadd.f32 %v3527_v37, %v3504_v12 }
 0x680   :  { %v3448_v26 = vadd.f32 %v3447_v44, %v3446_v13  ;;  %v3511_v28 = vrot.slane %v3510_v45, 2  ;;  %v3460_v30 = vadd.f32 %v3459_v27, %v3458_v15  ;;  %v3523_v58 = vrot.slane %v3522_v29, 2 }
 0x681   :  { %v3454_v57 = vadd.f32 %v3453_v21, %v3452_v17  ;;  %v3517_v31 = vrot.slane %v3516_v23, 2  ;;  %v3466_v59 = vadd.f32 %v3465_v24, %v3464_v20  ;;  %v3529_v11 = vrot.slane %v3528_v25, 2 }
 0x682   :  { %v3449_v33 = vrot.slane %v3448_v26, 1  ;;  %v3512_v39 = vadd.f32 %v3511_v28, %v3510_v45  ;;  %v3461_v34 = vrot.slane %v3460_v30, 1  ;;  %v3524_v42 = vadd.f32 %v3523_v58, %v3522_v29  ;;  %v6285_v29 = vld [vmem:[#allocation13 + $0x1d] ss:$4 sm:$0xff] }
 0x683   :  { %v3455_v35 = vrot.slane %v3454_v57, 1  ;;  %v3518_v36 = vadd.f32 %v3517_v31, %v3516_v23  ;;  %v3467_v41 = vrot.slane %v3466_v59, 1  ;;  %v3530_v7 = vadd.f32 %v3529_v11, %v3528_v25 }
 0x684   :  { %v3450_v40 = vadd.f32 %v3449_v33, %v3448_v26  ;;  %v3513_v62 = vrot.slane %v3512_v39, 1  ;;  %v3462_v38 = vadd.f32 %v3461_v34, %v3460_v30  ;;  %v3525_v43 = vrot.slane %v3524_v42, 1 }
 0x685   :  { %v3456_v46 = vadd.f32 %v3455_v35, %v3454_v57  ;;  %v3519_v48 = vrot.slane %v3518_v36, 1  ;;  %v3468_v50 = vadd.f32 %v3467_v41, %v3466_v59  ;;  %v3531_v47 = vrot.slane %v3530_v7, 1 }
 0x686   :  { %v3493_v54 = vmul.f32 0.125, %v3450_v40  ;;  %v3514_v5 = vadd.f32 %v3513_v62, %v3512_v39  ;;  %v3495_v63 = vmul.f32 0.125, %v3462_v38  ;;  %v3526_v9 = vadd.f32 %v3525_v43, %v3524_v42  ;;  %v5531_v62 = vld [vmem:[#allocation11 + $0x40] sm:$0xff]  }
 0x687   :  { %v3494_v60 = vmul.f32 0.125, %v3456_v46  ;;  %v3520_v61 = vadd.f32 %v3519_v48, %v3518_v36  ;;  %v3496_v0 = vmul.f32 0.125, %v3468_v50  ;;  %v3532_v1 = vadd.f32 %v3531_v47, %v3530_v7  ;;  %v5532_v38 = vld [vmem:[#allocation11 + $0xc0] sm:$0xff]   ;;  %5255 = vmatprep.subr.bf16.mxu0 %v5531_v62  ;;  %v5535_v48 = vld [vmem:[#allocation11 + $0x48] sm:$0xff]  }
 0x688   :  { %v3557_v2 = vmul.f32 0.125, %v3514_v5  ;;  %v3565_v6 = vmul.f32 %v3493_v54, %v3493_v54  ;;  %v3559_v3 = vmul.f32 0.125, %v3526_v9  ;;  %v3567_v4 = vmul.f32 %v3495_v63, %v3495_v63  ;;  %v5533_v43 = vld [vmem:[#allocation11] sm:$0xff]   ;;  %5277 = vmatprep.subr.bf16.mxu1 %v5532_v38  ;;  %v5536_v50 = vld [vmem:[#allocation11 + $0xc8] sm:$0xff]   ;;  %v5539_v5 = vld [vmem:[#allocation11 + $0x50] sm:$0xff]  }
 0x689   :  { %v3558_v12 = vmul.f32 0.125, %v3520_v61  ;;  %v3566_v13 = vmul.f32 %v3494_v60, %v3494_v60  ;;  %v3560_v14 = vmul.f32 0.125, %v3532_v1  ;;  %v3568_v15 = vmul.f32 %v3496_v0, %v3496_v0  ;;  %v5534_v46 = vld [vmem:[#allocation11 + $0x80] sm:$0xff]   ;;  %5256 = vmatpush3.bf16.msra.mxu0 %v5533_v43  ;;  %v5537_v47 = vld [vmem:[#allocation11 + $0x8] sm:$0xff]   ;;  %v5541_v9 = vld [vmem:[#allocation11 + $0x10] sm:$0xff]  }
 0x68a   :  { %v3573_v16 = vsub.f32 %v3557_v2, %v3565_v6  ;;  %v3575_v17 = vsub.f32 %v3559_v3, %v3567_v4  ;;  %v6289_v21 = vrot.slane %v6285_v29, %v6044_v10  ;;  %v6293_v23 = vrot.slane %v6285_v29, %v6106_v49  ;;  %5278 = vmatpush3.bf16.msra.mxu1 %v5534_v46  ;;  %v5543_v61 = vld [vmem:[#allocation11 + $0x58] sm:$0xff]   ;;  %v5547_v6 = vld [vmem:[#allocation11 + $0x60] sm:$0xff]  }
 0x68b   :  { %v3574_v19 = vsub.f32 %v3558_v12, %v3566_v13  ;;  %v3576_v20 = vsub.f32 %v3560_v14, %v3568_v15  ;;  %v6297_v24 = vrot.slane %v6285_v29, %v6049_v22  ;;  %v6301_v26 = vrot.slane %v6285_v29, %v6109_v51  ;;  %5257 = vmatprep.subr.bf16.mxu0 %v5535_v48  ;;  %v5545_v1 = vld [vmem:[#allocation11 + $0x18] sm:$0xff]   ;;  %v5548_v3 = vld [vmem:[#allocation11 + $0xe0] sm:$0xff]   ;;  %v5551_v13 = vld [vmem:[#allocation11 + $0x68] sm:$0xff]  }
 0x68c   :  { %v3581_v37 = vadd.f32 0.8, %v3573_v16  ;;  %v3583_v44 = vadd.f32 0.8, %v3575_v17  ;;  %5279 = vmatprep.subr.bf16.mxu1 %v5536_v50  ;;  %v5546_v2 = vld [vmem:[#allocation11 + $0x98] sm:$0xff]   ;;  %v5549_v4 = vld [vmem:[#allocation11 + $0x20] sm:$0xff]  }
 0x68d   :  { %v3582_v45 = vadd.f32 0.8, %v3574_v19  ;;  %v3584_v27 = vadd.f32 0.8, %v3576_v20  ;;  %5258 = vmatpush3.bf16.msra.mxu0 %v5537_v47  ;;  %v5550_v12 = vld [vmem:[#allocation11 + $0xa0] sm:$0xff]   ;;  %v5552_v14 = vld [vmem:[#allocation11 + $0xe8] sm:$0xff]  }
 0x68e   :  { %5621 = vrsqrt.f32 %v3581_v37  ;;  %5259 = vmatprep.subr.bf16.mxu0 %v5539_v5  ;;  %v5553_v15 = vld [vmem:[#allocation11 + $0x28] sm:$0xff]   ;;  %v5555_v17 = vld [vmem:[#allocation11 + $0x70] sm:$0xff]  }
 0x68f   :  { %5623 = vrsqrt.f32 %v3583_v44  ;;  %v5554_v16 = vld [vmem:[#allocation11 + $0xa8] sm:$0xff]   ;;  %v5556_v19 = vld [vmem:[#allocation11 + $0xf0] sm:$0xff]   ;;  %v5559_v44 = vld [vmem:[#allocation11 + $0x78] sm:$0xff]  }
 0x690   :  { %5625 = vrsqrt.f32 %v3582_v45  ;;  %v5557_v20 = vld [vmem:[#allocation11 + $0x30] sm:$0xff]   ;;  %v5560_v45 = vld [vmem:[#allocation11 + $0xf8] sm:$0xff]  }
 0x691   :  { %5627 = vrsqrt.f32 %v3584_v27  ;;  %5260 = vmatpush3.bf16.msra.mxu0 %v5541_v9  ;;  %v5558_v37 = vld [vmem:[#allocation11 + $0xb0] sm:$0xff]   ;;  %v5561_v27 = vld [vmem:[#allocation11 + $0x38] sm:$0xff]  }
 0x692   :  { %5261 = vmatprep.subr.bf16.mxu0 %v5543_v61 }
 0x695   :  { %5262 = vmatpush3.bf16.msra.mxu0 %v5545_v1 }
 0x696   :  { %5263 = vmatprep.subr.bf16.mxu0 %v5547_v6 }
 0x698   :  { %v5622_v25 = vpop.eup %5621 }
 0x699   :  { %v5624_v28 = vpop.eup %5623  ;;  %v6304_v30 = vmul.f32 %v5622_v25, %v6289_v21  ;;  %5264 = vmatpush3.bf16.msra.mxu0 %v5549_v4  ;;  %v5562_v25 = vld [vmem:[#allocation11 + $0xb8] sm:$0xff]  }
 0x69a   :  { %v5626_v58 = vpop.eup %5625  ;;  %v6307_v57 = vmul.f32 %v5624_v28, %v6293_v23  ;;  %5265 = vmatprep.subr.bf16.mxu0 %v5551_v13  ;;  %v6328_v28 = vsub.s32 4, %v6041_v8 }
 0x69b   :  { %v5628_v31 = vpop.eup %5627  ;;  %v3646_v59 = vmul.f32 %v6304_v30, %v3493_v54  ;;  %v6311_v11 = vmul.f32 %v5626_v58, %v6297_v24  ;;  %v5538_v54 = vld [vmem:[#allocation11 + $0x88] sm:$0xff]   ;;  %v6331_v58 = vsub.s32 6, %v6041_v8 }
 0x69c   :  { %v3648_v33 = vmul.f32 %v6307_v57, %v3495_v63  ;;  %v6315_v39 = vmul.f32 %v5628_v31, %v6301_v26  ;;  %5280 = vmatpush3.bf16.msra.mxu1 %v5538_v54  ;;  %v5540_v63 = vld [vmem:[#allocation11 + $0xd0] sm:$0xff]   ;;  %v6334_v31 = vsub.s32 5, %v6041_v8 }
 0x69d   :  { %v3647_v34 = vmul.f32 %v6311_v11, %v3494_v60  ;;  %v5542_v60 = vld [vmem:[#allocation11 + $0x90] sm:$0xff]   ;;  %5281 = vmatprep.subr.bf16.mxu1 %v5540_v63  ;;  %5266 = vmatpush3.bf16.msra.mxu0 %v5553_v15 }
 0x69e   :  { %v3649_v42 = vmul.f32 %v6315_v39, %v3496_v0  ;;  %v5544_v0 = vld [vmem:[#allocation11 + $0xd8] sm:$0xff]   ;;  %5267 = vmatprep.subr.bf16.mxu0 %v5555_v17 }
 0x69f   :  { %v3662_v35 = vcombine.low %v3646_v59, %v3647_v34  ;;  %v6337_v59 = vsub.s32 7, %v6041_v8  ;;  %v1824_v34 = vrot.slane %v6251_v32, %v6331_v58 }
 0x6a0   :  { %v3663_v36 = vcombine.low %v3648_v33, %v3649_v42  ;;  %5282 = vmatpush3.bf16.msra.mxu1 %v5542_v60  ;;  %v1816_v33 = vrot.slane %v6251_v32, %v6328_v28  ;;  %v1820_v42 = vrot.slane %v6251_v32, %v6334_v31 }
 0x6a1   :  { %v6320_v41 = vrot.slane %v3662_v35, %v6068_v18  ;;  %5283 = vmatprep.subr.bf16.mxu1 %v5544_v0  ;;  %5268 = vmatpush3.bf16.msra.mxu0 %v5557_v20  ;;  %v1828_v35 = vrot.slane %v6251_v32, %v6337_v59 }
 0x6a2   :  { %v6323_v7 = vrot.slane %v3663_v36, %v6068_v18  ;;  %5269 = vmatprep.subr.bf16.mxu0 %v5559_v44 }
 0x6a4   :  { %v3694_v40 = vcombine.low %v6320_v41, %v6323_v7  ;;  %5284 = vmatpush3.bf16.msra.mxu1 %v5546_v2 }
 0x6a5   :  { %5285 = vmatprep.subr.bf16.mxu1 %v5548_v3  ;;  %5270 = vmatpush3.bf16.msra.mxu0 %v5561_v27 }
 0x6a8   :  { %5286 = vmatpush3.bf16.msra.mxu1 %v5550_v12 }
 0x6a9   :  { %5287 = vmatprep.subr.bf16.mxu1 %v5552_v14 }
 0x6ac   :  { %5288 = vmatpush3.bf16.msra.mxu1 %v5554_v16 }
 0x6ad   :  { %5289 = vmatprep.subr.bf16.mxu1 %v5556_v19 }
 0x6b0   :  { %5290 = vmatpush3.bf16.msra.mxu1 %v5558_v37 }
 0x6b1   :  { %5291 = vmatprep.subr.bf16.mxu1 %v5560_v45 }
 0x6b4   :  { %5292 = vmatpush3.bf16.msra.mxu1 %v5562_v25 }
 0x6f7   :  { %v3356_v36 = vpop.f32.mrb[20].mxu0 }
 0x6f8   :  { %v6347_v62 = vadd.f32 %v3356_v36, %v1816_v33  ;;  %v3438_v38 = vpop.f32.mrb[12].mxu1  ;;  %v3358_v43 = vpop.f32.mrb[21].mxu0  ;;  %v5564_v36 = vld [vmem:[#allocation11 + $0x1c0] sm:$0xff]  }
 0x6f9   :  { %v6349_v46 = vadd.f32 %v3438_v38, %v1824_v34  ;;  %v6351_v8 = vadd.f32 %v3358_v43, %v1820_v42  ;;  %v3440_v48 = vpop.f32.mrb[13].mxu1  ;;  %v3360_v50 = vpop.f32.mrb[22].mxu0  ;;  %5321 = vmatprep.subr.bf16.mxu1 %v5564_v36 }
 0x6fa   :  { %v3469_v47 = vrot.slane %v6347_v62, 4  ;;  %v3505_v54 = vmul.f32 %v6347_v62, %v6347_v62  ;;  %v6356_v5 = vadd.f32 %v3440_v48, %v1828_v35  ;;  %v3442_v63 = vpop.f32.mrb[14].mxu1  ;;  %v3361_v32 = vpop.f32.mrb[23].mxu0  ;;  %v5563_v35 = vld [vmem:[#allocation11 + $0x140] sm:$0xff]  }
 0x6fb   :  { %v3481_v9 = vrot.slane %v6349_v46, 4  ;;  %v3507_v60 = vmul.f32 %v6349_v46, %v6349_v46  ;;  %v3475_v61 = vrot.slane %v6351_v8, 4  ;;  %v3506_v0 = vmul.f32 %v6351_v8, %v6351_v8  ;;  %v3443_v1 = vpop.f32.mrb[15].mxu1  ;;  %5299 = vmatprep.subr.bf16.mxu0 %v5563_v35 }
 0x6fc   :  { %v3470_v2 = vadd.f32 %v6347_v62, %v3469_v47  ;;  %v3533_v6 = vrot.slane %v3505_v54, 4  ;;  %v3487_v3 = vrot.slane %v6356_v5, 4  ;;  %v3508_v4 = vmul.f32 %v6356_v5, %v6356_v5 }
 0x6fd   :  { %v3482_v12 = vadd.f32 %v6349_v46, %v3481_v9  ;;  %v3545_v13 = vrot.slane %v3507_v60, 4  ;;  %v3476_v14 = vadd.f32 %v6351_v8, %v3475_v61  ;;  %v3539_v15 = vrot.slane %v3506_v0, 4 }
 0x6fe   :  { %v3471_v16 = vrot.slane %v3470_v2, 2  ;;  %v3534_v17 = vadd.f32 %v3533_v6, %v3505_v54  ;;  %v3488_v19 = vadd.f32 %v6356_v5, %v3487_v3  ;;  %v3551_v20 = vrot.slane %v3508_v4, 4 }
 0x6ff   :  { %v3483_v37 = vrot.slane %v3482_v12, 2  ;;  %v3546_v44 = vadd.f32 %v3545_v13, %v3507_v60  ;;  %v3477_v45 = vrot.slane %v3476_v14, 2  ;;  %v3540_v27 = vadd.f32 %v3539_v15, %v3506_v0 }
 0x700   :  { %v3472_v25 = vadd.f32 %v3471_v16, %v3470_v2  ;;  %v3535_v33 = vrot.slane %v3534_v17, 2  ;;  %v3489_v34 = vrot.slane %v3488_v19, 2  ;;  %v3552_v42 = vadd.f32 %v3551_v20, %v3508_v4 }
 0x701   :  { %v3484_v38 = vadd.f32 %v3483_v37, %v3482_v12  ;;  %v3547_v43 = vrot.slane %v3546_v44, 2  ;;  %v3478_v48 = vadd.f32 %v3477_v45, %v3476_v14  ;;  %v3541_v50 = vrot.slane %v3540_v27, 2 }
 0x702   :  { %v3473_v47 = vrot.slane %v3472_v25, 1  ;;  %v3536_v63 = vadd.f32 %v3535_v33, %v3534_v17  ;;  %v3490_v54 = vadd.f32 %v3489_v34, %v3488_v19  ;;  %v3553_v32 = vrot.slane %v3552_v42, 2 }
 0x703   :  { %v3485_v9 = vrot.slane %v3484_v38, 1  ;;  %v3548_v60 = vadd.f32 %v3547_v43, %v3546_v44  ;;  %v3479_v61 = vrot.slane %v3478_v48, 1  ;;  %v3542_v0 = vadd.f32 %v3541_v50, %v3540_v27 }
 0x704   :  { %v3474_v1 = vadd.f32 %v3473_v47, %v3472_v25  ;;  %v3537_v2 = vrot.slane %v3536_v63, 1  ;;  %v3491_v6 = vrot.slane %v3490_v54, 1  ;;  %v3554_v3 = vadd.f32 %v3553_v32, %v3552_v42 }
 0x705   :  { %v3486_v4 = vadd.f32 %v3485_v9, %v3484_v38  ;;  %v3549_v13 = vrot.slane %v3548_v60, 1  ;;  %v3480_v12 = vadd.f32 %v3479_v61, %v3478_v48  ;;  %v3543_v15 = vrot.slane %v3542_v0, 1 }
 0x706   :  { %v3497_v14 = vmul.f32 0.125, %v3474_v1  ;;  %v3538_v16 = vadd.f32 %v3537_v2, %v3536_v63  ;;  %v3492_v20 = vadd.f32 %v3491_v6, %v3490_v54  ;;  %v3555_v17 = vrot.slane %v3554_v3, 1 }
 0x707   :  { %v3499_v19 = vmul.f32 0.125, %v3486_v4  ;;  %v3550_v37 = vadd.f32 %v3549_v13, %v3548_v60  ;;  %v3498_v45 = vmul.f32 0.125, %v3480_v12  ;;  %v3544_v33 = vadd.f32 %v3543_v15, %v3542_v0 }
 0x708   :  { %v3561_v34 = vmul.f32 0.125, %v3538_v16  ;;  %v3569_v44 = vmul.f32 %v3497_v14, %v3497_v14  ;;  %v3500_v35 = vmul.f32 0.125, %v3492_v20  ;;  %v3556_v27 = vadd.f32 %v3555_v17, %v3554_v3 }
 0x709   :  { %v3563_v25 = vmul.f32 0.125, %v3550_v37  ;;  %v3571_v36 = vmul.f32 %v3499_v19, %v3499_v19  ;;  %v3562_v43 = vmul.f32 0.125, %v3544_v33  ;;  %v3570_v42 = vmul.f32 %v3498_v45, %v3498_v45 }
 0x70a   :  { %v3577_v38 = vsub.f32 %v3561_v34, %v3569_v44  ;;  %v3564_v50 = vmul.f32 0.125, %v3556_v27  ;;  %v3572_v48 = vmul.f32 %v3500_v35, %v3500_v35  ;;  %v6373_v0 = vrot.slane %v6285_v29, %v6328_v28 }
 0x70b   :  { %v3579_v47 = vsub.f32 %v3563_v25, %v3571_v36  ;;  %v3578_v32 = vsub.f32 %v3562_v43, %v3570_v42  ;;  %v6377_v1 = vrot.slane %v6285_v29, %v6331_v58  ;;  %v6381_v2 = vrot.slane %v6285_v29, %v6334_v31 }
 0x70c   :  { %v3585_v63 = vadd.f32 0.8, %v3577_v38  ;;  %v3580_v54 = vsub.f32 %v3564_v50, %v3572_v48  ;;  %v6385_v3 = vrot.slane %v6285_v29, %v6337_v59  ;;  %v3716_v42 = vrot.slane %v6304_v30, %v6044_v10 }
 0x70d   :  { %v3587_v9 = vadd.f32 0.8, %v3579_v47  ;;  %v3586_v61 = vadd.f32 0.8, %v3578_v32 }
 0x70e   :  { %5629 = vrsqrt.f32 %v3585_v63  ;;  %v3588_v60 = vadd.f32 0.8, %v3580_v54  ;;  %v3745_v32 = vmul.f32 %v6261_v52, %v3716_v42 }
 0x70f   :  { %5631 = vrsqrt.f32 %v3587_v9 }
 0x710   :  { %5633 = vrsqrt.f32 %v3586_v61 }
 0x711   :  { %5635 = vrsqrt.f32 %v3588_v60 }
 0x718   :  { %v5630_v6 = vpop.eup %5629 }
 0x719   :  { %v5632_v4 = vpop.eup %5631  ;;  %v3642_v13 = vmul.f32 %v5630_v6, %v6373_v0 }
 0x71a   :  { %v5634_v12 = vpop.eup %5633  ;;  %v3644_v15 = vmul.f32 %v5632_v4, %v6377_v1 }
 0x71b   :  { %v5636_v16 = vpop.eup %5635  ;;  %v3650_v20 = vmul.f32 %v3642_v13, %v3497_v14  ;;  %v3643_v17 = vmul.f32 %v5634_v12, %v6381_v2  ;;  %v3724_v14 = vrot.slane %v6307_v57, %v6044_v10  ;;  %v3732_v50 = vrot.slane %v3642_v13, %v6044_v10  ;;  %v6409_v57 = vld [vmem:[#allocation13 + $0x1e] ss:$4 sm:$0xff] }
 0x71c   :  { %v3652_v37 = vmul.f32 %v3644_v15, %v3499_v19  ;;  %v3645_v33 = vmul.f32 %v5636_v16, %v6385_v3  ;;  %v3720_v19 = vrot.slane %v6311_v11, %v6044_v10  ;;  %v3740_v30 = vrot.slane %v3644_v15, %v6044_v10 }
 0x71d   :  { %v3651_v34 = vmul.f32 %v3643_v17, %v3498_v45  ;;  %v3702_v45 = vrot.slane %v3694_v40, %v6068_v18  ;;  %v3736_v48 = vrot.slane %v3643_v17, %v6044_v10  ;;  %v3747_v41 = vmul.f32 %v6263_v53, %v3724_v14 }
 0x71e   :  { %v3653_v44 = vmul.f32 %v3645_v33, %v3500_v35  ;;  %v3728_v35 = vrot.slane %v6315_v39, %v6044_v10  ;;  %v3744_v11 = vrot.slane %v3645_v33, %v6044_v10  ;;  %v3746_v7 = vmul.f32 %v6265_v55, %v3720_v19 }
 0x71f   :  { %v3664_v27 = vcombine.low %v3650_v20, %v3651_v34  ;;  %v3749_v63 = vmul.f32 %v6347_v62, %v3732_v50  ;;  %v3751_v54 = vmul.f32 %v6349_v46, %v3740_v30  ;;  %v3750_v9 = vmul.f32 %v6351_v8, %v3736_v48 }
 0x720   :  { %v3665_v25 = vcombine.low %v3652_v37, %v3653_v44  ;;  %v3748_v39 = vmul.f32 %v6267_v56, %v3728_v35  ;;  %v3752_v61 = vmul.f32 %v6356_v5, %v3744_v11 }
 0x721   :  { %v3686_v29 = vrot.slane %v3664_v27, %v6068_v18 }
 0x722   :  { %v3693_v36 = vrot.slane %v3665_v25, %v6068_v18 }
 0x724   :  { %v3695_v43 = vcombine.low %v3686_v29, %v3693_v36 }
 0x726   :  { %v3709_v38 = vrot.slane %v3695_v43, %v6068_v18 }
 0x728   :  { %v3710_v47 = vcombine.low %v3702_v45, %v3709_v38 }
 0x72a   :  { %v3712_v40 = vsub.f32 %v6409_v57, %v3710_v47 }
 0x72c   :  { %v3773_v60 = vrot.slane %v3712_v40, %v6328_v28  ;;  %v3777_v52 = vrot.slane %v3712_v40, %v6334_v31  ;;  %v3781_v53 = vrot.slane %v3712_v40, %v6331_v58  ;;  %v3785_v55 = vrot.slane %v3712_v40, %v6337_v59 }
 0x72d   :  { %v3757_v56 = vrot.slane %v3712_v40, %v6044_v10  ;;  %v3761_v6 = vrot.slane %v3712_v40, %v6049_v22  ;;  %v3765_v62 = vrot.slane %v3712_v40, %v6106_v49  ;;  %v3769_v46 = vrot.slane %v3712_v40, %v6109_v51 }
 0x72e   :  { %v3798_v4 = vadd.f32 %v3773_v60, %v3749_v63  ;;  %v3799_v8 = vadd.f32 %v3777_v52, %v3750_v9  ;;  %v3800_v13 = vadd.f32 %v3781_v53, %v3751_v54  ;;  %v3801_v5 = vadd.f32 %v3785_v55, %v3752_v61 }
 0x72f   :  { %v3794_v12 = vadd.f32 %v3757_v56, %v3745_v32  ;;  %v3795_v15 = vadd.f32 %v3761_v6, %v3746_v7  ;;  %v6429_v16 = vadd.f32 %v3765_v62, %v3747_v41  ;;  %v6431_v20 = vadd.f32 %v3769_v46, %v3748_v39 }
 0x730   :  { %v3806_v17 = vmul.f32 0.2, %v3798_v4  ;;  %v3807_v37 = vmul.f32 0.2, %v3799_v8  ;;  %v3808_v33 = vmul.f32 0.2, %v3800_v13 }
 0x731   :  { %v3809_v34 = vmul.f32 0.2, %v3801_v5  ;;  %v3802_v44 = vmul.f32 0.2, %v3794_v12  ;;  %v3803_v27 = vmul.f32 0.2, %v3795_v15 }
 0x732   :  { %v6433_v25 = vmax.f32 %v3798_v4, %v3806_v17  ;;  %v6435_v29 = vmax.f32 %v3799_v8, %v3807_v37  ;;  %v6437_v36 = vmax.f32 %v3800_v13, %v3808_v33  ;;  %v6440_v43 = vmul.f32 0.2, %v6429_v16 }
 0x733   :  { %v6442_v42 = vmax.f32 %v3801_v5, %v3809_v34  ;;  %v6445_v14 = vmul.f32 0.2, %v6431_v20  ;;  %v6447_v19 = vmax.f32 %v3794_v12, %v3802_v44  ;;  %v6449_v45 = vmax.f32 %v3795_v15, %v3803_v27 }
 0x734   :  { %v3842_v35 = vrot.slane %v6433_v25, 4  ;;  %v3848_v38 = vrot.slane %v6435_v29, 4  ;;  %v3854_v50 = vrot.slane %v6437_v36, 4  ;;  %v3878_v30 = vmul.f32 %v6433_v25, %v6433_v25 }
 0x735   :  { %v3860_v48 = vrot.slane %v6442_v42, 4  ;;  %v3879_v11 = vmul.f32 %v6435_v29, %v6435_v29  ;;  %v3880_v47 = vmul.f32 %v6437_v36, %v6437_v36  ;;  %v3881_v32 = vmul.f32 %v6442_v42, %v6442_v42 }
 0x736   :  { %v3843_v41 = vadd.f32 %v3842_v35, %v6433_v25  ;;  %v3849_v7 = vadd.f32 %v3848_v38, %v6435_v29  ;;  %v3855_v39 = vadd.f32 %v3854_v50, %v6437_v36  ;;  %v3906_v40 = vrot.slane %v3878_v30, 4 }
 0x737   :  { %v3861_v63 = vadd.f32 %v3860_v48, %v6442_v42  ;;  %v3912_v54 = vrot.slane %v3879_v11, 4  ;;  %v3918_v9 = vrot.slane %v3880_v47, 4  ;;  %v3924_v61 = vrot.slane %v3881_v32, 4 }
 0x738   :  { %v3844_v60 = vrot.slane %v3843_v41, 2  ;;  %v3850_v52 = vrot.slane %v3849_v7, 2  ;;  %v3856_v53 = vrot.slane %v3855_v39, 2  ;;  %v3907_v55 = vadd.f32 %v3906_v40, %v3878_v30 }
 0x739   :  { %v3862_v56 = vrot.slane %v3861_v63, 2  ;;  %v3913_v6 = vadd.f32 %v3912_v54, %v3879_v11  ;;  %v3919_v62 = vadd.f32 %v3918_v9, %v3880_v47  ;;  %v3925_v46 = vadd.f32 %v3924_v61, %v3881_v32 }
 0x73a   :  { %v3845_v4 = vadd.f32 %v3844_v60, %v3843_v41  ;;  %v3851_v8 = vadd.f32 %v3850_v52, %v3849_v7  ;;  %v3857_v13 = vadd.f32 %v3856_v53, %v3855_v39  ;;  %v3908_v5 = vrot.slane %v3907_v55, 2 }
 0x73b   :  { %v3863_v12 = vadd.f32 %v3862_v56, %v3861_v63  ;;  %v3914_v15 = vrot.slane %v3913_v6, 2  ;;  %v3920_v17 = vrot.slane %v3919_v62, 2  ;;  %v3926_v37 = vrot.slane %v3925_v46, 2 }
 0x73c   :  { %v3846_v33 = vrot.slane %v3845_v4, 1  ;;  %v3852_v34 = vrot.slane %v3851_v8, 1  ;;  %v3858_v44 = vrot.slane %v3857_v13, 1  ;;  %v3909_v27 = vadd.f32 %v3908_v5, %v3907_v55 }
 0x73d   :  { %v3864_v35 = vrot.slane %v3863_v12, 1  ;;  %v3915_v38 = vadd.f32 %v3914_v15, %v3913_v6  ;;  %v3921_v50 = vadd.f32 %v3920_v17, %v3919_v62  ;;  %v3927_v30 = vadd.f32 %v3926_v37, %v3925_v46 }
 0x73e   :  { %v3847_v48 = vadd.f32 %v3846_v33, %v3845_v4  ;;  %v3853_v11 = vadd.f32 %v3852_v34, %v3851_v8  ;;  %v3859_v47 = vadd.f32 %v3858_v44, %v3857_v13  ;;  %v3910_v32 = vrot.slane %v3909_v27, 1 }
 0x73f   :  { %v3865_v41 = vadd.f32 %v3864_v35, %v3863_v12  ;;  %v3916_v7 = vrot.slane %v3915_v38, 1  ;;  %v3922_v39 = vrot.slane %v3921_v50, 1  ;;  %v3928_v40 = vrot.slane %v3927_v30, 1 }
 0x740   :  { %v6467_v63 = vmul.f32 0.125, %v3847_v48  ;;  %v6469_v54 = vmul.f32 0.125, %v3853_v11  ;;  %v6471_v9 = vmul.f32 0.125, %v3859_v47  ;;  %v3911_v61 = vadd.f32 %v3910_v32, %v3909_v27 }
 0x741   :  { %v6473_v60 = vmul.f32 0.125, %v3865_v41  ;;  %v3917_v52 = vadd.f32 %v3916_v7, %v3915_v38  ;;  %v3923_v53 = vadd.f32 %v3922_v39, %v3921_v50  ;;  %v3929_v55 = vadd.f32 %v3928_v40, %v3927_v30 }
 0x742   :  { %v3934_v56 = vmul.f32 0.125, %v3911_v61  ;;  %v3942_v6 = vmul.f32 %v6467_v63, %v6467_v63  ;;  %v3943_v62 = vmul.f32 %v6469_v54, %v6469_v54  ;;  %v3944_v46 = vmul.f32 %v6471_v9, %v6471_v9 }
 0x743   :  { %v3935_v4 = vmul.f32 0.125, %v3917_v52  ;;  %v3936_v8 = vmul.f32 0.125, %v3923_v53  ;;  %v3937_v13 = vmul.f32 0.125, %v3929_v55  ;;  %v3945_v5 = vmul.f32 %v6473_v60, %v6473_v60 }
 0x744   :  { %v3950_v12 = vsub.f32 %v3934_v56, %v3942_v6  ;;  %v6485_v15 = vmax.f32 %v6429_v16, %v6440_v43  ;;  %v6489_v17 = vmax.f32 %v6431_v20, %v6445_v14  ;;  %v3818_v37 = vrot.slane %v6447_v19, 4 }
 0x745   :  { %v3951_v33 = vsub.f32 %v3935_v4, %v3943_v62  ;;  %v3952_v34 = vsub.f32 %v3936_v8, %v3944_v46  ;;  %v3953_v44 = vsub.f32 %v3937_v13, %v3945_v5  ;;  %v3824_v27 = vrot.slane %v6449_v45, 4 }
 0x746   :  { %v3958_v35 = vadd.f32 0.8, %v3950_v12  ;;  %v3819_v38 = vadd.f32 %v3818_v37, %v6447_v19  ;;  %v3830_v50 = vrot.slane %v6485_v15, 4  ;;  %v3836_v30 = vrot.slane %v6489_v17, 4 }
 0x747   :  { %v3959_v16 = vadd.f32 0.8, %v3951_v33  ;;  %v3960_v43 = vadd.f32 0.8, %v3952_v34  ;;  %v3961_v48 = vadd.f32 0.8, %v3953_v44  ;;  %v3825_v20 = vadd.f32 %v3824_v27, %v6449_v45 }
 0x748   :  { %5637 = vrsqrt.f32 %v3958_v35  ;;  %v3820_v14 = vrot.slane %v3819_v38, 2  ;;  %v3831_v11 = vadd.f32 %v3830_v50, %v6485_v15  ;;  %v3837_v47 = vadd.f32 %v3836_v30, %v6489_v17 }
 0x749   :  { %5639 = vrsqrt.f32 %v3959_v16  ;;  %v3826_v32 = vrot.slane %v3825_v20, 2  ;;  %v3874_v41 = vmul.f32 %v6447_v19, %v6447_v19  ;;  %v3875_v7 = vmul.f32 %v6449_v45, %v6449_v45 }
 0x74a   :  { %5641 = vrsqrt.f32 %v3960_v43  ;;  %v3821_v39 = vadd.f32 %v3820_v14, %v3819_v38  ;;  %v3832_v40 = vrot.slane %v3831_v11, 2  ;;  %v3838_v61 = vrot.slane %v3837_v47, 2 }
 0x74b   :  { %5643 = vrsqrt.f32 %v3961_v48  ;;  %v3827_v52 = vadd.f32 %v3826_v32, %v3825_v20  ;;  %v3876_v53 = vmul.f32 %v6485_v15, %v6485_v15  ;;  %v3877_v55 = vmul.f32 %v6489_v17, %v6489_v17 }
 0x74c   :  { %v3822_v56 = vrot.slane %v3821_v39, 1  ;;  %v3833_v6 = vadd.f32 %v3832_v40, %v3831_v11  ;;  %v3839_v62 = vadd.f32 %v3838_v61, %v3837_v47  ;;  %v3882_v46 = vrot.slane %v3874_v41, 4 }
 0x74d   :  { %v3828_v4 = vrot.slane %v3827_v52, 1  ;;  %v3888_v8 = vrot.slane %v3875_v7, 4  ;;  %v3894_v13 = vrot.slane %v3876_v53, 4  ;;  %v3900_v5 = vrot.slane %v3877_v55, 4 }
 0x74e   :  { %v3823_v12 = vadd.f32 %v3822_v56, %v3821_v39  ;;  %v3834_v37 = vrot.slane %v3833_v6, 1  ;;  %v3840_v33 = vrot.slane %v3839_v62, 1  ;;  %v3883_v34 = vadd.f32 %v3882_v46, %v3874_v41 }
 0x74f   :  { %v3829_v44 = vadd.f32 %v3828_v4, %v3827_v52  ;;  %v3889_v27 = vadd.f32 %v3888_v8, %v3875_v7  ;;  %v3895_v35 = vadd.f32 %v3894_v13, %v3876_v53  ;;  %v3901_v38 = vadd.f32 %v3900_v5, %v3877_v55 }
 0x750   :  { %v3835_v50 = vadd.f32 %v3834_v37, %v3833_v6  ;;  %v3841_v30 = vadd.f32 %v3840_v33, %v3839_v62  ;;  %v6507_v16 = vmul.f32 0.125, %v3823_v12  ;;  %v3884_v43 = vrot.slane %v3883_v34, 2 }
 0x751   :  { %v6509_v48 = vmul.f32 0.125, %v3829_v44  ;;  %v3890_v20 = vrot.slane %v3889_v27, 2  ;;  %v3896_v14 = vrot.slane %v3895_v35, 2  ;;  %v3902_v11 = vrot.slane %v3901_v38, 2 }
 0x752   :  { %v5638_v47 = vpop.eup %5637  ;;  %v6511_v32 = vmul.f32 0.125, %v3835_v50  ;;  %v6513_v39 = vmul.f32 0.125, %v3841_v30  ;;  %v3885_v41 = vadd.f32 %v3884_v43, %v3883_v34  ;;  %v3938_v7 = vmul.f32 %v6507_v16, %v6507_v16 }
 0x753   :  { %v5640_v40 = vpop.eup %5639  ;;  %v3974_v61 = vmul.f32 %v5638_v47, %v6373_v0  ;;  %v3891_v52 = vadd.f32 %v3890_v20, %v3889_v27  ;;  %v3897_v53 = vadd.f32 %v3896_v14, %v3895_v35  ;;  %v3903_v55 = vadd.f32 %v3902_v11, %v3901_v38 }
 0x754   :  { %v5642_v56 = vpop.eup %5641  ;;  %v6519_v6 = vmul.f32 %v5640_v40, %v6381_v2  ;;  %v3886_v62 = vrot.slane %v3885_v41, 1  ;;  %v3939_v46 = vmul.f32 %v6509_v48, %v6509_v48  ;;  %v3940_v4 = vmul.f32 %v6511_v32, %v6511_v32 }
 0x755   :  { %v5644_v8 = vpop.eup %5643  ;;  %v3976_v13 = vmul.f32 %v5642_v56, %v6377_v1  ;;  %v3982_v5 = vmul.f32 %v3974_v61, %v6467_v63  ;;  %v3892_v0 = vrot.slane %v3891_v52, 1  ;;  %v3898_v12 = vrot.slane %v3897_v53, 1 }
 0x756   :  { %v6528_v37 = vmul.f32 %v5644_v8, %v6385_v3  ;;  %v3983_v2 = vmul.f32 %v6519_v6, %v6469_v54  ;;  %v3887_v33 = vadd.f32 %v3886_v62, %v3885_v41  ;;  %v3904_v34 = vrot.slane %v3903_v55, 1 }
 0x757   :  { %v3984_v44 = vmul.f32 %v3976_v13, %v6471_v9  ;;  %v3893_v27 = vadd.f32 %v3892_v0, %v3891_v52  ;;  %v3899_v35 = vadd.f32 %v3898_v12, %v3897_v53  ;;  %v3941_v38 = vmul.f32 %v6513_v39, %v6513_v39 }
 0x758   :  { %v3985_v1 = vmul.f32 %v6528_v37, %v6473_v60  ;;  %v3996_v63 = vcombine.low %v3982_v5, %v3983_v2  ;;  %v3905_v50 = vadd.f32 %v3904_v34, %v3903_v55  ;;  %v3930_v30 = vmul.f32 0.125, %v3887_v33 }
 0x759   :  { %v3931_v3 = vmul.f32 0.125, %v3893_v27  ;;  %v3932_v43 = vmul.f32 0.125, %v3899_v35  ;;  %v4064_v53 = vrot.slane %v3974_v61, %v6044_v10  ;;  %v4072_v55 = vrot.slane %v3976_v13, %v6044_v10 }
 0x75a   :  { %v3997_v20 = vcombine.low %v3984_v44, %v3985_v1  ;;  %v4018_v54 = vrot.slane %v3996_v63, %v6068_v18  ;;  %v3933_v14 = vmul.f32 0.125, %v3905_v50  ;;  %v3946_v11 = vsub.f32 %v3930_v30, %v3938_v7 }
 0x75b   :  { %v3947_v47 = vsub.f32 %v3931_v3, %v3939_v46  ;;  %v3948_v9 = vsub.f32 %v3932_v43, %v3940_v4  ;;  %v4081_v5 = vmul.f32 %v4064_v53, %v6433_v25  ;;  %v4083_v7 = vmul.f32 %v4072_v55, %v6437_v36  ;;  %v5565_v53 = vld [vmem:[#allocation11 + $0x100] sm:$0xff]   ;;  %v5569_v55 = vld [vmem:[#allocation11 + $0x108] sm:$0xff]  }
 0x75c   :  { %v4025_v41 = vrot.slane %v3997_v20, %v6068_v18  ;;  %v3949_v40 = vsub.f32 %v3933_v14, %v3941_v38  ;;  %v3954_v52 = vadd.f32 0.8, %v3946_v11 }
 0x75d   :  { %v3955_v56 = vadd.f32 0.8, %v3947_v47  ;;  %v3956_v60 = vadd.f32 0.8, %v3948_v9 }
 0x75e   :  { %v4027_v62 = vcombine.low %v4018_v54, %v4025_v41  ;;  %v3957_v8 = vadd.f32 0.8, %v3949_v40  ;;  %5645 = vrsqrt.f32 %v3954_v52 }
 0x75f   :  { %5647 = vrsqrt.f32 %v3955_v56 }
 0x760   :  { %5649 = vrsqrt.f32 %v3956_v60  ;;  %v4041_v1 = vrot.slane %v4027_v62, %v6068_v18  ;;  %v5570_v62 = vld [vmem:[#allocation11 + $0x188] sm:$0xff]  }
 0x761   :  { %5651 = vrsqrt.f32 %v3957_v8  ;;  %v5571_v8 = vld [vmem:[#allocation11 + $0x150] sm:$0xff]  }
 0x768   :  { %v5646_v46 = vpop.eup %5645 }
 0x769   :  { %v5648_v4 = vpop.eup %5647  ;;  %v3970_v0 = vmul.f32 %v5646_v46, %v6289_v21  ;;  %v5574_v46 = vld [vmem:[#allocation11 + $0x190] sm:$0xff]  }
 0x76a   :  { %v5650_v12 = vpop.eup %5649  ;;  %v3971_v61 = vmul.f32 %v5648_v4, %v6297_v24  ;;  %v5575_v4 = vld [vmem:[#allocation11 + $0x158] sm:$0xff]  }
 0x76b   :  { %v5652_v2 = vpop.eup %5651  ;;  %v3972_v13 = vmul.f32 %v5650_v12, %v6293_v23  ;;  %v3978_v33 = vmul.f32 %v3970_v0, %v6507_v16  ;;  %v4076_v16 = vrot.slane %v6528_v37, %v6044_v10  ;;  %v5577_v12 = vld [vmem:[#allocation11 + $0x118] sm:$0xff]  }
 0x76c   :  { %v3973_v34 = vmul.f32 %v5652_v2, %v6301_v26  ;;  %v3979_v25 = vmul.f32 %v3971_v61, %v6509_v48  ;;  %v4068_v26 = vrot.slane %v6519_v6, %v6044_v10  ;;  %v4052_v48 = vrot.slane %v3971_v61, %v6044_v10  ;;  %v5578_v61 = vld [vmem:[#allocation11 + $0x198] sm:$0xff]   ;;  %v5579_v2 = vld [vmem:[#allocation11 + $0x160] sm:$0xff]  }
 0x76d   :  { %v3980_v36 = vmul.f32 %v3972_v13, %v6511_v32  ;;  %v4056_v63 = vrot.slane %v3972_v13, %v6044_v10  ;;  %v5580_v13 = vld [vmem:[#allocation11 + $0x1e0] sm:$0xff]  }
 0x76e   :  { %v3981_v44 = vmul.f32 %v3973_v34, %v6513_v39  ;;  %v3994_v27 = vcombine.low %v3978_v33, %v3979_v25  ;;  %v4060_v32 = vrot.slane %v3973_v34, %v6044_v10  ;;  %v4048_v39 = vrot.slane %v3970_v0, %v6044_v10  ;;  %v5576_v0 = vld [vmem:[#allocation11 + $0x1d8] sm:$0xff]   ;;  %v5581_v33 = vld [vmem:[#allocation11 + $0x120] sm:$0xff]   ;;  %v5583_v25 = vld [vmem:[#allocation11 + $0x168] sm:$0xff]  }
 0x76f   :  { %v4082_v3 = vmul.f32 %v4068_v26, %v6435_v29  ;;  %v4078_v6 = vmul.f32 %v4052_v48, %v6449_v45  ;;  %v4079_v20 = vmul.f32 %v4056_v63, %v6485_v15  ;;  %v5582_v34 = vld [vmem:[#allocation11 + $0x1a0] sm:$0xff]   ;;  %v5593_v26 = vld [vmem:[#allocation11 + $0x138] sm:$0xff]  }
 0x770   :  { %v3995_v35 = vcombine.low %v3980_v36, %v3981_v44  ;;  %v4004_v21 = vrot.slane %v3994_v27, %v6068_v18  ;;  %v4080_v43 = vmul.f32 %v4060_v32, %v6489_v17  ;;  %v4077_v37 = vmul.f32 %v4048_v39, %v6447_v19  ;;  %v5584_v36 = vld [vmem:[#allocation11 + $0x1e8] sm:$0xff]  }
 0x771   :  { %v5585_v44 = vld [vmem:[#allocation11 + $0x128] sm:$0xff]  }
 0x772   :  { %v4011_v38 = vrot.slane %v3995_v35, %v6068_v18  ;;  %v5586_v27 = vld [vmem:[#allocation11 + $0x1a8] sm:$0xff]   ;;  %v5587_v35 = vld [vmem:[#allocation11 + $0x170] sm:$0xff]  }
 0x774   :  { %v4026_v24 = vcombine.low %v4004_v21, %v4011_v38  ;;  %v5588_v21 = vld [vmem:[#allocation11 + $0x1f0] sm:$0xff]  }
 0x775   :  { %v5589_v38 = vld [vmem:[#allocation11 + $0x130] sm:$0xff]  }
 0x776   :  { %v4034_v23 = vrot.slane %v4026_v24, %v6068_v18  ;;  %v4084_v18 = vmul.f32 %v4076_v16, %v6442_v42  ;;  %v5590_v24 = vld [vmem:[#allocation11 + $0x1b0] sm:$0xff]   ;;  %v5594_v16 = vld [vmem:[#allocation11 + $0x1b8] sm:$0xff]  }
 0x778   :  { %v4042_v50 = vcombine.low %v4034_v23, %v4041_v1  ;;  %v5591_v1 = vld [vmem:[#allocation11 + $0x178] sm:$0xff]  }
 0x779   :  { %v5592_v23 = vld [vmem:[#allocation11 + $0x1f8] sm:$0xff]  }
 0x77a   :  { %v4044_v30 = vsub.f32 %v6409_v57, %v4042_v50  ;;  %v5183_v50 = vld [vmem:[#allocation13 + $0x3c] ss:$0 sm:$0xff] }
 0x77c   :  { %v4093_v54 = vrot.slane %v4044_v30, %v6049_v22  ;;  %v4101_v14 = vrot.slane %v4044_v30, %v6109_v51  ;;  %v4089_v11 = vrot.slane %v4044_v30, %v6044_v10  ;;  %v4097_v57 = vrot.slane %v4044_v30, %v6106_v49 }
 0x77d   :  { %v4109_v29 = vrot.slane %v4044_v30, %v6334_v31  ;;  %v4117_v42 = vrot.slane %v4044_v30, %v6337_v59  ;;  %v4105_v45 = vrot.slane %v4044_v30, %v6328_v28  ;;  %v4113_v17 = vrot.slane %v4044_v30, %v6331_v58  ;;  %v5566_v59 = vld [vmem:[#allocation11 + $0x180] sm:$0xff]   ;;  %v5567_v28 = vld [vmem:[#allocation11 + $0x148] sm:$0xff]  }
 0x77e   :  { %v4127_v47 = vadd.f32 %v4093_v54, %v4078_v6  ;;  %v4129_v19 = vadd.f32 %v4101_v14, %v4080_v43  ;;  %v4126_v9 = vadd.f32 %v4089_v11, %v4077_v37  ;;  %v4128_v15 = vadd.f32 %v4097_v57, %v4079_v20  ;;  %v5568_v58 = vld [vmem:[#allocation11 + $0x1c8] sm:$0xff]  }
 0x77f   :  { %v4131_v41 = vadd.f32 %v4109_v29, %v4082_v3  ;;  %v4133_v22 = vadd.f32 %v4117_v42, %v4084_v18  ;;  %v6578_v40 = vadd.f32 %v4105_v45, %v4081_v5  ;;  %v6580_v51 = vadd.f32 %v4113_v17, %v4083_v7  ;;  %v5572_v5 = vld [vmem:[#allocation11 + $0x1d0] sm:$0xff]  }
 0x780   :  { %v4136_v10 = vpack.c.bf16 %v4127_v47, %v4127_v47  ;;  %v4138_v49 = vpack.c.bf16 %v4129_v19, %v4129_v19  ;;  %v4135_v52 = vpack.c.bf16 %v4126_v9, %v4126_v9  ;;  %v4137_v31 = vpack.c.bf16 %v4128_v15, %v4128_v15  ;;  %v5573_v7 = vld [vmem:[#allocation11 + $0x110] sm:$0xff]  }
 0x781   :  { %v4140_v56 = vpack.c.bf16 %v4131_v41, %v4131_v41  ;;  %v4142_v60 = vpack.c.bf16 %v4133_v22, %v4133_v22  ;;  %v4139_v48 = vpack.c.bf16 %v6578_v40, %v6578_v40  ;;  %v4141_v32 = vpack.c.bf16 %v6580_v51, %v6580_v51 }
 0x782   :  { %4691 = vmatprep.mubr.bf16.mxu0 %v4136_v10  ;;  %4731 = vmatprep.mubr.bf16.mxu1 %v4138_v49 }
 0x783   :  { %4692 = vmatmul.mubr.bf16.vlgmr.msra.gmra.mrb[24].mxu0 %v4135_v52  ;;  %4732 = vmatmul.mubr.bf16.vlgmr.msra.gmra.mrb[16].mxu1 %v4137_v31 }
 0x784   :  { %5300 = vmatpush3.bf16.msra.mxu0 %v5565_v53  ;;  %5322 = vmatpush3.bf16.msra.mxu1 %v5566_v59 }
 0x785   :  { %4771 = vmatprep.mubr.bf16.mxu0 %v4140_v56  ;;  %4811 = vmatprep.mubr.bf16.mxu1 %v4142_v60 }
 0x786   :  { %5301 = vmatprep.subr.bf16.mxu0 %v5567_v28  ;;  %5323 = vmatprep.subr.bf16.mxu1 %v5568_v58 }
 0x788   :  { %5302 = vmatpush3.bf16.msra.mxu0 %v5569_v55  ;;  %5324 = vmatpush3.bf16.msra.mxu1 %v5570_v62 }
 0x789   :  { %5303 = vmatprep.subr.bf16.mxu0 %v5571_v8  ;;  %5325 = vmatprep.subr.bf16.mxu1 %v5572_v5 }
 0x78c   :  { %5304 = vmatpush3.bf16.msra.mxu0 %v5573_v7  ;;  %5326 = vmatpush3.bf16.msra.mxu1 %v5574_v46 }
 0x78d   :  { %5305 = vmatprep.subr.bf16.mxu0 %v5575_v4  ;;  %5327 = vmatprep.subr.bf16.mxu1 %v5576_v0 }
 0x790   :  { %5306 = vmatpush3.bf16.msra.mxu0 %v5577_v12  ;;  %5328 = vmatpush3.bf16.msra.mxu1 %v5578_v61 }
 0x791   :  { %5307 = vmatprep.subr.bf16.mxu0 %v5579_v2  ;;  %5329 = vmatprep.subr.bf16.mxu1 %v5580_v13 }
 0x794   :  { %5308 = vmatpush3.bf16.msra.mxu0 %v5581_v33  ;;  %5330 = vmatpush3.bf16.msra.mxu1 %v5582_v34 }
 0x795   :  { %5309 = vmatprep.subr.bf16.mxu0 %v5583_v25  ;;  %5331 = vmatprep.subr.bf16.mxu1 %v5584_v36 }
 0x798   :  { %5310 = vmatpush3.bf16.msra.mxu0 %v5585_v44  ;;  %5332 = vmatpush3.bf16.msra.mxu1 %v5586_v27 }
 0x799   :  { %5311 = vmatprep.subr.bf16.mxu0 %v5587_v35  ;;  %5333 = vmatprep.subr.bf16.mxu1 %v5588_v21 }
 0x79c   :  { %5312 = vmatpush3.bf16.msra.mxu0 %v5589_v38  ;;  %5334 = vmatpush3.bf16.msra.mxu1 %v5590_v24 }
 0x79d   :  { %5313 = vmatprep.subr.bf16.mxu0 %v5591_v1  ;;  %5335 = vmatprep.subr.bf16.mxu1 %v5592_v23 }
 0x7a0   :  { %5314 = vmatpush3.bf16.msra.mxu0 %v5593_v26  ;;  %5336 = vmatpush3.bf16.msra.mxu1 %v5594_v16 }
 0x7a3   :  { %4772 = vmatmul.mubr.bf16.vlgmr.msra.gmra.mrb[28].mxu0 %v4139_v48  ;;  %4812 = vmatmul.mubr.bf16.vlgmr.msra.gmra.mrb[20].mxu1 %v4141_v32 }
 0x856   :  { %v5271_v39 = vpop.f32.mrb[24].mxu0  ;;  %v5293_v63 = vpop.f32.mrb[16].mxu1 }
 0x857   :  { %v5272_v30 = vpop.f32.mrb[25].mxu0  ;;  %v5294_v3 = vpop.f32.mrb[17].mxu1 }
 0x858   :  { %v5273_v18 = vadd.f32 %v5272_v30, %v5271_v39  ;;  %v5295_v6 = vadd.f32 %v5294_v3, %v5293_v63  ;;  %v5274_v43 = vpop.f32.mrb[26].mxu0  ;;  %v5296_v37 = vpop.f32.mrb[18].mxu1 }
 0x859   :  { %v5275_v20 = vpop.f32.mrb[27].mxu0  ;;  %v5297_v54 = vpop.f32.mrb[19].mxu1 }
 0x85a   :  { %v4694_v14 = vadd.f32 %v5273_v18, %v5183_v50 }
 0x85c   :  { %v4734_v11 = vadd.f32 %v5295_v6, %v4694_v14 }
 0x876   :  { %v5315_v57 = vpop.f32.mrb[28].mxu0  ;;  %v5337_v29 = vpop.f32.mrb[20].mxu1 }
 0x877   :  { %v5316_v42 = vpop.f32.mrb[29].mxu0  ;;  %v5338_v45 = vpop.f32.mrb[21].mxu1 }
 0x878   :  { %v5317_v17 = vadd.f32 %v5316_v42, %v5315_v57  ;;  %v5339_v47 = vadd.f32 %v5338_v45, %v5337_v29  ;;  %v5318_v19 = vpop.f32.mrb[30].mxu0  ;;  %v5340_v9 = vpop.f32.mrb[22].mxu1 }
 0x879   :  { %v5319_v15 = vpop.f32.mrb[31].mxu0  ;;  %v5341_v41 = vpop.f32.mrb[23].mxu1 }
 0x87a   :  { %v4774_v22 = vadd.f32 %v5317_v17, %v4734_v11 }
 0x87c   :  { %v4814_v40 = vadd.f32 %v5339_v47, %v4774_v22 }
 0x87e   :  { %5653 = vtanh.f32 %v4814_v40 }
 0x888   :  { %v5654_v51 = vpop.eup %5653 }
 0x889   :  { %4820 = vst [vmem:[#allocation14] sm:$0xff] %v5654_v51 }
 0x88a   :  { %5820 = shalt.err (!%p5817_p4)
}
 0x88b   :  { %s5821_s21 = scalar_lea.hbm %s6608_s10, 128 }
 0x88c   :  { %p5822_p5 = scmp.ne.s32.totalorder %s6608_s10, %s5821_s21  ;;  %p5825_p6 = scmp.lt.u32.totalorder %s5821_s21, %s6608_s10 }
 0x88e   :  { %p5827_p7 = pnand %p5825_p6, %p5822_p5 }
 0x890   :  { %5830 = shalt.err (!%p5827_p7)
}
 0x891   :  { %4830 = dma.vmem_to_hbm [thread:$0]  %s4828_s4, 128, %s6608_s10, [#allocation4]  }
 0x892   :  { %5839 = dma.done.wait [#allocation4], 128  }
 0x893   :  { %5840 = vsyncadd [#allocation4], 4294967168 }
 0x894   :  { %4834 = vsyncpa [#allocation3], 1 }
 0x895   :  { %4835 = vsyncpa [#allocation6], 1 }
 0x896   :  { %4836 = vsyncpa [#allocation9], 1 }
 0x897   :  { %4837 = vsyncpa [#allocation12], 1 }
 0x898   :  { %4838 = vsyncpa [#allocation4], 1 }

</bundles_post_ra>
